<compile_context>
chip_gen: v7x
topology: tpu7x:2x2x1
jax: 0.10.0
libtpu: 0.0.40
codegen_flags: <defaults>
</compile_context>

<pallas_src>
import functools

import jax
import jax.numpy as jnp
import numpy as np
from jax.experimental import pallas as pl
from jax.experimental.pallas import tpu as pltpu

EPS = 1e-5
NEG_SLOPE = 0.2
VMEM_LIMIT = 32 * 1024 * 1024  # explicit scoped-VMEM limit, safe on v5e/v6e/v7x


# ------------------------------ in-kernel helpers ----------------------------
def _pad_hw(x):
    """Zero-pad (1, H, W, C) -> (1, H+2, W+2, C) entirely in VMEM."""
    _, H, W, C = x.shape
    zr = jnp.zeros((1, 1, W, C), x.dtype)
    xp = jnp.concatenate([zr, x, zr], axis=1)        # pad H (leading dim)
    zc = jnp.zeros((1, H + 2, 1, C), x.dtype)
    return jnp.concatenate([zc, xp, zc], axis=2)     # pad W


def _conv3x3(x, w_flat):
    """3x3 / pad=1 conv of one image.

    x: (1, H, W, C) f32 value; w_flat: (9*C, Cout) with row index = tap*C + ci.
    Returns (H*W, Cout) f32.  The nine taps are packed into the contraction
    dimension (im2col) so the MXU sees one K=9*C matmul instead of nine K=C ones.
    """
    _, H, W, C = x.shape
    xp = _pad_hw(x)
    cols = []
    for kh in range(3):
        for kw in range(3):
            cols.append(xp[:, kh:kh + H, kw:kw + W, :].reshape(H * W, C))
    patch = jnp.concatenate(cols, axis=1)            # (H*W, 9*C)
    return jnp.dot(patch, w_flat, preferred_element_type=jnp.float32)


def _partial_moments(acc):
    """Per-channel (sum, sum-of-squares) of an (HW, C) tile -> (2, C)."""
    s1 = jnp.sum(acc, axis=0, keepdims=True)
    s2 = jnp.sum(acc * acc, axis=0, keepdims=True)
    return jnp.concatenate([s1, s2], axis=0)


def _bn_scale_shift(stats, gamma, beta, count):
    """Fold training-mode BatchNorm into one per-channel scale/shift (f32)."""
    inv_n = 1.0 / float(count)
    mean = stats[0:1, :] * inv_n
    var = stats[1:2, :] * inv_n - mean * mean        # biased variance, one pass
    scale = gamma * jax.lax.rsqrt(var + EPS)
    shift = beta - mean * scale
    return scale, shift


# ---------------------------------- kernels -----------------------------------
def _conv1_kernel(x_ref, w1_ref, c1_ref, st1_ref):
    """Pass 1: conv1 on one image + accumulate global BN1 moments."""
    n = pl.program_id(0)
    acc = _conv3x3(x_ref[...], w1_ref[...])          # (H*W, C) f32

    @pl.when(n == 0)
    def _():
        st1_ref[...] = jnp.zeros_like(st1_ref)

    st1_ref[...] = st1_ref[...] + _partial_moments(acc)
    c1_ref[...] = acc.reshape(c1_ref.shape)


def _bn1_conv2_kernel(c1_ref, st1_ref, g1_ref, bt1_ref, w2_ref, c2_ref, st2_ref,
                      *, h, w, c, count):
    """Pass 2: folded BN1 + LeakyReLU(0.2) + conv2 + accumulate BN2 moments."""
    n = pl.program_id(0)
    scale, shift = _bn_scale_shift(st1_ref[...], g1_ref[...], bt1_ref[...], count)
    y = c1_ref[...].reshape(h * w, c) * scale + shift
    y = jnp.where(y >= 0, y, NEG_SLOPE * y)          # LeakyReLU(0.2)
    acc = _conv3x3(y.reshape(1, h, w, c), w2_ref[...])

    @pl.when(n == 0)
    def _():
        st2_ref[...] = jnp.zeros_like(st2_ref)

    st2_ref[...] = st2_ref[...] + _partial_moments(acc)
    c2_ref[...] = acc.reshape(c2_ref.shape)


def _bn2_add_kernel(c2_ref, st2_ref, g2_ref, bt2_ref, x_ref, o_ref,
                    *, h, w, c, count):
    """Pass 3: folded BN2 + residual add."""
    scale, shift = _bn_scale_shift(st2_ref[...], g2_ref[...], bt2_ref[...], count)
    z = c2_ref[...].reshape(h * w, c) * scale + shift
    out = x_ref[...].reshape(h * w, c) + z
    o_ref[...] = out.reshape(o_ref.shape)


# ---------------------------------- wrapper ------------------------------------
def _const_spec(shape):
    """Whole-array operand: DMA'd once and kept resident across the grid."""
    return pl.BlockSpec(shape, lambda n: (0,) * len(shape))


@jax.jit
def residual_block_nhwc(x, w1, b1, g1, beta1, w2, b2, g2, beta2):
    """x: (N, H, W, C) f32.  w1/w2: (9, C, C) tap-major.  b1/b2 unused (the
    conv bias is exactly cancelled by the BatchNorm mean subtraction)."""
    del b1, b2
    N, H, W, C = x.shape
    count = N * H * W
    w1f = w1.reshape(9 * C, C)
    w2f = w2.reshape(9 * C, C)

    img_spec = pl.BlockSpec((1, H, W, C), lambda n: (n, 0, 0, 0))
    mid_spec = pl.BlockSpec((1, H * W, C), lambda n: (n, 0, 0))
    stat_spec = _const_spec((2, C))

    acc_params = pltpu.CompilerParams(
        dimension_semantics=("arbitrary",),          # moments accumulate across n
        vmem_limit_bytes=VMEM_LIMIT)
    par_params = pltpu.CompilerParams(
        dimension_semantics=("parallel",),
        vmem_limit_bytes=VMEM_LIMIT)

    # Pass 1: conv1 (batch-tiled, pipelined DMAs) + BN1 moments.
    c1, st1 = pl.pallas_call(
        _conv1_kernel,
        grid=(N,),
        in_specs=[img_spec, _const_spec((9 * C, C))],
        out_specs=(mid_spec, stat_spec),
        out_shape=(jax.ShapeDtypeStruct((N, H * W, C), jnp.float32),
                   jax.ShapeDtypeStruct((2, C), jnp.float32)),
        compiler_params=acc_params,
    )(x, w1f)

    # Pass 2: folded BN1 + LeakyReLU + conv2 + BN2 moments.
    kern2 = functools.partial(_bn1_conv2_kernel, h=H, w=W, c=C, count=count)
    c2, st2 = pl.pallas_call(
        kern2,
        grid=(N,),
        in_specs=[mid_spec, stat_spec, _const_spec((1, C)), _const_spec((1, C)),
                  _const_spec((9 * C, C))],
        out_specs=(mid_spec, stat_spec),
        out_shape=(jax.ShapeDtypeStruct((N, H * W, C), jnp.float32),
                   jax.ShapeDtypeStruct((2, C), jnp.float32)),
        compiler_params=acc_params,
    )(c1, st1, g1, beta1, w2f)

    # Pass 3: folded BN2 + residual add.
    kern3 = functools.partial(_bn2_add_kernel, h=H, w=W, c=C, count=count)
    out = pl.pallas_call(
        kern3,
        grid=(N,),
        in_specs=[mid_spec, stat_spec, _const_spec((1, C)), _const_spec((1, C)),
                  img_spec],
        out_specs=mid_spec,
        out_shape=jax.ShapeDtypeStruct((N, H * W, C), jnp.float32),
        compiler_params=par_params,
    )(c2, st2, g2, beta2, x)

    return out.reshape(N, H, W, C)


# ---------------- pure-JAX reference (for correctness check) -----------------
def _reference(x, w1, b1, g1, beta1, w2, b2, g2, beta2):
    def conv(x, w_taps, b):
        w_hwio = w_taps.reshape(3, 3, x.shape[-1], -1)
        y = jax.lax.conv_general_dilated(
            x, w_hwio, window_strides=(1, 1), padding="SAME",
            dimension_numbers=("NHWC", "HWIO", "NHWC"),
            precision=jax.lax.Precision.HIGHEST)
        return y + b.reshape(1, 1, 1, -1)

    def bn(y, g, beta):
        mean = jnp.mean(y, axis=(0, 1, 2), keepdims=True)
        var = jnp.mean(jnp.square(y - mean), axis=(0, 1, 2), keepdims=True)
        return (y - mean) * jax.lax.rsqrt(var + EPS) * g.reshape(1, 1, 1, -1) \
            + beta.reshape(1, 1, 1, -1)

    y = bn(conv(x, w1, b1), g1, beta1)
    y = jnp.where(y >= 0, y, NEG_SLOPE * y)
    z = bn(conv(y, w2, b2), g2, beta2)
    return x + z


if __name__ == "__main__":
    # Small shapes consistent with the module (in_channels == out_channels so
    # the residual add is well-defined): N=2, C=4, H=W=16.
    N, C, H, W = 2, 4, 16, 16
    key = jax.random.PRNGKey(0)
    ks = jax.random.split(key, 10)

    # PyTorch-convention NCHW input, transposed to the kernel's NHWC layout.
    x_nchw = jax.random.normal(ks[0], (N, C, H, W), jnp.float32)
    x = jnp.transpose(x_nchw, (0, 2, 3, 1))  # NHWC

    # Deterministic synthetic parameters (shapes from ResidualBlock.__init__).
    # Conv weights in tap-major layout (9, Cin, Cout); biases / BN params (1, C).
    w1 = 0.1 * jax.random.normal(ks[1], (9, C, C), jnp.float32)
    b1 = 0.1 * jax.random.normal(ks[2], (1, C), jnp.float32)
    g1 = 1.0 + 0.1 * jax.random.normal(ks[3], (1, C), jnp.float32)
    beta1 = 0.1 * jax.random.normal(ks[4], (1, C), jnp.float32)
    w2 = 0.1 * jax.random.normal(ks[5], (9, C, C), jnp.float32)
    b2 = 0.1 * jax.random.normal(ks[6], (1, C), jnp.float32)
    g2 = 1.0 + 0.1 * jax.random.normal(ks[7], (1, C), jnp.float32)
    beta2 = 0.1 * jax.random.normal(ks[8], (1, C), jnp.float32)

    out = residual_block_nhwc(x, w1, b1, g1, beta1, w2, b2, g2, beta2)
    out = jax.block_until_ready(out)

    ref = _reference(x, w1, b1, g1, beta1, w2, b2, g2, beta2)
    np.testing.assert_allclose(np.asarray(out), np.asarray(ref),
                               rtol=1e-3, atol=1e-3)
    print("KERNEL_OK")
</pallas_src>

<mosaic_0001>
module attributes {stable_mosaic.version = 11 : i64} {
  func.func @_conv1_kernel(%arg0: i32, %arg1: memref<1x16x16x4xf32, #tpu.memory_space<vmem>>, %arg2: memref<36x4xf32, #tpu.memory_space<vmem>>, %arg3: memref<1x256x4xf32, #tpu.memory_space<vmem>>, %arg4: memref<2x4xf32, #tpu.memory_space<vmem>>) attributes {dimension_semantics = [#tpu.dimension_semantics<arbitrary>], iteration_bounds = array<i64: 2>, scalar_prefetch = 0 : i64, scratch_operands = 0 : i64, tpu.core_type = #tpu.core_type<tc>, window_params = [{transform_indices = @transform_0, window_bounds = array<i64: 1, 16, 16, 4>}, {pipeline_mode = #tpu.pipeline_mode<synchronous>, transform_indices = @transform_1, window_bounds = array<i64: 36, 4>}, {transform_indices = @transform_2, window_bounds = array<i64: 1, 256, 4>}, {pipeline_mode = #tpu.pipeline_mode<synchronous>, transform_indices = @transform_3, window_bounds = array<i64: 2, 4>}]} {
    %c0 = arith.constant 0 : index
    %c0_0 = arith.constant 0 : index
    %c0_1 = arith.constant 0 : index
    %c0_2 = arith.constant 0 : index
    %0 = vector.load %arg1[%c0, %c0_0, %c0_1, %c0_2] : memref<1x16x16x4xf32, #tpu.memory_space<vmem>>, vector<1x16x16x4xf32>
    %c0_3 = arith.constant 0 : index
    %c0_4 = arith.constant 0 : index
    %1 = vector.load %arg2[%c0_3, %c0_4] : memref<36x4xf32, #tpu.memory_space<vmem>>, vector<36x4xf32>
    %cst = arith.constant 0.000000e+00 : f32
    %2 = vector.broadcast %cst : f32 to vector<1x1x16x4xf32>
    %3 = tpu.concatenate %2, %0, %2 in 1 : vector<1x1x16x4xf32>, vector<1x16x16x4xf32>, vector<1x1x16x4xf32> -> vector<1x18x16x4xf32>
    %cst_5 = arith.constant 0.000000e+00 : f32
    %4 = vector.broadcast %cst_5 : f32 to vector<1x18x1x4xf32>
    %5 = tpu.concatenate %4, %3, %4 in 2 : vector<1x18x1x4xf32>, vector<1x18x16x4xf32>, vector<1x18x1x4xf32> -> vector<1x18x18x4xf32>
    %6 = vector.extract_strided_slice %5 {offsets = [0, 0, 0, 0], sizes = [1, 16, 16, 4], strides = [1, 1, 1, 1]} : vector<1x18x18x4xf32> to vector<1x16x16x4xf32>
    %7 = vector.shape_cast %6 : vector<1x16x16x4xf32> to vector<256x4xf32>
    %8 = vector.extract_strided_slice %5 {offsets = [0, 0, 1, 0], sizes = [1, 16, 16, 4], strides = [1, 1, 1, 1]} : vector<1x18x18x4xf32> to vector<1x16x16x4xf32>
    %9 = vector.shape_cast %8 : vector<1x16x16x4xf32> to vector<256x4xf32>
    %10 = vector.extract_strided_slice %5 {offsets = [0, 0, 2, 0], sizes = [1, 16, 16, 4], strides = [1, 1, 1, 1]} : vector<1x18x18x4xf32> to vector<1x16x16x4xf32>
    %11 = vector.shape_cast %10 : vector<1x16x16x4xf32> to vector<256x4xf32>
    %12 = vector.extract_strided_slice %5 {offsets = [0, 1, 0, 0], sizes = [1, 16, 16, 4], strides = [1, 1, 1, 1]} : vector<1x18x18x4xf32> to vector<1x16x16x4xf32>
    %13 = vector.shape_cast %12 : vector<1x16x16x4xf32> to vector<256x4xf32>
    %14 = vector.extract_strided_slice %5 {offsets = [0, 1, 1, 0], sizes = [1, 16, 16, 4], strides = [1, 1, 1, 1]} : vector<1x18x18x4xf32> to vector<1x16x16x4xf32>
    %15 = vector.shape_cast %14 : vector<1x16x16x4xf32> to vector<256x4xf32>
    %16 = vector.extract_strided_slice %5 {offsets = [0, 1, 2, 0], sizes = [1, 16, 16, 4], strides = [1, 1, 1, 1]} : vector<1x18x18x4xf32> to vector<1x16x16x4xf32>
    %17 = vector.shape_cast %16 : vector<1x16x16x4xf32> to vector<256x4xf32>
    %18 = vector.extract_strided_slice %5 {offsets = [0, 2, 0, 0], sizes = [1, 16, 16, 4], strides = [1, 1, 1, 1]} : vector<1x18x18x4xf32> to vector<1x16x16x4xf32>
    %19 = vector.shape_cast %18 : vector<1x16x16x4xf32> to vector<256x4xf32>
    %20 = vector.extract_strided_slice %5 {offsets = [0, 2, 1, 0], sizes = [1, 16, 16, 4], strides = [1, 1, 1, 1]} : vector<1x18x18x4xf32> to vector<1x16x16x4xf32>
    %21 = vector.shape_cast %20 : vector<1x16x16x4xf32> to vector<256x4xf32>
    %22 = vector.extract_strided_slice %5 {offsets = [0, 2, 2, 0], sizes = [1, 16, 16, 4], strides = [1, 1, 1, 1]} : vector<1x18x18x4xf32> to vector<1x16x16x4xf32>
    %23 = vector.shape_cast %22 : vector<1x16x16x4xf32> to vector<256x4xf32>
    %24 = tpu.concatenate %7, %9, %11, %13, %15, %17, %19, %21, %23 in 1 : vector<256x4xf32>, vector<256x4xf32>, vector<256x4xf32>, vector<256x4xf32>, vector<256x4xf32>, vector<256x4xf32>, vector<256x4xf32>, vector<256x4xf32>, vector<256x4xf32> -> vector<256x36xf32>
    %cst_6 = arith.constant dense<0.000000e+00> : vector<256x4xf32>
    %25 = tpu.matmul %24, %1, %cst_6 {dimension_numbers = #tpu.dot_dimension_numbers<[1], [0], [0], [1], [0, 0, 1, 1], [], []>} : vector<256x36xf32>, vector<36x4xf32>, vector<256x4xf32> -> vector<256x4xf32>
    %c0_i32 = arith.constant 0 : i32
    %26 = arith.cmpi eq, %arg0, %c0_i32 : i32
    %27 = arith.extui %26 : i1 to i32
    %c0_i32_7 = arith.constant 0 : i32
    %28 = arith.cmpi ne, %27, %c0_i32_7 : i32
    scf.if %28 {
      %cst_17 = arith.constant 0.000000e+00 : f32
      %40 = vector.broadcast %cst_17 : f32 to vector<2x4xf32>
      %c0_18 = arith.constant 0 : index
      %c0_19 = arith.constant 0 : index
      %41 = vector.load %arg4[%c0_18, %c0_19] : memref<2x4xf32, #tpu.memory_space<vmem>>, vector<2x4xf32>
      tpu.vector_store %arg4[%c0_18, %c0_19], %40 {strides = array<i32>} : memref<2x4xf32, #tpu.memory_space<vmem>>, vector<2x4xf32>,
    } else {
    }
    %c0_8 = arith.constant 0 : index
    %c0_9 = arith.constant 0 : index
    %29 = vector.load %arg4[%c0_8, %c0_9] : memref<2x4xf32, #tpu.memory_space<vmem>>, vector<2x4xf32>
    %cst_10 = arith.constant dense<0.000000e+00> : vector<4xf32>
    %30 = vector.multi_reduction <add>, %25, %cst_10 [0] : vector<256x4xf32> to vector<4xf32>
    %31 = vector.shape_cast %30 : vector<4xf32> to vector<1x4xf32>
    %32 = arith.mulf %25, %25 : vector<256x4xf32>
    %cst_11 = arith.constant dense<0.000000e+00> : vector<4xf32>
    %33 = vector.multi_reduction <add>, %32, %cst_11 [0] : vector<256x4xf32> to vector<4xf32>
    %34 = vector.shape_cast %33 : vector<4xf32> to vector<1x4xf32>
    %35 = tpu.concatenate %31, %34 in 0 : vector<1x4xf32>, vector<1x4xf32> -> vector<2x4xf32>
    %36 = arith.addf %29, %35 : vector<2x4xf32>
    %c0_12 = arith.constant 0 : index
    %c0_13 = arith.constant 0 : index
    %37 = vector.load %arg4[%c0_12, %c0_13] : memref<2x4xf32, #tpu.memory_space<vmem>>, vector<2x4xf32>
    tpu.vector_store %arg4[%c0_12, %c0_13], %36 {strides = array<i32>} : memref<2x4xf32, #tpu.memory_space<vmem>>, vector<2x4xf32>,
    %38 = vector.shape_cast %25 : vector<256x4xf32> to vector<1x256x4xf32>
    %c0_14 = arith.constant 0 : index
    %c0_15 = arith.constant 0 : index
    %c0_16 = arith.constant 0 : index
    %39 = vector.load %arg3[%c0_14, %c0_15, %c0_16] : memref<1x256x4xf32, #tpu.memory_space<vmem>>, vector<1x256x4xf32>
    tpu.vector_store %arg3[%c0_14, %c0_15, %c0_16], %38 {strides = array<i32>} : memref<1x256x4xf32, #tpu.memory_space<vmem>>, vector<1x256x4xf32>,
    return
  }
  func.func @transform_0(%arg0: i32) -> (i32, i32, i32, i32) {
    %c0_i32 = arith.constant 0 : i32
    %c0_i32_0 = arith.constant 0 : i32
    %c0_i32_1 = arith.constant 0 : i32
    %c0_i32_2 = arith.constant 0 : i32
    return %arg0, %c0_i32, %c0_i32_0, %c0_i32_1 : i32, i32, i32, i32
  }
  func.func @transform_1(%arg0: i32) -> (i32, i32) {
    %c0_i32 = arith.constant 0 : i32
    %c0_i32_0 = arith.constant 0 : i32
    %c0_i32_1 = arith.constant 0 : i32
    return %c0_i32, %c0_i32_0 : i32, i32
  }
  func.func @transform_2(%arg0: i32) -> (i32, i32, i32) {
    %c0_i32 = arith.constant 0 : i32
    %c0_i32_0 = arith.constant 0 : i32
    %c0_i32_1 = arith.constant 0 : i32
    return %arg0, %c0_i32, %c0_i32_0 : i32, i32, i32
  }
  func.func @transform_3(%arg0: i32) -> (i32, i32) {
    %c0_i32 = arith.constant 0 : i32
    %c0_i32_0 = arith.constant 0 : i32
    %c0_i32_1 = arith.constant 0 : i32
    return %c0_i32, %c0_i32_0 : i32, i32
  }
}

module attributes {stable_mosaic.version = 11 : i64} {
  func.func @_bn1_conv2_kernel(%arg0: i32, %arg1: memref<1x256x4xf32, #tpu.memory_space<vmem>>, %arg2: memref<2x4xf32, #tpu.memory_space<vmem>>, %arg3: memref<1x4xf32, #tpu.memory_space<vmem>>, %arg4: memref<1x4xf32, #tpu.memory_space<vmem>>, %arg5: memref<36x4xf32, #tpu.memory_space<vmem>>, %arg6: memref<1x256x4xf32, #tpu.memory_space<vmem>>, %arg7: memref<2x4xf32, #tpu.memory_space<vmem>>) attributes {dimension_semantics = [#tpu.dimension_semantics<arbitrary>], iteration_bounds = array<i64: 2>, scalar_prefetch = 0 : i64, scratch_operands = 0 : i64, tpu.core_type = #tpu.core_type<tc>, window_params = [{transform_indices = @transform_0, window_bounds = array<i64: 1, 256, 4>}, {pipeline_mode = #tpu.pipeline_mode<synchronous>, transform_indices = @transform_1, window_bounds = array<i64: 2, 4>}, {pipeline_mode = #tpu.pipeline_mode<synchronous>, transform_indices = @transform_2, window_bounds = array<i64: 1, 4>}, {pipeline_mode = #tpu.pipeline_mode<synchronous>, transform_indices = @transform_3, window_bounds = array<i64: 1, 4>}, {pipeline_mode = #tpu.pipeline_mode<synchronous>, transform_indices = @transform_4, window_bounds = array<i64: 36, 4>}, {transform_indices = @transform_5, window_bounds = array<i64: 1, 256, 4>}, {pipeline_mode = #tpu.pipeline_mode<synchronous>, transform_indices = @transform_6, window_bounds = array<i64: 2, 4>}]} {
    %c0 = arith.constant 0 : index
    %c0_0 = arith.constant 0 : index
    %0 = vector.load %arg2[%c0, %c0_0] : memref<2x4xf32, #tpu.memory_space<vmem>>, vector<2x4xf32>
    %c0_1 = arith.constant 0 : index
    %c0_2 = arith.constant 0 : index
    %1 = vector.load %arg3[%c0_1, %c0_2] : memref<1x4xf32, #tpu.memory_space<vmem>>, vector<1x4xf32>
    %c0_3 = arith.constant 0 : index
    %c0_4 = arith.constant 0 : index
    %2 = vector.load %arg4[%c0_3, %c0_4] : memref<1x4xf32, #tpu.memory_space<vmem>>, vector<1x4xf32>
    %3 = vector.extract_strided_slice %0 {offsets = [0, 0], sizes = [1, 4], strides = [1, 1]} : vector<2x4xf32> to vector<1x4xf32>
    %cst = arith.constant 0.001953125 : f32
    %4 = vector.broadcast %cst : f32 to vector<1x4xf32>
    %5 = arith.mulf %3, %4 : vector<1x4xf32>
    %6 = vector.extract_strided_slice %0 {offsets = [1, 0], sizes = [1, 4], strides = [1, 1]} : vector<2x4xf32> to vector<1x4xf32>
    %cst_5 = arith.constant 0.001953125 : f32
    %7 = vector.broadcast %cst_5 : f32 to vector<1x4xf32>
    %8 = arith.mulf %6, %7 : vector<1x4xf32>
    %9 = arith.mulf %5, %5 : vector<1x4xf32>
    %10 = arith.subf %8, %9 : vector<1x4xf32>
    %cst_6 = arith.constant 9.99999974E-6 : f32
    %11 = vector.broadcast %cst_6 : f32 to vector<1x4xf32>
    %12 = arith.addf %10, %11 : vector<1x4xf32>
    %13 = math.rsqrt %12 : vector<1x4xf32>
    %14 = arith.mulf %1, %13 : vector<1x4xf32>
    %15 = arith.mulf %5, %14 : vector<1x4xf32>
    %16 = arith.subf %2, %15 : vector<1x4xf32>
    %c0_7 = arith.constant 0 : index
    %c0_8 = arith.constant 0 : index
    %c0_9 = arith.constant 0 : index
    %17 = vector.load %arg1[%c0_7, %c0_8, %c0_9] : memref<1x256x4xf32, #tpu.memory_space<vmem>>, vector<1x256x4xf32>
    %18 = vector.shape_cast %17 : vector<1x256x4xf32> to vector<256x4xf32>
    %19 = vector.broadcast %14 : vector<1x4xf32> to vector<256x4xf32>
    %20 = arith.mulf %18, %19 : vector<256x4xf32>
    %21 = vector.broadcast %16 : vector<1x4xf32> to vector<256x4xf32>
    %22 = arith.addf %20, %21 : vector<256x4xf32>
    %cst_10 = arith.constant 0.000000e+00 : f32
    %23 = vector.broadcast %cst_10 : f32 to vector<256x4xf32>
    %24 = arith.cmpf oge, %22, %23 : vector<256x4xf32>
    %cst_11 = arith.constant 2.000000e-01 : f32
    %25 = vector.broadcast %cst_11 : f32 to vector<256x4xf32>
    %26 = arith.mulf %25, %22 : vector<256x4xf32>
    %27 = arith.select %24, %22, %26 : vector<256x4xi1>, vector<256x4xf32>
    %28 = vector.shape_cast %27 : vector<256x4xf32> to vector<1x16x16x4xf32>
    %c0_12 = arith.constant 0 : index
    %c0_13 = arith.constant 0 : index
    %29 = vector.load %arg5[%c0_12, %c0_13] : memref<36x4xf32, #tpu.memory_space<vmem>>, vector<36x4xf32>
    %cst_14 = arith.constant 0.000000e+00 : f32
    %30 = vector.broadcast %cst_14 : f32 to vector<1x1x16x4xf32>
    %31 = tpu.concatenate %30, %28, %30 in 1 : vector<1x1x16x4xf32>, vector<1x16x16x4xf32>, vector<1x1x16x4xf32> -> vector<1x18x16x4xf32>
    %cst_15 = arith.constant 0.000000e+00 : f32
    %32 = vector.broadcast %cst_15 : f32 to vector<1x18x1x4xf32>
    %33 = tpu.concatenate %32, %31, %32 in 2 : vector<1x18x1x4xf32>, vector<1x18x16x4xf32>, vector<1x18x1x4xf32> -> vector<1x18x18x4xf32>
    %34 = vector.extract_strided_slice %33 {offsets = [0, 0, 0, 0], sizes = [1, 16, 16, 4], strides = [1, 1, 1, 1]} : vector<1x18x18x4xf32> to vector<1x16x16x4xf32>
    %35 = vector.shape_cast %34 : vector<1x16x16x4xf32> to vector<256x4xf32>
    %36 = vector.extract_strided_slice %33 {offsets = [0, 0, 1, 0], sizes = [1, 16, 16, 4], strides = [1, 1, 1, 1]} : vector<1x18x18x4xf32> to vector<1x16x16x4xf32>
    %37 = vector.shape_cast %36 : vector<1x16x16x4xf32> to vector<256x4xf32>
    %38 = vector.extract_strided_slice %33 {offsets = [0, 0, 2, 0], sizes = [1, 16, 16, 4], strides = [1, 1, 1, 1]} : vector<1x18x18x4xf32> to vector<1x16x16x4xf32>
    %39 = vector.shape_cast %38 : vector<1x16x16x4xf32> to vector<256x4xf32>
    %40 = vector.extract_strided_slice %33 {offsets = [0, 1, 0, 0], sizes = [1, 16, 16, 4], strides = [1, 1, 1, 1]} : vector<1x18x18x4xf32> to vector<1x16x16x4xf32>
    %41 = vector.shape_cast %40 : vector<1x16x16x4xf32> to vector<256x4xf32>
    %42 = vector.extract_strided_slice %33 {offsets = [0, 1, 1, 0], sizes = [1, 16, 16, 4], strides = [1, 1, 1, 1]} : vector<1x18x18x4xf32> to vector<1x16x16x4xf32>
    %43 = vector.shape_cast %42 : vector<1x16x16x4xf32> to vector<256x4xf32>
    %44 = vector.extract_strided_slice %33 {offsets = [0, 1, 2, 0], sizes = [1, 16, 16, 4], strides = [1, 1, 1, 1]} : vector<1x18x18x4xf32> to vector<1x16x16x4xf32>
    %45 = vector.shape_cast %44 : vector<1x16x16x4xf32> to vector<256x4xf32>
    %46 = vector.extract_strided_slice %33 {offsets = [0, 2, 0, 0], sizes = [1, 16, 16, 4], strides = [1, 1, 1, 1]} : vector<1x18x18x4xf32> to vector<1x16x16x4xf32>
    %47 = vector.shape_cast %46 : vector<1x16x16x4xf32> to vector<256x4xf32>
    %48 = vector.extract_strided_slice %33 {offsets = [0, 2, 1, 0], sizes = [1, 16, 16, 4], strides = [1, 1, 1, 1]} : vector<1x18x18x4xf32> to vector<1x16x16x4xf32>
    %49 = vector.shape_cast %48 : vector<1x16x16x4xf32> to vector<256x4xf32>
    %50 = vector.extract_strided_slice %33 {offsets = [0, 2, 2, 0], sizes = [1, 16, 16, 4], strides = [1, 1, 1, 1]} : vector<1x18x18x4xf32> to vector<1x16x16x4xf32>
    %51 = vector.shape_cast %50 : vector<1x16x16x4xf32> to vector<256x4xf32>
    %52 = tpu.concatenate %35, %37, %39, %41, %43, %45, %47, %49, %51 in 1 : vector<256x4xf32>, vector<256x4xf32>, vector<256x4xf32>, vector<256x4xf32>, vector<256x4xf32>, vector<256x4xf32>, vector<256x4xf32>, vector<256x4xf32>, vector<256x4xf32> -> vector<256x36xf32>
    %cst_16 = arith.constant dense<0.000000e+00> : vector<256x4xf32>
    %53 = tpu.matmul %52, %29, %cst_16 {dimension_numbers = #tpu.dot_dimension_numbers<[1], [0], [0], [1], [0, 0, 1, 1], [], []>} : vector<256x36xf32>, vector<36x4xf32>, vector<256x4xf32> -> vector<256x4xf32>
    %c0_i32 = arith.constant 0 : i32
    %54 = arith.cmpi eq, %arg0, %c0_i32 : i32
    %55 = arith.extui %54 : i1 to i32
    %c0_i32_17 = arith.constant 0 : i32
    %56 = arith.cmpi ne, %55, %c0_i32_17 : i32
    scf.if %56 {
      %cst_27 = arith.constant 0.000000e+00 : f32
      %68 = vector.broadcast %cst_27 : f32 to vector<2x4xf32>
      %c0_28 = arith.constant 0 : index
      %c0_29 = arith.constant 0 : index
      %69 = vector.load %arg7[%c0_28, %c0_29] : memref<2x4xf32, #tpu.memory_space<vmem>>, vector<2x4xf32>
      tpu.vector_store %arg7[%c0_28, %c0_29], %68 {strides = array<i32>} : memref<2x4xf32, #tpu.memory_space<vmem>>, vector<2x4xf32>,
    } else {
    }
    %c0_18 = arith.constant 0 : index
    %c0_19 = arith.constant 0 : index
    %57 = vector.load %arg7[%c0_18, %c0_19] : memref<2x4xf32, #tpu.memory_space<vmem>>, vector<2x4xf32>
    %cst_20 = arith.constant dense<0.000000e+00> : vector<4xf32>
    %58 = vector.multi_reduction <add>, %53, %cst_20 [0] : vector<256x4xf32> to vector<4xf32>
    %59 = vector.shape_cast %58 : vector<4xf32> to vector<1x4xf32>
    %60 = arith.mulf %53, %53 : vector<256x4xf32>
    %cst_21 = arith.constant dense<0.000000e+00> : vector<4xf32>
    %61 = vector.multi_reduction <add>, %60, %cst_21 [0] : vector<256x4xf32> to vector<4xf32>
    %62 = vector.shape_cast %61 : vector<4xf32> to vector<1x4xf32>
    %63 = tpu.concatenate %59, %62 in 0 : vector<1x4xf32>, vector<1x4xf32> -> vector<2x4xf32>
    %64 = arith.addf %57, %63 : vector<2x4xf32>
    %c0_22 = arith.constant 0 : index
    %c0_23 = arith.constant 0 : index
    %65 = vector.load %arg7[%c0_22, %c0_23] : memref<2x4xf32, #tpu.memory_space<vmem>>, vector<2x4xf32>
    tpu.vector_store %arg7[%c0_22, %c0_23], %64 {strides = array<i32>} : memref<2x4xf32, #tpu.memory_space<vmem>>, vector<2x4xf32>,
    %66 = vector.shape_cast %53 : vector<256x4xf32> to vector<1x256x4xf32>
    %c0_24 = arith.constant 0 : index
    %c0_25 = arith.constant 0 : index
    %c0_26 = arith.constant 0 : index
    %67 = vector.load %arg6[%c0_24, %c0_25, %c0_26] : memref<1x256x4xf32, #tpu.memory_space<vmem>>, vector<1x256x4xf32>
    tpu.vector_store %arg6[%c0_24, %c0_25, %c0_26], %66 {strides = array<i32>} : memref<1x256x4xf32, #tpu.memory_space<vmem>>, vector<1x256x4xf32>,
    return
  }
  func.func @transform_0(%arg0: i32) -> (i32, i32, i32) {
    %c0_i32 = arith.constant 0 : i32
    %c0_i32_0 = arith.constant 0 : i32
    %c0_i32_1 = arith.constant 0 : i32
    return %arg0, %c0_i32, %c0_i32_0 : i32, i32, i32
  }
  func.func @transform_1(%arg0: i32) -> (i32, i32) {
    %c0_i32 = arith.constant 0 : i32
    %c0_i32_0 = arith.constant 0 : i32
    %c0_i32_1 = arith.constant 0 : i32
    return %c0_i32, %c0_i32_0 : i32, i32
  }
  func.func @transform_2(%arg0: i32) -> (i32, i32) {
    %c0_i32 = arith.constant 0 : i32
    %c0_i32_0 = arith.constant 0 : i32
    %c0_i32_1 = arith.constant 0 : i32
    return %c0_i32, %c0_i32_0 : i32, i32
  }
  func.func @transform_3(%arg0: i32) -> (i32, i32) {
    %c0_i32 = arith.constant 0 : i32
    %c0_i32_0 = arith.constant 0 : i32
    %c0_i32_1 = arith.constant 0 : i32
    return %c0_i32, %c0_i32_0 : i32, i32
  }
  func.func @transform_4(%arg0: i32) -> (i32, i32) {
    %c0_i32 = arith.constant 0 : i32
    %c0_i32_0 = arith.constant 0 : i32
    %c0_i32_1 = arith.constant 0 : i32
    return %c0_i32, %c0_i32_0 : i32, i32
  }
  func.func @transform_5(%arg0: i32) -> (i32, i32, i32) {
    %c0_i32 = arith.constant 0 : i32
    %c0_i32_0 = arith.constant 0 : i32
    %c0_i32_1 = arith.constant 0 : i32
    return %arg0, %c0_i32, %c0_i32_0 : i32, i32, i32
  }
  func.func @transform_6(%arg0: i32) -> (i32, i32) {
    %c0_i32 = arith.constant 0 : i32
    %c0_i32_0 = arith.constant 0 : i32
    %c0_i32_1 = arith.constant 0 : i32
    return %c0_i32, %c0_i32_0 : i32, i32
  }
}

module attributes {stable_mosaic.version = 11 : i64} {
  func.func @_bn2_add_kernel(%arg0: i32, %arg1: memref<1x256x4xf32, #tpu.memory_space<vmem>>, %arg2: memref<2x4xf32, #tpu.memory_space<vmem>>, %arg3: memref<1x4xf32, #tpu.memory_space<vmem>>, %arg4: memref<1x4xf32, #tpu.memory_space<vmem>>, %arg5: memref<1x16x16x4xf32, #tpu.memory_space<vmem>>, %arg6: memref<1x256x4xf32, #tpu.memory_space<vmem>>) attributes {dimension_semantics = [#tpu.dimension_semantics<parallel>], iteration_bounds = array<i64: 2>, scalar_prefetch = 0 : i64, scratch_operands = 0 : i64, tpu.core_type = #tpu.core_type<tc>, window_params = [{transform_indices = @transform_0, window_bounds = array<i64: 1, 256, 4>}, {pipeline_mode = #tpu.pipeline_mode<synchronous>, transform_indices = @transform_1, window_bounds = array<i64: 2, 4>}, {pipeline_mode = #tpu.pipeline_mode<synchronous>, transform_indices = @transform_2, window_bounds = array<i64: 1, 4>}, {pipeline_mode = #tpu.pipeline_mode<synchronous>, transform_indices = @transform_3, window_bounds = array<i64: 1, 4>}, {transform_indices = @transform_4, window_bounds = array<i64: 1, 16, 16, 4>}, {transform_indices = @transform_5, window_bounds = array<i64: 1, 256, 4>}]} {
    %c0 = arith.constant 0 : index
    %c0_0 = arith.constant 0 : index
    %0 = vector.load %arg2[%c0, %c0_0] : memref<2x4xf32, #tpu.memory_space<vmem>>, vector<2x4xf32>
    %c0_1 = arith.constant 0 : index
    %c0_2 = arith.constant 0 : index
    %1 = vector.load %arg3[%c0_1, %c0_2] : memref<1x4xf32, #tpu.memory_space<vmem>>, vector<1x4xf32>
    %c0_3 = arith.constant 0 : index
    %c0_4 = arith.constant 0 : index
    %2 = vector.load %arg4[%c0_3, %c0_4] : memref<1x4xf32, #tpu.memory_space<vmem>>, vector<1x4xf32>
    %3 = vector.extract_strided_slice %0 {offsets = [0, 0], sizes = [1, 4], strides = [1, 1]} : vector<2x4xf32> to vector<1x4xf32>
    %cst = arith.constant 0.001953125 : f32
    %4 = vector.broadcast %cst : f32 to vector<1x4xf32>
    %5 = arith.mulf %3, %4 : vector<1x4xf32>
    %6 = vector.extract_strided_slice %0 {offsets = [1, 0], sizes = [1, 4], strides = [1, 1]} : vector<2x4xf32> to vector<1x4xf32>
    %cst_5 = arith.constant 0.001953125 : f32
    %7 = vector.broadcast %cst_5 : f32 to vector<1x4xf32>
    %8 = arith.mulf %6, %7 : vector<1x4xf32>
    %9 = arith.mulf %5, %5 : vector<1x4xf32>
    %10 = arith.subf %8, %9 : vector<1x4xf32>
    %cst_6 = arith.constant 9.99999974E-6 : f32
    %11 = vector.broadcast %cst_6 : f32 to vector<1x4xf32>
    %12 = arith.addf %10, %11 : vector<1x4xf32>
    %13 = math.rsqrt %12 : vector<1x4xf32>
    %14 = arith.mulf %1, %13 : vector<1x4xf32>
    %15 = arith.mulf %5, %14 : vector<1x4xf32>
    %16 = arith.subf %2, %15 : vector<1x4xf32>
    %c0_7 = arith.constant 0 : index
    %c0_8 = arith.constant 0 : index
    %c0_9 = arith.constant 0 : index
    %17 = vector.load %arg1[%c0_7, %c0_8, %c0_9] : memref<1x256x4xf32, #tpu.memory_space<vmem>>, vector<1x256x4xf32>
    %18 = vector.shape_cast %17 : vector<1x256x4xf32> to vector<256x4xf32>
    %19 = vector.broadcast %14 : vector<1x4xf32> to vector<256x4xf32>
    %20 = arith.mulf %18, %19 : vector<256x4xf32>
    %21 = vector.broadcast %16 : vector<1x4xf32> to vector<256x4xf32>
    %22 = arith.addf %20, %21 : vector<256x4xf32>
    %c0_10 = arith.constant 0 : index
    %c0_11 = arith.constant 0 : index
    %c0_12 = arith.constant 0 : index
    %c0_13 = arith.constant 0 : index
    %23 = vector.load %arg5[%c0_10, %c0_11, %c0_12, %c0_13] : memref<1x16x16x4xf32, #tpu.memory_space<vmem>>, vector<1x16x16x4xf32>
    %24 = vector.shape_cast %23 : vector<1x16x16x4xf32> to vector<256x4xf32>
    %25 = arith.addf %24, %22 : vector<256x4xf32>
    %26 = vector.shape_cast %25 : vector<256x4xf32> to vector<1x256x4xf32>
    %c0_14 = arith.constant 0 : index
    %c0_15 = arith.constant 0 : index
    %c0_16 = arith.constant 0 : index
    %27 = vector.load %arg6[%c0_14, %c0_15, %c0_16] : memref<1x256x4xf32, #tpu.memory_space<vmem>>, vector<1x256x4xf32>
    tpu.vector_store %arg6[%c0_14, %c0_15, %c0_16], %26 {strides = array<i32>} : memref<1x256x4xf32, #tpu.memory_space<vmem>>, vector<1x256x4xf32>,
    return
  }
  func.func @transform_0(%arg0: i32) -> (i32, i32, i32) {
    %c0_i32 = arith.constant 0 : i32
    %c0_i32_0 = arith.constant 0 : i32
    %c0_i32_1 = arith.constant 0 : i32
    return %arg0, %c0_i32, %c0_i32_0 : i32, i32, i32
  }
  func.func @transform_1(%arg0: i32) -> (i32, i32) {
    %c0_i32 = arith.constant 0 : i32
    %c0_i32_0 = arith.constant 0 : i32
    %c0_i32_1 = arith.constant 0 : i32
    return %c0_i32, %c0_i32_0 : i32, i32
  }
  func.func @transform_2(%arg0: i32) -> (i32, i32) {
    %c0_i32 = arith.constant 0 : i32
    %c0_i32_0 = arith.constant 0 : i32
    %c0_i32_1 = arith.constant 0 : i32
    return %c0_i32, %c0_i32_0 : i32, i32
  }
  func.func @transform_3(%arg0: i32) -> (i32, i32) {
    %c0_i32 = arith.constant 0 : i32
    %c0_i32_0 = arith.constant 0 : i32
    %c0_i32_1 = arith.constant 0 : i32
    return %c0_i32, %c0_i32_0 : i32, i32
  }
  func.func @transform_4(%arg0: i32) -> (i32, i32, i32, i32) {
    %c0_i32 = arith.constant 0 : i32
    %c0_i32_0 = arith.constant 0 : i32
    %c0_i32_1 = arith.constant 0 : i32
    %c0_i32_2 = arith.constant 0 : i32
    return %arg0, %c0_i32, %c0_i32_0, %c0_i32_1 : i32, i32, i32, i32
  }
  func.func @transform_5(%arg0: i32) -> (i32, i32, i32) {
    %c0_i32 = arith.constant 0 : i32
    %c0_i32_0 = arith.constant 0 : i32
    %c0_i32_1 = arith.constant 0 : i32
    return %arg0, %c0_i32, %c0_i32_0 : i32, i32, i32
  }
}

</mosaic_0001>

<bundles_post_ra>
// kernel: residual_block_nhwc.5
= control target key start
LH: loop header
LB: loop body
LE: loop exit
PB: predicated region body
PF: predicated region fallthrough
CT: control target
= control target key end

     0   :  { %s614_s18 = smov 0   ;;  %s850_s0 = inlined_call_operand.vmem [shape: f32[2,256,4], index: 0, kind: input, shape index: {}]   ;;  %s851_s1 = inlined_call_operand.vmem [shape: f32[2,4], index: 1, kind: input, shape index: {}]   ;;  %s852_s2 = inlined_call_operand.vmem [shape: f32[1,4], index: 2, kind: input, shape index: {}]   ;;  %s853_s3 = inlined_call_operand.vmem [shape: f32[1,4], index: 3, kind: input, shape index: {}]   ;;  %s854_s4 = inlined_call_operand.vmem [shape: f32[2,16,16,4], index: 4, kind: input, shape index: {}]   ;;  %s855_s5 = inlined_call_operand.vmem [shape: f32[2,256,4], index: 5, kind: output, shape index: {}]  }
   0x1 LB: > { %s548_s19 = sadd.s32 4294967295, %s581_s18   ;;  %p552_p0 = scmp.ge.s32.totalorder %s581_s18, 1  ;;  %s581_s18 = sphi %s614_s18, %s15_s18  }
   0x2   : > { %p197_p1 = scmp.lt.s32.totalorder %s581_s18, 3 }
   0x4   : > { %p198_p2 = pnand %p552_p0, %p197_p1 }
   0x5   : > { %v245_v0 = vld [vmem:[%s851_s1] sm:$0x3] (!%p198_p2)  ;;  %v583_v6 = vmov (!%p198_p2), 1966171168   ;;  %v260_v8 = vlaneseq (!%p198_p2)  ;;  %p230_p3 = scmp.lt.s32.totalorder (!%p198_p2), %s548_s19, 1  ;;  %vm448_vm0 = vcmask (!%p198_p2), 31744  }
   0x6   : > { %201 = sbr.rel (%p198_p2) target bundleno = 68 (0x44), region = 40  ;;  %v248_v1 = vmul.f32 (!%p198_p2), 0.001953125, %v245_v0  ;;  %v258_v7 = vunpack.c.l.s4 (!%p198_p2), %v583_v6  ;;  %v246_v15 = vld [vmem:[%s852_s2] sm:$0x1] (!%p198_p2) }
   0x7   : > { %v261_v10 = vshrl.u32 (!%p198_p2), %v260_v8, 7  ;;  %v247_v18 = vld [vmem:[%s853_s3] sm:$0x1] (!%p198_p2) }
   0x8   : > { %v249_v2 = vmul.f32 (!%p198_p2), %v248_v1, %v248_v1  ;;  %v259_v9 = vunpack.c.0.s8 (!%p198_p2), %v258_v7 }
   0x9   : > { %v311_v17 = vsub.s32 (!%p198_p2), 0, %v261_v10 }
   0xa   : > { %v251_v3 = vrot.slane (!%p198_p2), %v249_v2, 7  ;;  %v262_v11 = vsub.s32 (!%p198_p2), %v259_v9, %v261_v10 }
   0xc   : > { %v253_v4 = vsub.f32 (!%p198_p2), %v248_v1, %v251_v3 }
   0xd   : > { %s857_s19 = smov (!%p230_p3, %s548_s19), 1 }
   0xe   : > { %v254_v5 = vadd.f32 1e-05, %v253_v4  ;;  %s625_s22 = sshll.u32 %s857_s19, 8 }
   0xf   : > { %s631_s25 = scalar_lea.vmem %s850_s0, %s625_s22  ;;  %s653_s7 = scalar_lea.vmem %s854_s4, %s625_s22 }
  0x10   : > { %573 = vrsqrt.f32 %v254_v5  ;;  %v276_v20 = vld [vmem:[%s631_s25] sm:$0xff]  ;;  %v277_v21 = vld [vmem:[%s631_s25 + $0x8] sm:$0xff]  ;;  %v278_v22 = vld [vmem:[%s631_s25 + $0x10] sm:$0xff]  ;;  %s693_s10 = scalar_lea.vmem %s855_s5, %s625_s22 }
  0x11   : > { %v279_v23 = vld [vmem:[%s631_s25 + $0x18] sm:$0xff]  ;;  %v280_v24 = vld [vmem:[%s631_s25 + $0x20] sm:$0xff]  ;;  %v281_v27 = vld [vmem:[%s631_s25 + $0x28] sm:$0xff] }
  0x12   : > { %v282_v28 = vld [vmem:[%s631_s25 + $0x30] sm:$0xff]  ;;  %v283_v29 = vld [vmem:[%s631_s25 + $0x38] sm:$0xff]  ;;  %v284_v30 = vld [vmem:[%s631_s25 + $0x40] sm:$0xff] }
  0x13   : > { %v285_v31 = vld [vmem:[%s631_s25 + $0x48] sm:$0xff]  ;;  %v286_v32 = vld [vmem:[%s631_s25 + $0x50] sm:$0xff]  ;;  %v287_v37 = vld [vmem:[%s631_s25 + $0x58] sm:$0xff] }
  0x14   : > { %v288_v38 = vld [vmem:[%s631_s25 + $0x60] sm:$0xff]  ;;  %v289_v39 = vld [vmem:[%s631_s25 + $0x68] sm:$0xff]  ;;  %v386_v50 = vld [vmem:[%s653_s7 + $0x10] sm:$0xff] }
  0x15   : > { %v384_v45 = vld [vmem:[%s653_s7] sm:$0xff]  ;;  %v385_v46 = vld [vmem:[%s653_s7 + $0x8] sm:$0xff]  ;;  %v387_v51 = vld [vmem:[%s653_s7 + $0x18] sm:$0xff] }
  0x16   : > { %v388_v52 = vld [vmem:[%s653_s7 + $0x20] sm:$0xff]  ;;  %v389_v61 = vld [vmem:[%s653_s7 + $0x28] sm:$0xff]  ;;  %v390_v62 = vld [vmem:[%s653_s7 + $0x30] sm:$0xff] }
  0x17   : > { %v391_v63 = vld [vmem:[%s653_s7 + $0x38] sm:$0xff]  ;;  %v392_v4 = vld [vmem:[%s653_s7 + $0x40] sm:$0xff]  ;;  %v393_v9 = vld [vmem:[%s653_s7 + $0x48] sm:$0xff] }
  0x18   : > { %v290_v10 = vld [vmem:[%s631_s25 + $0x70] sm:$0xff] }
  0x1a   : > { %v574_v12 = vpop.eup %573 }
  0x1b   : > { %v263_v13 = vrot.slane %v574_v12, %v262_v11 }
  0x1d   : > { %v264_v14 = vcombine.high %v263_v13, %v263_v13 }
  0x1f   : > { %v271_v16 = vrot.slane %v264_v14, %v262_v11  ;;  %v291_v11 = vld [vmem:[%s631_s25 + $0x78] sm:$0xff] }
  0x21   : > { %v273_v19 = vmul.f32 %v271_v16, %v246_v15  ;;  %v394_v16 = vld [vmem:[%s653_s7 + $0x50] sm:$0xff] }
  0x23   : > { %v274_v25 = vmul.f32 %v273_v19, %v248_v1  ;;  %v644_v26 = vrot.slane %v273_v19, %v311_v17 }
  0x25   : > { %v275_v33 = vsub.f32 %v247_v18, %v274_v25  ;;  %v314_v34 = vmul.f32 %v644_v26, %v276_v20  ;;  %v315_v35 = vmul.f32 %v644_v26, %v277_v21  ;;  %v316_v36 = vmul.f32 %v644_v26, %v278_v22  ;;  %v396_v18 = vld [vmem:[%s653_s7 + $0x60] sm:$0xff] }
  0x26   : > { %v317_v40 = vmul.f32 %v644_v26, %v279_v23  ;;  %v318_v41 = vmul.f32 %v644_v26, %v280_v24  ;;  %v319_v42 = vmul.f32 %v644_v26, %v281_v27  ;;  %v320_v43 = vmul.f32 %v644_v26, %v282_v28  ;;  %v397_v23 = vld [vmem:[%s653_s7 + $0x68] sm:$0xff]  ;;  %v398_v24 = vld [vmem:[%s653_s7 + $0x70] sm:$0xff]  ;;  %v292_v25 = vld [vmem:[%s631_s25 + $0x80] sm:$0xff] }
  0x27   : > { %v668_v44 = vrot.slane %v275_v33, %v311_v17  ;;  %v321_v47 = vmul.f32 %v644_v26, %v283_v29  ;;  %v322_v48 = vmul.f32 %v644_v26, %v284_v30  ;;  %v323_v49 = vmul.f32 %v644_v26, %v285_v31  ;;  %v395_v17 = vld [vmem:[%s653_s7 + $0x58] sm:$0xff]  ;;  %v293_v31 = vld [vmem:[%s631_s25 + $0x88] sm:$0xff] }
  0x28   : > { %v324_v53 = vmul.f32 %v644_v26, %v286_v32  ;;  %v325_v54 = vmul.f32 %v644_v26, %v287_v37  ;;  %v326_v55 = vmul.f32 %v644_v26, %v288_v38  ;;  %v327_v56 = vmul.f32 %v644_v26, %v289_v39  ;;  %v294_v32 = vld [vmem:[%s631_s25 + $0x90] sm:$0xff]  ;;  %v295_v33 = vld [vmem:[%s631_s25 + $0x98] sm:$0xff]  ;;  %v296_v39 = vld [vmem:[%s631_s25 + $0xa0] sm:$0xff] }
  0x29   : > { %v352_v57 = vadd.f32 %v668_v44, %v314_v34  ;;  %v353_v58 = vadd.f32 %v668_v44, %v315_v35  ;;  %v354_v59 = vadd.f32 %v668_v44, %v316_v36  ;;  %v355_v60 = vadd.f32 %v668_v44, %v317_v40  ;;  %v399_v38 = vld [vmem:[%s653_s7 + $0x78] sm:$0xff]  ;;  %v297_v40 = vld [vmem:[%s631_s25 + $0xa8] sm:$0xff] }
  0x2a   : > { %v356_v0 = vadd.f32 %v668_v44, %v318_v41  ;;  %v357_v1 = vadd.f32 %v668_v44, %v319_v42  ;;  %v358_v2 = vadd.f32 %v668_v44, %v320_v43  ;;  %v359_v3 = vadd.f32 %v668_v44, %v321_v47 }
  0x2b   : > { %v416_v5 = vadd.f32 %v384_v45, %v352_v57  ;;  %v417_v6 = vadd.f32 %v385_v46, %v353_v58  ;;  %v418_v7 = vadd.f32 %v386_v50, %v354_v59  ;;  %v419_v8 = vadd.f32 %v387_v51, %v355_v60  ;;  %v400_v46 = vld [vmem:[%s653_s7 + $0x80] sm:$0xff]  ;;  %v403_v57 = vld [vmem:[%s653_s7 + $0x98] sm:$0xff] }
  0x2c   : > { %v420_v12 = vadd.f32 %v388_v52, %v356_v0  ;;  %v421_v13 = vadd.f32 %v389_v61, %v357_v1  ;;  %v422_v14 = vadd.f32 %v390_v62, %v358_v2  ;;  %v423_v15 = vadd.f32 %v391_v63, %v359_v3  ;;  %v298_v52 = vld [vmem:[%s631_s25 + $0xb0] sm:$0xff]  ;;  %v404_v59 = vld [vmem:[%s653_s7 + $0xa0] sm:$0xff]  ;;  %v405_v1 = vld [vmem:[%s653_s7 + $0xa8] sm:$0xff] }
  0x2d   : > { %449 = vst.msk [vmem:[%s693_s10] sm:$0xff] %vm448_vm0, %v416_v5  ;;  %450 = vst.msk [vmem:[%s693_s10 + $0x8] sm:$0xff] %vm448_vm0, %v417_v6  ;;  %v360_v19 = vadd.f32 %v668_v44, %v322_v48  ;;  %v361_v20 = vadd.f32 %v668_v44, %v323_v49  ;;  %v362_v21 = vadd.f32 %v668_v44, %v324_v53  ;;  %v401_v49 = vld [vmem:[%s653_s7 + $0x88] sm:$0xff]  ;;  %v299_v53 = vld [vmem:[%s631_s25 + $0xb8] sm:$0xff] }
  0x2e   : > { %451 = vst.msk [vmem:[%s693_s10 + $0x10] sm:$0xff] %vm448_vm0, %v418_v7  ;;  %452 = vst.msk [vmem:[%s693_s10 + $0x18] sm:$0xff] %vm448_vm0, %v419_v8  ;;  %v363_v22 = vadd.f32 %v668_v44, %v325_v54  ;;  %v364_v27 = vadd.f32 %v668_v44, %v326_v55  ;;  %v365_v28 = vadd.f32 %v668_v44, %v327_v56  ;;  %v402_v56 = vld [vmem:[%s653_s7 + $0x90] sm:$0xff]  ;;  %v300_v3 = vld [vmem:[%s631_s25 + $0xc0] sm:$0xff] }
  0x2f   : > { %453 = vst.msk [vmem:[%s693_s10 + $0x20] sm:$0xff] %vm448_vm0, %v420_v12  ;;  %454 = vst.msk [vmem:[%s693_s10 + $0x28] sm:$0xff] %vm448_vm0, %v421_v13  ;;  %v328_v29 = vmul.f32 %v644_v26, %v290_v10  ;;  %v329_v30 = vmul.f32 %v644_v26, %v291_v11  ;;  %v424_v34 = vadd.f32 %v392_v4, %v360_v19  ;;  %v406_v2 = vld [vmem:[%s653_s7 + $0xb0] sm:$0xff]  ;;  %v301_v8 = vld [vmem:[%s631_s25 + $0xc8] sm:$0xff] }
  0x30   : > { %455 = vst.msk [vmem:[%s693_s10 + $0x30] sm:$0xff] %vm448_vm0, %v422_v14  ;;  %456 = vst.msk [vmem:[%s693_s10 + $0x38] sm:$0xff] %vm448_vm0, %v423_v15  ;;  %v425_v35 = vadd.f32 %v393_v9, %v361_v20  ;;  %v426_v36 = vadd.f32 %v394_v16, %v362_v21  ;;  %v427_v37 = vadd.f32 %v395_v17, %v363_v22  ;;  %v302_v9 = vld [vmem:[%s631_s25 + $0xd0] sm:$0xff]  ;;  %v303_v10 = vld [vmem:[%s631_s25 + $0xd8] sm:$0xff] }
  0x31   : > { %v428_v41 = vadd.f32 %v396_v18, %v364_v27  ;;  %v429_v42 = vadd.f32 %v397_v23, %v365_v28  ;;  %v366_v43 = vadd.f32 %v668_v44, %v328_v29  ;;  %v367_v45 = vadd.f32 %v668_v44, %v329_v30  ;;  %457 = vst.msk [vmem:[%s693_s10 + $0x40] sm:$0xff] %vm448_vm0, %v424_v34  ;;  %v407_v15 = vld [vmem:[%s653_s7 + $0xb8] sm:$0xff]  ;;  %v304_v16 = vld [vmem:[%s631_s25 + $0xe0] sm:$0xff]  ;;  %v305_v17 = vld [vmem:[%s631_s25 + $0xe8] sm:$0xff] }
  0x32   : > { %458 = vst.msk [vmem:[%s693_s10 + $0x48] sm:$0xff] %vm448_vm0, %v425_v35  ;;  %459 = vst.msk [vmem:[%s693_s10 + $0x50] sm:$0xff] %vm448_vm0, %v426_v36  ;;  %v330_v47 = vmul.f32 %v644_v26, %v292_v25  ;;  %v331_v48 = vmul.f32 %v644_v26, %v293_v31  ;;  %v332_v50 = vmul.f32 %v644_v26, %v294_v32  ;;  %v408_v23 = vld [vmem:[%s653_s7 + $0xc0] sm:$0xff]  ;;  %v306_v28 = vld [vmem:[%s631_s25 + $0xf0] sm:$0xff] }
  0x33   : > { %460 = vst.msk [vmem:[%s693_s10 + $0x58] sm:$0xff] %vm448_vm0, %v427_v37  ;;  %v333_v51 = vmul.f32 %v644_v26, %v295_v33  ;;  %461 = vst.msk [vmem:[%s693_s10 + $0x60] sm:$0xff] %vm448_vm0, %v428_v41  ;;  %v430_v54 = vadd.f32 %v398_v24, %v366_v43  ;;  %v431_v55 = vadd.f32 %v399_v38, %v367_v45  ;;  %v307_v29 = vld [vmem:[%s631_s25 + $0xf8] sm:$0xff]  ;;  %v409_v32 = vld [vmem:[%s653_s7 + $0xc8] sm:$0xff] }
  0x34   : > { %462 = vst.msk [vmem:[%s693_s10 + $0x68] sm:$0xff] %vm448_vm0, %v429_v42  ;;  %v334_v58 = vmul.f32 %v644_v26, %v296_v39  ;;  %v335_v60 = vmul.f32 %v644_v26, %v297_v40  ;;  %v368_v61 = vadd.f32 %v668_v44, %v330_v47  ;;  %v369_v62 = vadd.f32 %v668_v44, %v331_v48  ;;  %v410_v33 = vld [vmem:[%s653_s7 + $0xd0] sm:$0xff]  ;;  %v411_v34 = vld [vmem:[%s653_s7 + $0xd8] sm:$0xff]  ;;  %v412_v41 = vld [vmem:[%s653_s7 + $0xe0] sm:$0xff] }
  0x35   : > { %v370_v63 = vadd.f32 %v668_v44, %v332_v50  ;;  %v371_v0 = vadd.f32 %v668_v44, %v333_v51  ;;  %463 = vst.msk [vmem:[%s693_s10 + $0x70] sm:$0xff] %vm448_vm0, %v430_v54  ;;  %464 = vst.msk [vmem:[%s693_s10 + $0x78] sm:$0xff] %vm448_vm0, %v431_v55  ;;  %v336_v6 = vmul.f32 %v644_v26, %v298_v52  ;;  %v413_v42 = vld [vmem:[%s653_s7 + $0xe8] sm:$0xff]  ;;  %v414_v52 = vld [vmem:[%s653_s7 + $0xf0] sm:$0xff] }
  0x36   : > { %v372_v4 = vadd.f32 %v668_v44, %v334_v58  ;;  %v373_v5 = vadd.f32 %v668_v44, %v335_v60  ;;  %v337_v7 = vmul.f32 %v644_v26, %v299_v53  ;;  %v432_v11 = vadd.f32 %v400_v46, %v368_v61  ;;  %v415_v53 = vld [vmem:[%s653_s7 + $0xf8] sm:$0xff] }
  0x37   : > { %v433_v12 = vadd.f32 %v401_v49, %v369_v62  ;;  %v434_v13 = vadd.f32 %v402_v56, %v370_v63  ;;  %v435_v14 = vadd.f32 %v403_v57, %v371_v0  ;;  %v374_v20 = vadd.f32 %v668_v44, %v336_v6 }
  0x38   : > { %v436_v18 = vadd.f32 %v404_v59, %v372_v4  ;;  %v437_v19 = vadd.f32 %v405_v1, %v373_v5  ;;  %v375_v21 = vadd.f32 %v668_v44, %v337_v7  ;;  %465 = vst.msk [vmem:[%s693_s10 + $0x80] sm:$0xff] %vm448_vm0, %v432_v11  ;;  %v338_v22 = vmul.f32 %v644_v26, %v300_v3 }
  0x39   : > { %466 = vst.msk [vmem:[%s693_s10 + $0x88] sm:$0xff] %vm448_vm0, %v433_v12  ;;  %467 = vst.msk [vmem:[%s693_s10 + $0x90] sm:$0xff] %vm448_vm0, %v434_v13  ;;  %v339_v24 = vmul.f32 %v644_v26, %v301_v8  ;;  %v340_v25 = vmul.f32 %v644_v26, %v302_v9  ;;  %v341_v27 = vmul.f32 %v644_v26, %v303_v10 }
  0x3a   : > { %468 = vst.msk [vmem:[%s693_s10 + $0x98] sm:$0xff] %vm448_vm0, %v435_v14  ;;  %469 = vst.msk [vmem:[%s693_s10 + $0xa0] sm:$0xff] %vm448_vm0, %v436_v18  ;;  %v438_v30 = vadd.f32 %v406_v2, %v374_v20  ;;  %v439_v31 = vadd.f32 %v407_v15, %v375_v21  ;;  %v342_v35 = vmul.f32 %v644_v26, %v304_v16 }
  0x3b   : > { %470 = vst.msk [vmem:[%s693_s10 + $0xa8] sm:$0xff] %vm448_vm0, %v437_v19  ;;  %v343_v36 = vmul.f32 %v644_v26, %v305_v17  ;;  %v376_v37 = vadd.f32 %v668_v44, %v338_v22  ;;  %v377_v38 = vadd.f32 %v668_v44, %v339_v24  ;;  %v378_v39 = vadd.f32 %v668_v44, %v340_v25 }
  0x3c   : > { %v379_v40 = vadd.f32 %v668_v44, %v341_v27  ;;  %471 = vst.msk [vmem:[%s693_s10 + $0xb0] sm:$0xff] %vm448_vm0, %v438_v30  ;;  %472 = vst.msk [vmem:[%s693_s10 + $0xb8] sm:$0xff] %vm448_vm0, %v439_v31  ;;  %v380_v43 = vadd.f32 %v668_v44, %v342_v35  ;;  %v344_v46 = vmul.f32 %v644_v26, %v306_v28 }
  0x3d   : > { %v381_v45 = vadd.f32 %v668_v44, %v343_v36  ;;  %v345_v47 = vmul.f32 %v644_v26, %v307_v29  ;;  %v440_v48 = vadd.f32 %v408_v23, %v376_v37  ;;  %v441_v49 = vadd.f32 %v409_v32, %v377_v38 }
  0x3e   : > { %v442_v50 = vadd.f32 %v410_v33, %v378_v39  ;;  %v443_v51 = vadd.f32 %v411_v34, %v379_v40  ;;  %v444_v54 = vadd.f32 %v412_v41, %v380_v43  ;;  %v382_v56 = vadd.f32 %v668_v44, %v344_v46 }
  0x3f   : > { %v445_v55 = vadd.f32 %v413_v42, %v381_v45  ;;  %v383_v57 = vadd.f32 %v668_v44, %v345_v47  ;;  %473 = vst.msk [vmem:[%s693_s10 + $0xc0] sm:$0xff] %vm448_vm0, %v440_v48  ;;  %474 = vst.msk [vmem:[%s693_s10 + $0xc8] sm:$0xff] %vm448_vm0, %v441_v49 }
  0x40   : > { %475 = vst.msk [vmem:[%s693_s10 + $0xd0] sm:$0xff] %vm448_vm0, %v442_v50  ;;  %476 = vst.msk [vmem:[%s693_s10 + $0xd8] sm:$0xff] %vm448_vm0, %v443_v51  ;;  %v446_v26 = vadd.f32 %v414_v52, %v382_v56 }
  0x41   : > { %477 = vst.msk [vmem:[%s693_s10 + $0xe0] sm:$0xff] %vm448_vm0, %v444_v54  ;;  %478 = vst.msk [vmem:[%s693_s10 + $0xe8] sm:$0xff] %vm448_vm0, %v445_v55  ;;  %v447_v58 = vadd.f32 %v415_v53, %v383_v57 }
  0x42   : > { %479 = vst.msk [vmem:[%s693_s10 + $0xf0] sm:$0xff] %vm448_vm0, %v446_v26 }
  0x43   : > { %480 = vst.msk [vmem:[%s693_s10 + $0xf8] sm:$0xff] %vm448_vm0, %v447_v58 }
  0x44 PF: > { %s15_s18 = sadd.s32 1, %s581_s18  }
  0x45   : > { %p12_p4 = scmp.ge.s32.totalorder %s15_s18, 4  }
  0x47   :  { %14 = sbr.rel (!%p12_p4) target bundleno = 1 (0x1), region = 73 }

// kernel: residual_block_nhwc.3
= control target key start
LH: loop header
LB: loop body
LE: loop exit
PB: predicated region body
PF: predicated region fallthrough
CT: control target
= control target key end

     0   :  { %s2448_s12 = smov 0   ;;  %s4464_s0 = inlined_call_operand.vmem [shape: f32[2,16,16,4], index: 0, kind: input, shape index: {}]   ;;  %s4465_s1 = inlined_call_operand.vmem [shape: f32[36,4], index: 1, kind: input, shape index: {}]   ;;  %s4466_s2 = inlined_call_operand.vmem [shape: f32[2,256,4], index: 2, kind: output, shape index: {0}]   ;;  %s4467_s3 = inlined_call_operand.vmem [shape: f32[2,4], index: 3, kind: output, shape index: {1}]  }
   0x1 LB: > { %s2454_s13 = sadd.s32 4294967295, %s2416_s12   ;;  %p2215_p0 = scmp.ge.s32.totalorder %s2416_s12, 1  ;;  %s2416_s12 = sphi %s2448_s12, %s14_s12  }
   0x2   : > { %p135_p1 = scmp.lt.s32.totalorder %s2416_s12, 3 }
   0x4   : > { %p136_p2 = pnand %p2215_p0, %p135_p1 }
   0x6   : > { %139 = sbr.rel (%p136_p2) target bundleno = 938 (0x3aa), region = 28 }
   0xd   : > { %vm239_vm0 = vcmask 1040384   ;;  %p159_p3 = scmp.lt.s32.totalorder %s2454_s13, 1  ;;  %v2418_v0 = vmov 0.0   ;;  %vm405_vm1 = vcmask 1046528   ;;  %s2419_s22 = smov 4   ;;  %vm486_vm2 = vcmask 1045504  }
   0xe   : > { %v2459_v1 = vrot.slane %v2418_v0, 7  ;;  %s2420_s23 = smov 8   ;;  %s2421_s24 = smov 12   ;;  %vm1347_vm3 = vcmask 31744   ;;  %vm1380_vm4 = vcmask 64512   ;;  %vm1708_vm5 = vcmask 1043456  }
   0xf   : > { %s160_s14 = scalar_select %p159_p3, %s2454_s13, 1  ;;  %vm1413_vm6 = vcmask 97280   ;;  %vm1446_vm7 = vcmask 130048   ;;  %vm1479_vm8 = vcmask 162816   ;;  %vm1512_vm9 = vcmask 195584  }
  0x10   : > { %4594 = vst [vmem:[#allocation2_spill] sm:$0xff] %v2459_v1  ;;  %v2464_v2 = vsel %vm239_vm0, 0.0, %v2459_v1  ;;  %v2468_v3 = vsel %vm239_vm0, %v2459_v1, 0.0  ;;  %v407_v4 = vrot.slane %v2459_v1, 1  ;;  %s2422_s25 = smov 16   ;;  %s2423_s26 = smov 20  }
  0x11   : > { %4595 = vst [vmem:[#allocation3_spill] sm:$0xff] %v2464_v2  ;;  %v406_v5 = vrot.slane %v2464_v2, 1  ;;  %v409_v6 = vrot.slane %v2468_v3, 1  ;;  %s2256_s15 = sshll.u32 %s160_s14, 8  ;;  %s2424_s27 = smov 24   ;;  %vm1545_vm10 = vcmask 228352  }
  0x12   : > { %s2476_s18 = scalar_lea.vmem %s4464_s0, %s2256_s15  ;;  %s2481_s21 = scalar_lea.vmem %s4466_s2, %s2256_s15  ;;  %vm1578_vm11 = vcmask 261120   ;;  %vm1611_vm12 = vcmask 293888  }
  0x13   : > { %v408_v7 = vsel %vm405_vm1, %v406_v5, %v407_v4  ;;  %v410_v8 = vsel %vm405_vm1, %v407_v4, %v409_v6  ;;  %v169_v9 = vld [vmem:[%s2476_s18] sm:$0xff]  ;;  %v170_v10 = vld [vmem:[%s2476_s18 + $0x8] sm:$0xff]  ;;  %v171_v11 = vld [vmem:[%s2476_s18 + $0x10] sm:$0xff]  ;;  %s2425_s5 = smov 28   ;;  %s2426_s14 = smov 32  }
  0x14   : > { %v2488_v12 = vpack.i.bf16 %v410_v8, %v408_v7  ;;  %v242_v13 = vrot.slane %v169_v9, 7  ;;  %v243_v14 = vrot.slane %v170_v10, 7  ;;  %v172_v15 = vld [vmem:[%s2476_s18 + $0x18] sm:$0xff]  ;;  %v173_v16 = vld [vmem:[%s2476_s18 + $0x20] sm:$0xff]  ;;  %v174_v17 = vld [vmem:[%s2476_s18 + $0x28] sm:$0xff]  ;;  %v245_v18 = vrot.slane %v171_v11, 7 }
  0x15   : > { %v246_v19 = vrot.slane %v172_v15, 7  ;;  %v248_v20 = vrot.slane %v173_v16, 7  ;;  %v249_v21 = vrot.slane %v174_v17, 7  ;;  %v175_v22 = vld [vmem:[%s2476_s18 + $0x30] sm:$0xff]  ;;  %v176_v31 = vld [vmem:[%s2476_s18 + $0x38] sm:$0xff]  ;;  %v177_v40 = vld [vmem:[%s2476_s18 + $0x40] sm:$0xff] }
  0x16   : > { %4596 = vst [vmem:[#allocation4_spill] sm:$0xff] %v2488_v12  ;;  %2386 = vrot.lane.b32.xlu0 %v2488_v12, %s2419_s22  ;;  %v2497_v23 = vsel %vm239_vm0, %v242_v13, %v243_v14  ;;  %v2500_v24 = vsel %vm239_vm0, %v243_v14, 0.0  ;;  %v2503_v25 = vsel %vm239_vm0, 0.0, %v242_v13  ;;  %v251_v26 = vrot.slane %v175_v22, 7  ;;  %v178_v49 = vld [vmem:[%s2476_s18 + $0x48] sm:$0xff]  ;;  %v179_v50 = vld [vmem:[%s2476_s18 + $0x50] sm:$0xff] }
  0x17   : > { %4597 = vst [vmem:[#allocation5_spill] sm:$0xff] %v2497_v23  ;;  %4598 = vst [vmem:[#allocation6_spill] sm:$0xff] %v2503_v25  ;;  %v412_v27 = vrot.slane %v2497_v23, 1  ;;  %v414_v28 = vrot.slane %v2500_v24, 1  ;;  %v411_v29 = vrot.slane %v2503_v25, 1  ;;  %v2509_v30 = vsel %vm239_vm0, %v245_v18, %v246_v19  ;;  %v180_v55 = vld [vmem:[%s2476_s18 + $0x58] sm:$0xff] }
  0x18   : > { %v2513_v32 = vsel %vm239_vm0, 0.0, %v245_v18  ;;  %v417_v33 = vrot.slane %v2509_v30, 1  ;;  %v2517_v34 = vsel %vm239_vm0, %v246_v19, 0.0  ;;  %v2520_v35 = vsel %vm239_vm0, %v248_v20, %v249_v21  ;;  %v181_v4 = vld [vmem:[%s2476_s18 + $0x60] sm:$0xff]  ;;  %v182_v5 = vld [vmem:[%s2476_s18 + $0x68] sm:$0xff]  ;;  %v183_v19 = vld [vmem:[%s2476_s18 + $0x70] sm:$0xff] }
  0x19   : > { %v2523_v36 = vsel %vm405_vm1, %v412_v27, %v414_v28  ;;  %v2526_v37 = vsel %vm405_vm1, %v411_v29, %v412_v27  ;;  %v416_v38 = vrot.slane %v2513_v32, 1  ;;  %v419_v39 = vrot.slane %v2517_v34, 1  ;;  %v191_v12 = vld [vmem:[%s2476_s18 + $0xb0] sm:$0xff]  ;;  %p2253_p4 = scmp.ne.s32.totalorder %s2454_s13, 0 }
  0x1a   : > { %585 = vrot.lane.b32.xlu1 %v2523_v36, %s2419_s22  ;;  %583 = vrot.lane.b32.xlu0 %v2526_v37, %s2419_s22  ;;  %v2536_v41 = vsel %vm239_vm0, 0.0, %v248_v20  ;;  %v422_v42 = vrot.slane %v2520_v35, 1  ;;  %v2540_v43 = vsel %vm239_vm0, %v249_v21, 0.0  ;;  %v252_v44 = vrot.slane %v176_v31, 7  ;;  %v184_v20 = vld [vmem:[%s2476_s18 + $0x78] sm:$0xff] }
  0x1b   : > { %v2543_v45 = vsel %vm405_vm1, %v416_v38, %v417_v33  ;;  %v2546_v46 = vsel %vm405_vm1, %v417_v33, %v419_v39  ;;  %v421_v47 = vrot.slane %v2536_v41, 1  ;;  %v424_v48 = vrot.slane %v2540_v43, 1  ;;  %v185_v39 = vld [vmem:[%s2476_s18 + $0x80] sm:$0xff] }
  0x1c   : > { %v2553_v51 = vsel %vm239_vm0, %v251_v26, %v252_v44  ;;  %v2556_v52 = vsel %vm239_vm0, 0.0, %v251_v26  ;;  %v2559_v53 = vsel %vm239_vm0, %v252_v44, 0.0  ;;  %v254_v54 = vrot.slane %v177_v40, 7  ;;  %v186_v40 = vld [vmem:[%s2476_s18 + $0x88] sm:$0xff] }
  0x1d   : > { %v2563_v56 = vsel %vm405_vm1, %v421_v47, %v422_v42  ;;  %v2570_v57 = vsel %vm405_vm1, %v422_v42, %v424_v48  ;;  %v255_v58 = vrot.slane %v178_v49, 7  ;;  %v257_v60 = vrot.slane %v179_v50, 7 }
  0x1e   : > { %587 = vrot.lane.b32.xlu1 %v2543_v45, %s2419_s22  ;;  %589 = vrot.lane.b32.xlu0 %v2546_v46, %s2419_s22  ;;  %v2573_v59 = vsel %vm239_vm0, 0.0, %v254_v54  ;;  %v426_v61 = vrot.slane %v2556_v52, 1  ;;  %v427_v62 = vrot.slane %v2553_v51, 1  ;;  %v429_v63 = vrot.slane %v2559_v53, 1 }
  0x1f   : > { %v258_v0 = vrot.slane %v180_v55, 7  ;;  %v2581_v6 = vsel %vm239_vm0, %v254_v54, %v255_v58  ;;  %v2584_v7 = vsel %vm239_vm0, %v255_v58, 0.0  ;;  %v431_v8 = vrot.slane %v2573_v59, 1  ;;  %v187_v54 = vld [vmem:[%s2476_s18 + $0x90] sm:$0xff] }
  0x20   : > { %v432_v9 = vrot.slane %v2581_v6, 1  ;;  %v2593_v10 = vsel %vm239_vm0, 0.0, %v257_v60  ;;  %v260_v11 = vrot.slane %v181_v4, 7  ;;  %v261_v13 = vrot.slane %v182_v5, 7 }
  0x21   : > { %v2596_v14 = vsel %vm405_vm1, %v426_v61, %v427_v62  ;;  %v2599_v15 = vsel %vm405_vm1, %v427_v62, %v429_v63  ;;  %v434_v16 = vrot.slane %v2584_v7, 1  ;;  %v2603_v17 = vsel %vm239_vm0, %v257_v60, %v258_v0  ;;  %v188_v63 = vld [vmem:[%s2476_s18 + $0x98] sm:$0xff] }
  0x22   : > { %591 = vrot.lane.b32.xlu1 %v2563_v56, %s2419_s22  ;;  %593 = vrot.lane.b32.xlu0 %v2570_v57, %s2419_s22  ;;  %4599 = vst [vmem:[#allocation7_spill] sm:$0xff] %v2599_v15  ;;  %v2606_v18 = vsel %vm239_vm0, %v258_v0, 0.0  ;;  %v436_v21 = vrot.slane %v2593_v10, 1  ;;  %v2616_v22 = vsel %vm405_vm1, %v431_v8, %v432_v9  ;;  %v437_v26 = vrot.slane %v2603_v17, 1 }
  0x23   : > { %4600 = vst [vmem:[#allocation8_spill] sm:$0xff] %v2616_v22  ;;  %v2620_v27 = vsel %vm239_vm0, %v260_v11, %v261_v13  ;;  %v2623_v28 = vsel %vm239_vm0, 0.0, %v260_v11  ;;  %v2626_v29 = vsel %vm405_vm1, %v432_v9, %v434_v16  ;;  %v439_v31 = vrot.slane %v2606_v18, 1 }
  0x24   : > { %4601 = vst [vmem:[#allocation9_spill] sm:$0xff] %v2626_v29  ;;  %v263_v33 = vrot.slane %v183_v19, 7  ;;  %v264_v38 = vrot.slane %v184_v20, 7  ;;  %v2632_v42 = vsel %vm239_vm0, %v261_v13, 0.0  ;;  %v441_v44 = vrot.slane %v2623_v28, 1 }
  0x25   : > { %v442_v47 = vrot.slane %v2620_v27, 1  ;;  %v2641_v48 = vsel %vm405_vm1, %v436_v21, %v437_v26  ;;  %v266_v49 = vrot.slane %v185_v39, 7  ;;  %v267_v50 = vrot.slane %v186_v40, 7  ;;  %v189_v21 = vld [vmem:[%s2476_s18 + $0xa0] sm:$0xff] }
  0x26   : > { %595 = vrot.lane.b32.xlu1 %v2596_v14, %s2419_s22  ;;  %597 = vrot.lane.b32.xlu0 %v2599_v15, %s2419_s22  ;;  %4602 = vst [vmem:[#allocation10_spill] sm:$0xff] %v2641_v48  ;;  %v2645_v55 = vsel %vm405_vm1, %v437_v26, %v439_v31  ;;  %v444_v58 = vrot.slane %v2632_v42, 1  ;;  %v2649_v60 = vsel %vm239_vm0, %v263_v33, %v264_v38  ;;  %v2652_v61 = vsel %vm239_vm0, 0.0, %v263_v33  ;;  %v190_v26 = vld [vmem:[%s2476_s18 + $0xa8] sm:$0xff] }
  0x27   : > { %4603 = vst [vmem:[#allocation11_spill] sm:$0xff] %v2645_v55  ;;  %4604 = vst [vmem:[#allocation12_spill] sm:$0xff] %v2649_v60  ;;  %v2655_v62 = vsel %vm239_vm0, %v264_v38, 0.0  ;;  %v2659_v0 = vsel %vm405_vm1, %v441_v44, %v442_v47  ;;  %v269_v4 = vrot.slane %v187_v54, 7  ;;  %v446_v5 = vrot.slane %v2652_v61, 1 }
  0x28   : > { %4605 = vst [vmem:[#allocation13_spill] sm:$0xff] %v2652_v61  ;;  %4606 = vst [vmem:[#allocation14_spill] sm:$0xff] %v2659_v0  ;;  %v447_v8 = vrot.slane %v2649_v60, 1  ;;  %v2668_v9 = vsel %vm239_vm0, %v266_v49, %v267_v50  ;;  %v2671_v11 = vsel %vm239_vm0, 0.0, %v266_v49  ;;  %v2674_v13 = vsel %vm405_vm1, %v442_v47, %v444_v58 }
  0x29   : > { %4607 = vst [vmem:[#allocation15_spill] sm:$0xff] %v2668_v9  ;;  %4608 = vst [vmem:[#allocation16_spill] sm:$0xff] %v2671_v11  ;;  %v449_v16 = vrot.slane %v2655_v62, 1  ;;  %v2678_v19 = vsel %vm239_vm0, %v267_v50, 0.0  ;;  %v270_v20 = vrot.slane %v188_v63, 7  ;;  %v488_v31 = vrot.slane %v2459_v1, 2 }
  0x2a   : > { %599 = vrot.lane.b32.xlu1 %v2616_v22, %s2419_s22  ;;  %601 = vrot.lane.b32.xlu0 %v2626_v29, %s2419_s22  ;;  %4609 = vst [vmem:[#allocation17_spill] sm:$0xff] %v2674_v13  ;;  %v490_v33 = vrot.slane %v2468_v3, 2  ;;  %v451_v38 = vrot.slane %v2671_v11, 1  ;;  %v452_v39 = vrot.slane %v2668_v9, 1  ;;  %v487_v40 = vrot.slane %v2464_v2, 2  ;;  %v195_v1 = vld [vmem:[%s2476_s18 + $0xd0] sm:$0xff] }
  0x2b   : > { %v2692_v44 = vsel %vm405_vm1, %v446_v5, %v447_v8  ;;  %v454_v47 = vrot.slane %v2678_v19, 1  ;;  %v2696_v49 = vsel %vm239_vm0, 0.0, %v269_v4  ;;  %v272_v3 = vrot.slane %v189_v21, 7  ;;  %v192_v5 = vld [vmem:[%s2476_s18 + $0xb8] sm:$0xff] }
  0x2c   : > { %4610 = vst [vmem:[#allocation18_spill] sm:$0xff] %v2692_v44  ;;  %v2699_v50 = vsel %vm405_vm1, %v447_v8, %v449_v16  ;;  %v2702_v54 = vsel %vm239_vm0, %v269_v4, %v270_v20  ;;  %v2705_v58 = vsel %vm239_vm0, %v270_v20, 0.0  ;;  %v273_v63 = vrot.slane %v190_v26, 7 }
  0x2d   : > { %4611 = vst [vmem:[#allocation19_spill] sm:$0xff] %v2699_v50  ;;  %v489_v21 = vsel %vm486_vm2, %v487_v40, %v488_v31  ;;  %v491_v8 = vsel %vm486_vm2, %v488_v31, %v490_v33  ;;  %v2720_v4 = vsel %vm405_vm1, %v452_v39, %v454_v47  ;;  %v457_v16 = vrot.slane %v2702_v54, 1 }
  0x2e   : > { %603 = vrot.lane.b32.xlu1 %v2641_v48, %s2419_s22  ;;  %605 = vrot.lane.b32.xlu0 %v2645_v55, %s2419_s22  ;;  %4613 = vst [vmem:[#allocation21_spill] sm:$0xff] %v2720_v4  ;;  %v459_v20 = vrot.slane %v2705_v58, 1  ;;  %v2725_v26 = vsel %vm239_vm0, 0.0, %v272_v3  ;;  %v2731_v31 = vsel %vm239_vm0, %v273_v63, 0.0  ;;  %v275_v33 = vrot.slane %v191_v12, 7 }
  0x2f   : > { %v276_v40 = vrot.slane %v192_v5, 7  ;;  %v461_v47 = vrot.slane %v2725_v26, 1  ;;  %v464_v5 = vrot.slane %v2731_v31, 1  ;;  %v281_v29 = vrot.slane %v195_v1, 7 }
  0x30   : > { %v2746_v12 = vsel %vm405_vm1, %v457_v16, %v459_v20  ;;  %vm1941_vm13 = vcmask (!%p2253_p4), 25600  }
  0x31   : > { %4616 = vst [vmem:[#allocation24_spill] sm:$0xff] %v2746_v12  ;;  %v2757_v55 = vsel %vm239_vm0, %v276_v40, 0.0 }
  0x32   : > { %607 = vrot.lane.b32.xlu1 %v2659_v0, %s2419_s22  ;;  %609 = vrot.lane.b32.xlu0 %v2674_v13, %s2419_s22  ;;  %v2710_v13 = vsel %vm405_vm1, %v451_v38, %v452_v39  ;;  %v456_v0 = vrot.slane %v2696_v49, 1  ;;  %v2728_v38 = vsel %vm239_vm0, %v272_v3, %v273_v63  ;;  %v2734_v39 = vpack.i.bf16 %v491_v8, %v489_v21 }
  0x33   : > { %4612 = vst [vmem:[#allocation20_spill] sm:$0xff] %v2710_v13  ;;  %v462_v63 = vrot.slane %v2728_v38, 1  ;;  %v2751_v21 = vsel %vm239_vm0, %v275_v33, %v276_v40  ;;  %v2754_v8 = vsel %vm239_vm0, 0.0, %v275_v33  ;;  %v469_v40 = vrot.slane %v2757_v55, 1 }
  0x34   : > { %4614 = vst [vmem:[#allocation22_spill] sm:$0xff] %v2734_v39  ;;  %v2743_v3 = vsel %vm405_vm1, %v456_v0, %v457_v16  ;;  %v196_v16 = vld [vmem:[%s2476_s18 + $0xd8] sm:$0xff]  ;;  %v466_v33 = vrot.slane %v2754_v8, 1  ;;  %v467_v2 = vrot.slane %v2751_v21, 1 }
  0x35   : > { %4615 = vst [vmem:[#allocation23_spill] sm:$0xff] %v2743_v3  ;;  %v2766_v20 = vsel %vm405_vm1, %v461_v47, %v462_v63  ;;  %v282_v22 = vrot.slane %v196_v16, 7 }
  0x36   : > { %611 = vrot.lane.b32.xlu1 %v2692_v44, %s2419_s22  ;;  %613 = vrot.lane.b32.xlu0 %v2699_v50, %s2419_s22  ;;  %v193_v50 = vld [vmem:[%s2476_s18 + $0xc0] sm:$0xff]  ;;  %v194_v44 = vld [vmem:[%s2476_s18 + $0xc8] sm:$0xff]  ;;  %4617 = vst [vmem:[#allocation25_spill] sm:$0xff] %v2766_v20  ;;  %v2793_v1 = vsel %vm405_vm1, %v467_v2, %v469_v40 }
  0x37   : > { %v278_v48 = vrot.slane %v193_v50, 7  ;;  %v279_v0 = vrot.slane %v194_v44, 7  ;;  %v2772_v44 = vsel %vm405_vm1, %v462_v63, %v464_v5  ;;  %v2790_v63 = vsel %vm405_vm1, %v466_v33, %v467_v2  ;;  %4620 = vst [vmem:[#allocation28_spill] sm:$0xff] %v2793_v1 }
  0x38   : > { %4618 = vst [vmem:[#allocation26_spill] sm:$0xff] %v2772_v44  ;;  %4619 = vst [vmem:[#allocation27_spill] sm:$0xff] %v2790_v63 }
  0x39   : > { %v2775_v50 = vsel %vm239_vm0, 0.0, %v278_v48  ;;  %v2782_v47 = vsel %vm239_vm0, %v279_v0, 0.0 }
  0x3a   : > { %615 = vrot.lane.b32.xlu1 %v2710_v13, %s2419_s22  ;;  %617 = vrot.lane.b32.xlu0 %v2720_v4, %s2419_s22  ;;  %v198_v4 = vld [vmem:[%s2476_s18 + $0xe8] sm:$0xff]  ;;  %v471_v5 = vrot.slane %v2775_v50, 1  ;;  %v2799_v13 = vsel %vm239_vm0, %v281_v29, %v282_v22 }
  0x3b   : > { %v285_v33 = vrot.slane %v198_v4, 7 }
  0x3e   : > { %619 = vrot.lane.b32.xlu1 %v2743_v3, %s2419_s22  ;;  %621 = vrot.lane.b32.xlu0 %v2746_v12, %s2419_s22  ;;  %v197_v3 = vld [vmem:[%s2476_s18 + $0xe0] sm:$0xff]  ;;  %v2779_v12 = vsel %vm239_vm0, %v278_v48, %v279_v0  ;;  %v474_v0 = vrot.slane %v2782_v47, 1 }
  0x3f   : > { %v284_v48 = vrot.slane %v197_v3, 7  ;;  %v472_v16 = vrot.slane %v2779_v12, 1  ;;  %v477_v3 = vrot.slane %v2799_v13, 1 }
  0x41   : > { %v2814_v40 = vsel %vm405_vm1, %v471_v5, %v472_v16  ;;  %v2821_v4 = vsel %vm239_vm0, 0.0, %v284_v48 }
  0x42   : > { %623 = vrot.lane.b32.xlu1 %v2766_v20, %s2419_s22  ;;  %625 = vrot.lane.b32.xlu0 %v2772_v44, %s2419_s22  ;;  %v2802_v20 = vsel %vm239_vm0, 0.0, %v281_v29  ;;  %v2805_v44 = vsel %vm239_vm0, %v282_v22, 0.0  ;;  %4621 = vst [vmem:[#allocation29_spill] sm:$0xff] %v2814_v40  ;;  %v2817_v29 = vsel %vm405_vm1, %v472_v16, %v474_v0  ;;  %4623 = vst [vmem:[#allocation31_spill] sm:$0xff] %v2821_v4  ;;  %v481_v5 = vrot.slane %v2821_v4, 1 }
  0x43   : > { %v476_v2 = vrot.slane %v2802_v20, 1  ;;  %4622 = vst [vmem:[#allocation30_spill] sm:$0xff] %v2817_v29  ;;  %v479_v22 = vrot.slane %v2805_v44, 1 }
  0x45   : > { %v2835_v16 = vsel %vm405_vm1, %v476_v2, %v477_v3  ;;  %v2838_v0 = vsel %vm405_vm1, %v477_v3, %v479_v22  ;;  %v492_v2 = vrot.slane %v2503_v25, 2  ;;  %v493_v3 = vrot.slane %v2497_v23, 2 }
  0x46   : > { %627 = vrot.lane.b32.xlu1 %v2790_v63, %s2419_s22  ;;  %629 = vrot.lane.b32.xlu0 %v2793_v1, %s2419_s22  ;;  %v2824_v63 = vsel %vm239_vm0, %v284_v48, %v285_v33  ;;  %v2827_v1 = vsel %vm239_vm0, %v285_v33, 0.0  ;;  %4624 = vst [vmem:[#allocation32_spill] sm:$0xff] %v2835_v16  ;;  %4625 = vst [vmem:[#allocation33_spill] sm:$0xff] %v2838_v0 }
  0x47   : > { %v482_v48 = vrot.slane %v2824_v63, 1  ;;  %v484_v15 = vrot.slane %v2827_v1, 1  ;;  %v2859_v22 = vsel %vm486_vm2, %v492_v2, %v493_v3 }
  0x49   : > { %v2847_v33 = vsel %vm405_vm1, %v481_v5, %v482_v48  ;;  %v497_v5 = vrot.slane %v2513_v32, 2 }
  0x4a   : > { %631 = vrot.lane.b32.xlu1 %v2814_v40, %s2419_s22  ;;  %633 = vrot.lane.b32.xlu0 %v2817_v29, %s2419_s22  ;;  %4626 = vst [vmem:[#allocation34_spill] sm:$0xff] %v2847_v33  ;;  %v2850_v29 = vsel %vm405_vm1, %v482_v48, %v484_v15  ;;  %v498_v15 = vrot.slane %v2509_v30, 2  ;;  %v500_v48 = vrot.slane %v2517_v34, 2  ;;  %v515_v40 = vrot.slane %v2584_v7, 2 }
  0x4b   : > { %4627 = vst [vmem:[#allocation35_spill] sm:$0xff] %v2850_v29 }
  0x4c   : > { %v2873_v2 = vsel %vm486_vm2, %v497_v5, %v498_v15  ;;  %v508_v5 = vrot.slane %v2553_v51, 2 }
  0x4d   : > { %4628 = vst [vmem:[#allocation36_spill] sm:$0xff] %v2873_v2 }
  0x4e   : > { %635 = vrot.lane.b32.xlu1 %v2835_v16, %s2419_s22  ;;  %637 = vrot.lane.b32.xlu0 %v2838_v0, %s2419_s22  ;;  %v495_v0 = vrot.slane %v2500_v24, 2  ;;  %v502_v24 = vrot.slane %v2536_v41, 2  ;;  %v510_v16 = vrot.slane %v2559_v53, 2 }
  0x50   : > { %v2909_v53 = vsel %vm486_vm2, %v508_v5, %v510_v16 }
  0x51   : > { %4633 = vst [vmem:[#allocation41_spill] sm:$0xff] %v2909_v53 }
  0x52   : > { %639 = vrot.lane.b32.xlu1 %v2847_v33, %s2419_s22  ;;  %641 = vrot.lane.b32.xlu0 %v2850_v29, %s2419_s22  ;;  %v2870_v29 = vsel %vm486_vm2, %v493_v3, %v495_v0  ;;  %v503_v33 = vrot.slane %v2520_v35, 2  ;;  %v505_v0 = vrot.slane %v2540_v43, 2  ;;  %v507_v3 = vrot.slane %v2556_v52, 2 }
  0x53   : > { %v512_v43 = vrot.slane %v2573_v59, 2 }
  0x54   : > { %v2885_v34 = vsel %vm486_vm2, %v502_v24, %v503_v33  ;;  %v513_v24 = vrot.slane %v2581_v6, 2 }
  0x55   : > { %4630 = vst [vmem:[#allocation38_spill] sm:$0xff] %v2885_v34 }
  0x56   : > { %2391 = vrot.lane.b32.xlu1 %v2734_v39, %s2420_s23  ;;  %679 = vrot.lane.b32.xlu0 %v2859_v22, %s2420_s23  ;;  %v2882_v39 = vsel %vm486_vm2, %v498_v15, %v500_v48  ;;  %v2896_v15 = vsel %vm486_vm2, %v503_v33, %v505_v0  ;;  %v2899_v48 = vsel %vm486_vm2, %v507_v3, %v508_v5  ;;  %v517_v0 = vrot.slane %v2593_v10, 2 }
  0x57   : > { %4629 = vst [vmem:[#allocation37_spill] sm:$0xff] %v2882_v39  ;;  %4631 = vst [vmem:[#allocation39_spill] sm:$0xff] %v2896_v15  ;;  %v2912_v33 = vsel %vm486_vm2, %v512_v43, %v513_v24  ;;  %v518_v3 = vrot.slane %v2603_v17, 2  ;;  %v2922_v7 = vsel %vm486_vm2, %v513_v24, %v515_v40  ;;  %v522_v5 = vrot.slane %v2623_v28, 2 }
  0x58   : > { %4632 = vst [vmem:[#allocation40_spill] sm:$0xff] %v2899_v48  ;;  %4634 = vst [vmem:[#allocation42_spill] sm:$0xff] %v2912_v33  ;;  %v523_v43 = vrot.slane %v2620_v27, 2  ;;  %v525_v40 = vrot.slane %v2632_v42, 2  ;;  %v527_v24 = vrot.slane %v2652_v61, 2  ;;  %v532_v42 = vrot.slane %v2671_v11, 2 }
  0x59   : > { %4635 = vst [vmem:[#allocation43_spill] sm:$0xff] %v2922_v7  ;;  %v2925_v16 = vsel %vm486_vm2, %v517_v0, %v518_v3  ;;  %v528_v0 = vrot.slane %v2649_v60, 2 }
  0x5a   : > { %681 = vrot.lane.b32.xlu1 %v2870_v29, %s2420_s23  ;;  %683 = vrot.lane.b32.xlu0 %v2873_v2, %s2420_s23  ;;  %4636 = vst [vmem:[#allocation44_spill] sm:$0xff] %v2925_v16  ;;  %v3175_v2 = vld [vmem:[%s2476_s18 + $0xf8] sm:$0xff] }
  0x5b   : > { %4668 = vst [vmem:[#allocation76_spill] sm:$0xff] %v3175_v2 }
  0x5e   : > { %685 = vrot.lane.b32.xlu1 %v2882_v39, %s2420_s23  ;;  %687 = vrot.lane.b32.xlu0 %v2885_v34, %s2420_s23  ;;  %v199_v34 = vld [vmem:[%s2476_s18 + $0xf0] sm:$0xff] }
  0x62   : > { %689 = vrot.lane.b32.xlu1 %v2896_v15, %s2420_s23  ;;  %691 = vrot.lane.b32.xlu0 %v2899_v48, %s2420_s23  ;;  %v520_v48 = vrot.slane %v2606_v18, 2  ;;  %v2937_v18 = vsel %vm486_vm2, %v522_v5, %v523_v43  ;;  %v533_v5 = vrot.slane %v2668_v9, 2 }
  0x63   : > { %4638 = vst [vmem:[#allocation46_spill] sm:$0xff] %v2937_v18 }
  0x66   : > { %693 = vrot.lane.b32.xlu1 %v2909_v53, %s2420_s23  ;;  %695 = vrot.lane.b32.xlu0 %v2912_v33, %s2420_s23  ;;  %v2934_v33 = vsel %vm486_vm2, %v518_v3, %v520_v48  ;;  %v2948_v48 = vsel %vm486_vm2, %v523_v43, %v525_v40  ;;  %v2951_v3 = vsel %vm486_vm2, %v527_v24, %v528_v0  ;;  %v537_v40 = vrot.slane %v2696_v49, 2 }
  0x67   : > { %4637 = vst [vmem:[#allocation45_spill] sm:$0xff] %v2934_v33  ;;  %4639 = vst [vmem:[#allocation47_spill] sm:$0xff] %v2948_v48  ;;  %v2964_v43 = vsel %vm486_vm2, %v532_v42, %v533_v5  ;;  %v538_v24 = vrot.slane %v2702_v54, 2  ;;  %v543_v42 = vrot.slane %v2728_v38, 2 }
  0x68   : > { %4640 = vst [vmem:[#allocation48_spill] sm:$0xff] %v2951_v3  ;;  %4642 = vst [vmem:[#allocation50_spill] sm:$0xff] %v2964_v43 }
  0x6a   : > { %697 = vrot.lane.b32.xlu1 %v2922_v7, %s2420_s23  ;;  %699 = vrot.lane.b32.xlu0 %v2925_v16, %s2420_s23  ;;  %v530_v16 = vrot.slane %v2655_v62, 2  ;;  %v560_v7 = vrot.slane %v2805_v44, 2 }
  0x6c   : > { %v2961_v62 = vsel %vm486_vm2, %v528_v0, %v530_v16  ;;  %v2977_v16 = vsel %vm486_vm2, %v537_v40, %v538_v24  ;;  %v542_v0 = vrot.slane %v2725_v26, 2  ;;  %v548_v40 = vrot.slane %v2751_v21, 2 }
  0x6d   : > { %4641 = vst [vmem:[#allocation49_spill] sm:$0xff] %v2961_v62  ;;  %4644 = vst [vmem:[#allocation52_spill] sm:$0xff] %v2977_v16 }
  0x6e   : > { %701 = vrot.lane.b32.xlu1 %v2934_v33, %s2420_s23  ;;  %703 = vrot.lane.b32.xlu0 %v2937_v18, %s2420_s23  ;;  %v535_v18 = vrot.slane %v2678_v19, 2  ;;  %v555_v33 = vrot.slane %v2782_v47, 2 }
  0x70   : > { %v2974_v19 = vsel %vm486_vm2, %v533_v5, %v535_v18  ;;  %v545_v18 = vrot.slane %v2731_v31, 2  ;;  %v547_v5 = vrot.slane %v2754_v8, 2  ;;  %v552_v31 = vrot.slane %v2775_v50, 2 }
  0x71   : > { %4643 = vst [vmem:[#allocation51_spill] sm:$0xff] %v2974_v19 }
  0x72   : > { %705 = vrot.lane.b32.xlu1 %v2948_v48, %s2420_s23  ;;  %707 = vrot.lane.b32.xlu0 %v2951_v3, %s2420_s23  ;;  %v540_v3 = vrot.slane %v2705_v58, 2  ;;  %v2989_v58 = vsel %vm486_vm2, %v542_v0, %v543_v42  ;;  %v550_v48 = vrot.slane %v2757_v55, 2  ;;  %v553_v0 = vrot.slane %v2779_v12, 2 }
  0x73   : > { %4646 = vst [vmem:[#allocation54_spill] sm:$0xff] %v2989_v58 }
  0x74   : > { %v3013_v55 = vsel %vm486_vm2, %v548_v40, %v550_v48  ;;  %v3026_v47 = vsel %vm486_vm2, %v553_v0, %v555_v33 }
  0x75   : > { %4649 = vst [vmem:[#allocation57_spill] sm:$0xff] %v3013_v55  ;;  %4651 = vst [vmem:[#allocation59_spill] sm:$0xff] %v3026_v47 }
  0x76   : > { %709 = vrot.lane.b32.xlu1 %v2961_v62, %s2420_s23  ;;  %711 = vrot.lane.b32.xlu0 %v2964_v43, %s2420_s23  ;;  %v2986_v62 = vsel %vm486_vm2, %v538_v24, %v540_v3  ;;  %v3000_v3 = vsel %vm486_vm2, %v543_v42, %v545_v18  ;;  %v3003_v24 = vsel %vm486_vm2, %v547_v5, %v548_v40  ;;  %v557_v18 = vrot.slane %v2802_v20, 2 }
  0x77   : > { %4645 = vst [vmem:[#allocation53_spill] sm:$0xff] %v2986_v62  ;;  %4647 = vst [vmem:[#allocation55_spill] sm:$0xff] %v3000_v3  ;;  %v3016_v42 = vsel %vm486_vm2, %v552_v31, %v553_v0  ;;  %v558_v5 = vrot.slane %v2799_v13, 2  ;;  %v562_v40 = vrot.slane %v2821_v4, 2  ;;  %v563_v31 = vrot.slane %v2824_v63, 2 }
  0x78   : > { %4648 = vst [vmem:[#allocation56_spill] sm:$0xff] %v3003_v24  ;;  %4650 = vst [vmem:[#allocation58_spill] sm:$0xff] %v3016_v42  ;;  %v565_v0 = vrot.slane %v2827_v1, 2 }
  0x79   : > { %v3029_v48 = vsel %vm486_vm2, %v557_v18, %v558_v5  ;;  %v3040_v44 = vsel %vm486_vm2, %v558_v5, %v560_v7  ;;  %v3043_v33 = vsel %vm486_vm2, %v562_v40, %v563_v31 }
  0x7a   : > { %713 = vrot.lane.b32.xlu1 %v2974_v19, %s2420_s23  ;;  %715 = vrot.lane.b32.xlu0 %v2977_v16, %s2420_s23  ;;  %4652 = vst [vmem:[#allocation60_spill] sm:$0xff] %v3029_v48  ;;  %4654 = vst [vmem:[#allocation62_spill] sm:$0xff] %v3040_v44 }
  0x7b   : > { %4655 = vst [vmem:[#allocation63_spill] sm:$0xff] %v3043_v33 }
  0x7e   : > { %717 = vrot.lane.b32.xlu1 %v2986_v62, %s2420_s23  ;;  %719 = vrot.lane.b32.xlu0 %v2989_v58, %s2420_s23  ;;  %v287_v62 = vrot.slane %v199_v34, 7 }
  0x82   : > { %721 = vrot.lane.b32.xlu1 %v3000_v3, %s2420_s23  ;;  %723 = vrot.lane.b32.xlu0 %v3003_v24, %s2420_s23 }
  0x86   : > { %725 = vrot.lane.b32.xlu1 %v3013_v55, %s2420_s23  ;;  %727 = vrot.lane.b32.xlu0 %v3016_v42, %s2420_s23 }
  0x88   : > { %v3033_v53 = vpop.permute.xlu0 %2386 }
  0x89   : > { %4653 = vst [vmem:[#allocation61_spill] sm:$0xff] %v3033_v53 }
  0x8a   : > { %729 = vrot.lane.b32.xlu1 %v3026_v47, %s2420_s23  ;;  %731 = vrot.lane.b32.xlu0 %v3029_v48, %s2420_s23  ;;  %v3055_v48 = vsel %vm486_vm2, %v563_v31, %v565_v0 }
  0x8b   : > { %4658 = vst [vmem:[#allocation66_spill] sm:$0xff] %v3055_v48 }
  0x8c   : > { %v3046_v18 = vpop.permute.xlu1 %585  ;;  %v3048_v42 = vpop.permute.xlu0 %583 }
  0x8d   : > { %4656 = vst [vmem:[#allocation64_spill] sm:$0xff] %v3046_v18  ;;  %4657 = vst [vmem:[#allocation65_spill] sm:$0xff] %v3048_v42 }
  0x8e   : > { %733 = vrot.lane.b32.xlu1 %v3040_v44, %s2420_s23  ;;  %735 = vrot.lane.b32.xlu0 %v3043_v33, %s2420_s23 }
  0x90   : > { %v3057_v7 = vpop.permute.xlu1 %587  ;;  %v3059_v5 = vpop.permute.xlu0 %589 }
  0x91   : > { %v1352_v34 = vsel %vm1347_vm3, %v2513_v32, %v3057_v7  ;;  %v1353_v7 = vsel %vm1347_vm3, %v2509_v30, %v3059_v5 }
  0x92   : > { %737 = vrot.lane.b32.xlu1 %v3055_v48, %s2420_s23  ;;  %771 = vrot.lane.b32.xlu0 %v2503_v25, %s2421_s24 }
  0x94   : > { %v3065_v1 = vpop.permute.xlu1 %591  ;;  %v3067_v40 = vpop.permute.xlu0 %593 }
  0x96   : > { %773 = vrot.lane.b32.xlu1 %v2497_v23, %s2421_s24  ;;  %775 = vrot.lane.b32.xlu0 %v2513_v32, %s2421_s24 }
  0x98   : > { %v3073_v31 = vpop.permute.xlu1 %595  ;;  %v3075_v0 = vpop.permute.xlu0 %597 }
  0x99   : > { %v1356_v5 = vsel %vm1347_vm3, %v2556_v52, %v3073_v31 }
  0x9a   : > { %777 = vrot.lane.b32.xlu1 %v2509_v30, %s2421_s24  ;;  %779 = vrot.lane.b32.xlu0 %v2536_v41, %s2421_s24 }
  0x9c   : > { %v3081_v48 = vpop.permute.xlu1 %599  ;;  %v3083_v33 = vpop.permute.xlu0 %601 }
  0x9e   : > { %781 = vrot.lane.b32.xlu1 %v2520_v35, %s2421_s24  ;;  %783 = vrot.lane.b32.xlu0 %v2556_v52, %s2421_s24 }
  0xa0   : > { %v3089_v44 = vpop.permute.xlu1 %603  ;;  %v3091_v23 = vpop.permute.xlu0 %605 }
  0xa2   : > { %785 = vrot.lane.b32.xlu1 %v2553_v51, %s2421_s24  ;;  %787 = vrot.lane.b32.xlu0 %v2573_v59, %s2421_s24 }
  0xa4   : > { %v3097_v18 = vpop.permute.xlu1 %607  ;;  %v3099_v25 = vpop.permute.xlu0 %609 }
  0xa6   : > { %789 = vrot.lane.b32.xlu1 %v2581_v6, %s2421_s24  ;;  %791 = vrot.lane.b32.xlu0 %v2593_v10, %s2421_s24 }
  0xa8   : > { %v3105_v42 = vpop.permute.xlu1 %611  ;;  %v3107_v47 = vpop.permute.xlu0 %613 }
  0xa9   : > { %4659 = vst [vmem:[#allocation67_spill] sm:$0xff] %v3105_v42  ;;  %4660 = vst [vmem:[#allocation68_spill] sm:$0xff] %v3107_v47 }
  0xaa   : > { %793 = vrot.lane.b32.xlu1 %v2603_v17, %s2421_s24  ;;  %795 = vrot.lane.b32.xlu0 %v2623_v28, %s2421_s24 }
  0xac   : > { %v3113_v53 = vpop.permute.xlu1 %615  ;;  %v3115_v55 = vpop.permute.xlu0 %617 }
  0xad   : > { %4661 = vst [vmem:[#allocation69_spill] sm:$0xff] %v3113_v53  ;;  %4662 = vst [vmem:[#allocation70_spill] sm:$0xff] %v3115_v55 }
  0xae   : > { %797 = vrot.lane.b32.xlu1 %v2620_v27, %s2421_s24  ;;  %799 = vrot.lane.b32.xlu0 %v2652_v61, %s2421_s24 }
  0xb0   : > { %v3121_v24 = vpop.permute.xlu1 %619  ;;  %v3123_v42 = vpop.permute.xlu0 %621 }
  0xb2   : > { %801 = vrot.lane.b32.xlu1 %v2649_v60, %s2421_s24  ;;  %803 = vrot.lane.b32.xlu0 %v2671_v11, %s2421_s24 }
  0xb4   : > { %v3129_v47 = vpop.permute.xlu1 %623  ;;  %v3131_v53 = vpop.permute.xlu0 %625 }
  0xb6   : > { %805 = vrot.lane.b32.xlu1 %v2668_v9, %s2421_s24  ;;  %807 = vrot.lane.b32.xlu0 %v2696_v49, %s2421_s24 }
  0xb8   : > { %v3137_v55 = vpop.permute.xlu1 %627  ;;  %v3139_v61 = vpop.permute.xlu0 %629 }
  0xba   : > { %809 = vrot.lane.b32.xlu1 %v2702_v54, %s2421_s24  ;;  %811 = vrot.lane.b32.xlu0 %v2725_v26, %s2421_s24 }
  0xbc   : > { %v3145_v11 = vpop.permute.xlu1 %631  ;;  %v3147_v60 = vpop.permute.xlu0 %633 }
  0xbe   : > { %813 = vrot.lane.b32.xlu1 %v2728_v38, %s2421_s24  ;;  %815 = vrot.lane.b32.xlu0 %v2754_v8, %s2421_s24 }
  0xc0   : > { %v3153_v9 = vpop.permute.xlu1 %635  ;;  %v3155_v3 = vpop.permute.xlu0 %637 }
  0xc1   : > { %4663 = vst [vmem:[#allocation71_spill] sm:$0xff] %v3155_v3 }
  0xc2   : > { %817 = vrot.lane.b32.xlu1 %v2751_v21, %s2421_s24  ;;  %819 = vrot.lane.b32.xlu0 %v2775_v50, %s2421_s24 }
  0xc4   : > { %v3161_v15 = vpop.permute.xlu1 %639  ;;  %v3163_v58 = vpop.permute.xlu0 %641 }
  0xc5   : > { %4664 = vst [vmem:[#allocation72_spill] sm:$0xff] %v3161_v15  ;;  %4665 = vst [vmem:[#allocation73_spill] sm:$0xff] %v3163_v58  ;;  %v3182_v58 = vsel %vm239_vm0, 0.0, %v287_v62  ;;  %v4588_v15 = vrot.slane %v3175_v2, 7 }
  0xc6   : > { %821 = vrot.lane.b32.xlu1 %v2779_v12, %s2421_s24  ;;  %823 = vrot.lane.b32.xlu0 %v2802_v20, %s2421_s24  ;;  %4669 = vst [vmem:[#allocation77_spill] sm:$0xff] %v3182_v58 }
  0xc8   : > { %v3170_v39 = vpop.permute.xlu1 %2391  ;;  %v3172_v16 = vpop.permute.xlu0 %679 }
  0xc9   : > { %4666 = vst [vmem:[#allocation74_spill] sm:$0xff] %v3170_v39  ;;  %4667 = vst [vmem:[#allocation75_spill] sm:$0xff] %v3172_v16 }
  0xca   : > { %825 = vrot.lane.b32.xlu1 %v2799_v13, %s2421_s24  ;;  %827 = vrot.lane.b32.xlu0 %v2821_v4, %s2421_s24  ;;  %v3200_v4 = vsel %vm239_vm0, %v287_v62, %v4588_v15  ;;  %v1355_v62 = vsel %vm1347_vm3, %v2520_v35, %v3067_v40  ;;  %v1358_v40 = vsel %vm1347_vm3, %v2573_v59, %v3081_v48 }
  0xcb   : > { %4672 = vst [vmem:[#allocation80_spill] sm:$0xff] %v3200_v4  ;;  %v1360_v48 = vsel %vm1347_vm3, %v2593_v10, %v3089_v44  ;;  %v1362_v44 = vsel %vm1347_vm3, %v2623_v28, %v3097_v18 }
  0xcc   : > { %v3188_v16 = vpop.permute.xlu1 %681  ;;  %v684_v39 = vpop.permute.xlu0 %683 }
  0xcd   : > { %4670 = vst [vmem:[#allocation78_spill] sm:$0xff] %v3188_v16  ;;  %v3191_v3 = vsel %vm1380_vm4, %v1352_v34, %v684_v39  ;;  %v1354_v39 = vsel %vm1347_vm3, %v2536_v41, %v3065_v1 }
  0xce   : > { %4671 = vst [vmem:[#allocation79_spill] sm:$0xff] %v3191_v3  ;;  %829 = vrot.lane.b32.xlu1 %v2824_v63, %s2421_s24  ;;  %831 = vrot.lane.b32.xlu0 %v3182_v58, %s2421_s24 }
  0xd0   : > { %v686_v34 = vpop.permute.xlu1 %685  ;;  %v688_v16 = vpop.permute.xlu0 %687 }
  0xd1   : > { %v3209_v3 = vsel %vm1380_vm4, %v1353_v7, %v686_v34  ;;  %v3212_v58 = vsel %vm1380_vm4, %v1354_v39, %v688_v16 }
  0xd2   : > { %833 = vrot.lane.b32.xlu1 %v3200_v4, %s2421_s24  ;;  %867 = vrot.lane.b32.xlu0 %v2526_v37, %s2422_s25  ;;  %v1357_v37 = vsel %vm1347_vm3, %v2553_v51, %v3075_v0 }
  0xd4   : > { %v690_v1 = vpop.permute.xlu1 %689  ;;  %v692_v7 = vpop.permute.xlu0 %691 }
  0xd5   : > { %v3225_v16 = vsel %vm1380_vm4, %v1355_v62, %v690_v1  ;;  %v3228_v39 = vsel %vm1380_vm4, %v1356_v5, %v692_v7 }
  0xd6   : > { %869 = vrot.lane.b32.xlu1 %v2523_v36, %s2422_s25  ;;  %871 = vrot.lane.b32.xlu0 %v2543_v45, %s2422_s25  ;;  %v1359_v36 = vsel %vm1347_vm3, %v2581_v6, %v3083_v33  ;;  %v1361_v33 = vsel %vm1347_vm3, %v2603_v17, %v3091_v23  ;;  %v1363_v23 = vsel %vm1347_vm3, %v2620_v27, %v3099_v25 }
  0xd7   : > { %v1368_v25 = vsel %vm1347_vm3, %v2696_v49, %v3121_v24 }
  0xd8   : > { %v694_v31 = vpop.permute.xlu1 %693  ;;  %v696_v34 = vpop.permute.xlu0 %695 }
  0xd9   : > { %v3241_v62 = vsel %vm1380_vm4, %v1357_v37, %v694_v31  ;;  %v3244_v5 = vsel %vm1380_vm4, %v1358_v40, %v696_v34 }
  0xda   : > { %873 = vrot.lane.b32.xlu1 %v2546_v46, %s2422_s25  ;;  %875 = vrot.lane.b32.xlu0 %v2563_v56, %s2422_s25 }
  0xdc   : > { %v698_v0 = vpop.permute.xlu1 %697  ;;  %v700_v1 = vpop.permute.xlu0 %699 }
  0xdd   : > { %v3257_v7 = vsel %vm1380_vm4, %v1359_v36, %v698_v0  ;;  %v3260_v37 = vsel %vm1380_vm4, %v1360_v48, %v700_v1  ;;  %v4673_v48 = vld [vmem:[#allocation7_spill] sm:$0xff]  ;;  %v4674_v0 = vld [vmem:[#allocation20_spill] sm:$0xff] }
  0xde   : > { %877 = vrot.lane.b32.xlu1 %v2570_v57, %s2422_s25  ;;  %879 = vrot.lane.b32.xlu0 %v2596_v14, %s2422_s25 }
  0xe0   : > { %v702_v40 = vpop.permute.xlu1 %701  ;;  %v704_v31 = vpop.permute.xlu0 %703 }
  0xe1   : > { %v3273_v34 = vsel %vm1380_vm4, %v1361_v33, %v702_v40  ;;  %v3276_v36 = vsel %vm1380_vm4, %v1362_v44, %v704_v31  ;;  %v4675_v33 = vld [vmem:[#allocation21_spill] sm:$0xff] }
  0xe2   : > { %881 = vrot.lane.b32.xlu1 %v4673_v48, %s2422_s25  ;;  %899 = vrot.lane.b32.xlu0 %v4674_v0, %s2422_s25 }
  0xe4   : > { %v706_v1 = vpop.permute.xlu1 %705  ;;  %v3285_v18 = vpop.permute.xlu0 %707 }
  0xe5   : > { %v3288_v15 = vsel %vm1380_vm4, %v1363_v23, %v706_v1 }
  0xe6   : > { %901 = vrot.lane.b32.xlu1 %v4675_v33, %s2422_s25  ;;  %963 = vrot.lane.b32.xlu0 %v2859_v22, %s2423_s26  ;;  %v1370_v22 = vsel %vm1347_vm3, %v2725_v26, %v3129_v47 }
  0xe8   : > { %v3294_v44 = vpop.permute.xlu1 %709  ;;  %v3296_v40 = vpop.permute.xlu0 %711 }
  0xea   : > { %995 = vrot.lane.b32.xlu1 %v2964_v43, %s2423_s26  ;;  %965 = vrot.lane.b32.xlu0 %v2870_v29, %s2423_s26  ;;  %v1369_v29 = vsel %vm1347_vm3, %v2702_v54, %v3123_v42  ;;  %v202_v42 = vld [vmem:[%s4465_s1 + $0x8] sm:$0xff] }
  0xec   : > { %v3305_v31 = vpop.permute.xlu1 %713  ;;  %v716_v23 = vpop.permute.xlu0 %715 }
  0xed   : > { %v3308_v1 = vsel %vm1380_vm4, %v1368_v25, %v716_v23 }
  0xee   : > { %997 = vrot.lane.b32.xlu1 %v2974_v19, %s2423_s26  ;;  %1059 = vrot.lane.b32.xlu0 %v2513_v32, %s2424_s27  ;;  %v201_v32 = vld [vmem:[%s4465_s1] sm:$0xff] }
  0xef   : > { %v2353_v47 = vpack.c.bf16 %v202_v42, %v201_v32  ;;  %v1373_v32 = vsel %vm1347_vm3, %v2751_v21, %v3139_v61  ;;  %v205_v61 = vld [vmem:[%s4465_s1 + $0x20] sm:$0xf] }
  0xf0   : > { %v718_v24 = vpop.permute.xlu1 %717  ;;  %v720_v43 = vpop.permute.xlu0 %719 }
  0xf1   : > { %v3321_v25 = vsel %vm1380_vm4, %v1369_v29, %v718_v24  ;;  %v3324_v23 = vsel %vm1380_vm4, %v1370_v22, %v720_v43  ;;  %v1371_v43 = vsel %vm1347_vm3, %v2728_v38, %v3131_v53  ;;  %v1372_v29 = vsel %vm1347_vm3, %v2754_v8, %v3137_v55  ;;  %2354 = vmatprep.subr.bf16.mxu0 %v2353_v47  ;;  %v204_v53 = vld [vmem:[%s4465_s1 + $0x18] sm:$0xff] }
  0xf2   : > { %1091 = vrot.lane.b32.xlu1 %v2696_v49, %s2424_s27  ;;  %1061 = vrot.lane.b32.xlu0 %v2509_v30, %s2424_s27  ;;  %v203_v30 = vld [vmem:[%s4465_s1 + $0x10] sm:$0xff] }
  0xf3   : > { %2361 = vmatprep.subr.bf16.mxu1 %v2353_v47  ;;  %2356 = vmatpush3.bf16.msra.mxu0 %v2353_v47  ;;  %v2357_v55 = vpack.c.bf16 %v204_v53, %v203_v30 }
  0xf4   : > { %v722_v22 = vpop.permute.xlu1 %721  ;;  %v724_v24 = vpop.permute.xlu0 %723  ;;  %2364 = vmatpush3.bf16.msra.mxu1 %v2353_v47 }
  0xf5   : > { %v3343_v19 = vsel %vm1380_vm4, %v1371_v43, %v722_v22  ;;  %v3346_v49 = vsel %vm1380_vm4, %v1372_v29, %v724_v24  ;;  %2358 = vmatprep.subr.bf16.mxu0 %v2357_v55  ;;  %2362 = vmatprep.subr.bf16.mxu1 %v2357_v55  ;;  %v4676_v29 = vld [vmem:[#allocation23_spill] sm:$0xff]  ;;  %v1376_v22 = vsel %vm1347_vm3, %v2802_v20, %v3153_v9 }
  0xf6   : > { %1093 = vrot.lane.b32.xlu1 %v2702_v54, %s2424_s27  ;;  %1155 = vrot.lane.b32.xlu0 %v2543_v45, %s2425_s5  ;;  %v1374_v54 = vsel %vm1347_vm3, %v2775_v50, %v3145_v11  ;;  %v1375_v11 = vsel %vm1347_vm3, %v2779_v12, %v3147_v60  ;;  %v4678_v60 = vld [vmem:[#allocation71_spill] sm:$0xff] }
  0xf7   : > { %2360 = vmatpush3.bf16.msra.mxu0 %v2357_v55  ;;  %v1377_v9 = vsel %vm1347_vm3, %v2799_v13, %v4678_v60 }
  0xf8   : > { %v726_v42 = vpop.permute.xlu1 %725  ;;  %v728_v47 = vpop.permute.xlu0 %727  ;;  %2365 = vmatpush3.bf16.msra.mxu1 %v2357_v55  ;;  %2303 = vmatprep.subr.msk.mxu0 %vm1708_vm5, %v205_v61  ;;  %v4677_v55 = vld [vmem:[#allocation24_spill] sm:$0xff] }
  0xf9   : > { %v3365_v45 = vsel %vm1380_vm4, %v1373_v32, %v726_v42  ;;  %v3368_v43 = vsel %vm1380_vm4, %v1374_v54, %v728_v47  ;;  %2363 = vmatprep.subr.msk.mxu1 %vm1708_vm5, %v205_v61  ;;  %v4679_v54 = vld [vmem:[#allocation72_spill] sm:$0xff]  ;;  %v4680_v42 = vld [vmem:[#allocation31_spill] sm:$0xff] }
  0xfa   : > { %1187 = vrot.lane.b32.xlu1 %v4676_v29, %s2425_s5  ;;  %903 = vrot.lane.b32.xlu0 %v4676_v29, %s2422_s25  ;;  %v1378_v47 = vsel %vm1347_vm3, %v4680_v42, %v4679_v54 }
  0xfb   : > { %2304 = vmatpush3.msk.msra.mxu0 %vm1708_vm5, %v205_v61 }
  0xfc   : > { %v730_v24 = vpop.permute.xlu1 %729  ;;  %v732_v30 = vpop.permute.xlu0 %731  ;;  %2366 = vmatpush3.msk.msra.mxu1 %vm1708_vm5, %v205_v61  ;;  %v4682_v61 = vld [vmem:[#allocation52_spill] sm:$0xff] }
  0xfd   : > { %v3384_v53 = vsel %vm1380_vm4, %v1375_v11, %v730_v24  ;;  %v3387_v32 = vsel %vm1380_vm4, %v1376_v22, %v732_v30  ;;  %v4681_v24 = vld [vmem:[#allocation36_spill] sm:$0xff]  ;;  %v4683_v30 = vld [vmem:[#allocation73_spill] sm:$0xff] }
  0xfe   : > { %1157 = vrot.lane.b32.xlu1 %v2546_v46, %s2425_s5  ;;  %1189 = vrot.lane.b32.xlu0 %v4677_v55, %s2425_s5  ;;  %v1379_v60 = vsel %vm1347_vm3, %v2824_v63, %v4683_v30 }
 0x100   : > { %v734_v29 = vpop.permute.xlu1 %733  ;;  %v736_v11 = vpop.permute.xlu0 %735 }
 0x101   : > { %v3400_v22 = vsel %vm1380_vm4, %v1377_v9, %v734_v29  ;;  %v3403_v46 = vsel %vm1380_vm4, %v1378_v47, %v736_v11  ;;  %v4684_v11 = vld [vmem:[#allocation37_spill] sm:$0xff] }
 0x102   : > { %1251 = vrot.lane.b32.xlu1 %v4681_v24, %s2426_s14  ;;  %1283 = vrot.lane.b32.xlu0 %v4682_v61, %s2426_s14 }
 0x104   : > { %v738_v54 = vpop.permute.xlu1 %737  ;;  %v3412_v33 = vpop.permute.xlu0 %771 }
 0x105   : > { %v3415_v9 = vsel %vm1380_vm4, %v1379_v60, %v738_v54  ;;  %v4685_v54 = vld [vmem:[#allocation79_spill] sm:$0xff] }
 0x106   : > { %905 = vrot.lane.b32.xlu1 %v4677_v55, %s2422_s25  ;;  %967 = vrot.lane.b32.xlu0 %v4681_v24, %s2423_s26  ;;  %v4686_v24 = vld [vmem:[#allocation53_spill] sm:$0xff] }
 0x108   : > { %v3421_v47 = vpop.permute.xlu1 %773  ;;  %v3423_v29 = vpop.permute.xlu0 %775 }
 0x10a   : > { %999 = vrot.lane.b32.xlu1 %v4682_v61, %s2423_s26  ;;  %1253 = vrot.lane.b32.xlu0 %v4684_v11, %s2426_s14 }
 0x10c   : > { %v3429_v30 = vpop.permute.xlu1 %777  ;;  %v780_v60 = vpop.permute.xlu0 %779 }
 0x10d   : > { %v3433_v55 = vsel %vm1413_vm6, %v4685_v54, %v780_v60 }
 0x10e   : > { %1285 = vrot.lane.b32.xlu1 %v4686_v24, %s2426_s14  ;;  %969 = vrot.lane.b32.xlu0 %v4684_v11, %s2423_s26 }
 0x110   : > { %v782_v0 = vpop.permute.xlu1 %781  ;;  %v784_v2 = vpop.permute.xlu0 %783 }
 0x111   : > { %v3441_v61 = vsel %vm1413_vm6, %v3209_v3, %v782_v0  ;;  %v3445_v4 = vsel %vm1413_vm6, %v3212_v58, %v784_v2  ;;  %v4693_v0 = vld [vmem:[#allocation25_spill] sm:$0xff] }
 0x112   : > { %1001 = vrot.lane.b32.xlu1 %v4686_v24, %s2423_s26  ;;  %1063 = vrot.lane.b32.xlu0 %v2536_v41, %s2424_s27 }
 0x114   : > { %v786_v60 = vpop.permute.xlu1 %785  ;;  %v788_v54 = vpop.permute.xlu0 %787 }
 0x115   : > { %v3453_v11 = vsel %vm1413_vm6, %v3225_v16, %v786_v60  ;;  %v3457_v3 = vsel %vm1413_vm6, %v3228_v39, %v788_v54 }
 0x116   : > { %4687 = vst [vmem:[#allocation7_spill] sm:$0xff] %v3453_v11  ;;  %4688 = vst [vmem:[#allocation23_spill] sm:$0xff] %v3457_v3  ;;  %1095 = vrot.lane.b32.xlu1 %v2725_v26, %s2424_s27  ;;  %1065 = vrot.lane.b32.xlu0 %v2520_v35, %s2424_s27 }
 0x118   : > { %v790_v2 = vpop.permute.xlu1 %789  ;;  %v792_v58 = vpop.permute.xlu0 %791 }
 0x119   : > { %v3465_v41 = vsel %vm1413_vm6, %v3241_v62, %v790_v2  ;;  %v3469_v16 = vsel %vm1413_vm6, %v3244_v5, %v792_v58  ;;  %v4699_v2 = vld [vmem:[#allocation54_spill] sm:$0xff] }
 0x11a   : > { %4689 = vst [vmem:[#allocation24_spill] sm:$0xff] %v3465_v41  ;;  %4690 = vst [vmem:[#allocation71_spill] sm:$0xff] %v3469_v16  ;;  %1097 = vrot.lane.b32.xlu1 %v2728_v38, %s2424_s27  ;;  %1159 = vrot.lane.b32.xlu0 %v2563_v56, %s2425_s5 }
 0x11c   : > { %v794_v26 = vpop.permute.xlu1 %793  ;;  %v796_v39 = vpop.permute.xlu0 %795 }
 0x11d   : > { %v3477_v35 = vsel %vm1413_vm6, %v3257_v7, %v794_v26  ;;  %v3481_v62 = vsel %vm1413_vm6, %v3260_v37, %v796_v39  ;;  %v4696_v37 = vld [vmem:[#allocation26_spill] sm:$0xff]  ;;  %v4700_v39 = vld [vmem:[#allocation39_spill] sm:$0xff] }
 0x11e   : > { %4691 = vst [vmem:[#allocation72_spill] sm:$0xff] %v3477_v35  ;;  %4692 = vst [vmem:[#allocation31_spill] sm:$0xff] %v3481_v62  ;;  %1191 = vrot.lane.b32.xlu1 %v4693_v0, %s2425_s5  ;;  %907 = vrot.lane.b32.xlu0 %v4693_v0, %s2422_s25  ;;  %v4724_v35 = vld [vmem:[#allocation13_spill] sm:$0xff] }
 0x120   : > { %v798_v38 = vpop.permute.xlu1 %797  ;;  %v800_v5 = vpop.permute.xlu0 %799 }
 0x121   : > { %v3489_v56 = vsel %vm1413_vm6, %v3273_v34, %v798_v38  ;;  %v3493_v7 = vsel %vm1413_vm6, %v3276_v36, %v800_v5  ;;  %v4698_v34 = vld [vmem:[#allocation38_spill] sm:$0xff] }
 0x122   : > { %4694 = vst [vmem:[#allocation36_spill] sm:$0xff] %v3489_v56  ;;  %4695 = vst [vmem:[#allocation52_spill] sm:$0xff] %v3493_v7  ;;  %1161 = vrot.lane.b32.xlu1 %v2570_v57, %s2425_s5  ;;  %1193 = vrot.lane.b32.xlu0 %v4696_v37, %s2425_s5 }
 0x124   : > { %v802_v24 = vpop.permute.xlu1 %801  ;;  %v3499_v60 = vpop.permute.xlu0 %803 }
 0x125   : > { %v3503_v54 = vsel %vm1413_vm6, %v3288_v15, %v802_v24  ;;  %v4701_v24 = vld [vmem:[#allocation55_spill] sm:$0xff] }
 0x126   : > { %4697 = vst [vmem:[#allocation73_spill] sm:$0xff] %v3503_v54  ;;  %1255 = vrot.lane.b32.xlu1 %v4698_v34, %s2426_s14  ;;  %1287 = vrot.lane.b32.xlu0 %v4699_v2, %s2426_s14  ;;  %v4720_v54 = vld [vmem:[#allocation61_spill] sm:$0xff] }
 0x127   : > { %v2388_v7 = vunpack.i.l.bf16 %v4720_v54 }
 0x128   : > { %v3509_v36 = vpop.permute.xlu1 %805  ;;  %v3511_v58 = vpop.permute.xlu0 %807 }
 0x12a   : > { %909 = vrot.lane.b32.xlu1 %v4696_v37, %s2422_s25  ;;  %971 = vrot.lane.b32.xlu0 %v4698_v34, %s2423_s26 }
 0x12c   : > { %v3517_v57 = vpop.permute.xlu1 %809  ;;  %v812_v15 = vpop.permute.xlu0 %811 }
 0x12d   : > { %v3521_v26 = vsel %vm1413_vm6, %v3308_v1, %v812_v15 }
 0x12e   : > { %1003 = vrot.lane.b32.xlu1 %v4699_v2, %s2423_s26  ;;  %1257 = vrot.lane.b32.xlu0 %v4700_v39, %s2426_s14 }
 0x130   : > { %v814_v0 = vpop.permute.xlu1 %813  ;;  %v816_v38 = vpop.permute.xlu0 %815 }
 0x131   : > { %v3529_v5 = vsel %vm1413_vm6, %v3321_v25, %v814_v0  ;;  %v3533_v37 = vsel %vm1413_vm6, %v3324_v23, %v816_v38  ;;  %v4710_v38 = vld [vmem:[#allocation27_spill] sm:$0xff] }
 0x132   : > { %1289 = vrot.lane.b32.xlu1 %v4701_v24, %s2426_s14  ;;  %973 = vrot.lane.b32.xlu0 %v4700_v39, %s2423_s26 }
 0x134   : > { %v818_v1 = vpop.permute.xlu1 %817  ;;  %v820_v34 = vpop.permute.xlu0 %819 }
 0x135   : > { %v3541_v2 = vsel %vm1413_vm6, %v3343_v19, %v818_v1  ;;  %v3545_v25 = vsel %vm1413_vm6, %v3346_v49, %v820_v34  ;;  %v4713_v1 = vld [vmem:[#allocation40_spill] sm:$0xff] }
 0x136   : > { %4702 = vst [vmem:[#allocation37_spill] sm:$0xff] %v3541_v2  ;;  %4703 = vst [vmem:[#allocation79_spill] sm:$0xff] %v3545_v25  ;;  %1005 = vrot.lane.b32.xlu1 %v4701_v24, %s2423_s26  ;;  %1067 = vrot.lane.b32.xlu0 %v2556_v52, %s2424_s27  ;;  %v4714_v34 = vld [vmem:[#allocation56_spill] sm:$0xff] }
 0x138   : > { %v822_v23 = vpop.permute.xlu1 %821  ;;  %v824_v15 = vpop.permute.xlu0 %823 }
 0x139   : > { %v3553_v39 = vsel %vm1413_vm6, %v3365_v45, %v822_v23  ;;  %v3557_v19 = vsel %vm1413_vm6, %v3368_v43, %v824_v15 }
 0x13a   : > { %4704 = vst [vmem:[#allocation53_spill] sm:$0xff] %v3553_v39  ;;  %4705 = vst [vmem:[#allocation25_spill] sm:$0xff] %v3557_v19  ;;  %1099 = vrot.lane.b32.xlu1 %v2754_v8, %s2424_s27  ;;  %1069 = vrot.lane.b32.xlu0 %v2553_v51, %s2424_s27  ;;  %v4725_v19 = vld [vmem:[#allocation3_spill] sm:$0xff]  ;;  %v4726_v39 = vld [vmem:[#allocation30_spill] sm:$0xff] }
 0x13b   : > { %v1348_v16 = vsel %vm1347_vm3, %v4725_v19, %v2388_v7 }
 0x13c   : > { %v826_v49 = vpop.permute.xlu1 %825  ;;  %v828_v0 = vpop.permute.xlu0 %827 }
 0x13d   : > { %v3565_v52 = vsel %vm1413_vm6, %v3384_v53, %v826_v49  ;;  %v3569_v45 = vsel %vm1413_vm6, %v3387_v32, %v828_v0  ;;  %v4715_v49 = vld [vmem:[#allocation41_spill] sm:$0xff] }
 0x13e   : > { %4706 = vst [vmem:[#allocation26_spill] sm:$0xff] %v3565_v52  ;;  %4707 = vst [vmem:[#allocation38_spill] sm:$0xff] %v3569_v45  ;;  %1101 = vrot.lane.b32.xlu1 %v2751_v21, %s2424_s27  ;;  %1163 = vrot.lane.b32.xlu0 %v2596_v14, %s2425_s5  ;;  %v4723_v52 = vld [vmem:[#allocation67_spill] sm:$0xff] }
 0x140   : > { %v830_v8 = vpop.permute.xlu1 %829  ;;  %v832_v43 = vpop.permute.xlu0 %831 }
 0x141   : > { %v3577_v51 = vsel %vm1413_vm6, %v3400_v22, %v830_v8  ;;  %v3581_v53 = vsel %vm1413_vm6, %v3403_v46, %v832_v43  ;;  %v4712_v22 = vld [vmem:[#allocation28_spill] sm:$0xff]  ;;  %v4717_v43 = vld [vmem:[#allocation57_spill] sm:$0xff] }
 0x142   : > { %4708 = vst [vmem:[#allocation54_spill] sm:$0xff] %v3577_v51  ;;  %4709 = vst [vmem:[#allocation39_spill] sm:$0xff] %v3581_v53  ;;  %1195 = vrot.lane.b32.xlu1 %v4710_v38, %s2425_s5  ;;  %911 = vrot.lane.b32.xlu0 %v4710_v38, %s2422_s25  ;;  %v4719_v53 = vld [vmem:[#allocation29_spill] sm:$0xff]  ;;  %v4722_v51 = vld [vmem:[#allocation74_spill] sm:$0xff] }
 0x143   : > { %v2393_v56 = vunpack.i.l.bf16 %v4722_v51 }
 0x144   : > { %v834_v21 = vpop.permute.xlu1 %833  ;;  %v868_v32 = vpop.permute.xlu0 %867 }
 0x145   : > { %v3589_v14 = vsel %vm1413_vm6, %v3415_v9, %v834_v21  ;;  %v1381_v25 = vsel %vm1380_vm4, %v1348_v16, %v2393_v56  ;;  %v4728_v56 = vld [vmem:[#allocation58_spill] sm:$0xff] }
 0x146   : > { %4711 = vst [vmem:[#allocation55_spill] sm:$0xff] %v3589_v14  ;;  %1165 = vrot.lane.b32.xlu1 %v4673_v48, %s2425_s5  ;;  %1197 = vrot.lane.b32.xlu0 %v4712_v22, %s2425_s5  ;;  %v1414_v3 = vsel %vm1413_vm6, %v1381_v25, %v3412_v33  ;;  %v2394_v33 = vunpack.i.h.bf16 %v4722_v51 }
 0x147   : > { %v1447_v2 = vsel %vm1446_vm7, %v1414_v3, %v868_v32 }
 0x148   : > { %v3595_v46 = vpop.permute.xlu1 %869  ;;  %v3597_v24 = vpop.permute.xlu0 %871 }
 0x14a   : > { %1259 = vrot.lane.b32.xlu1 %v4713_v1, %s2426_s14  ;;  %1291 = vrot.lane.b32.xlu0 %v4714_v34, %s2426_s14 }
 0x14c   : > { %v3603_v23 = vpop.permute.xlu1 %873  ;;  %v3605_v9 = vpop.permute.xlu0 %875 }
 0x14e   : > { %913 = vrot.lane.b32.xlu1 %v4712_v22, %s2422_s25  ;;  %975 = vrot.lane.b32.xlu0 %v4713_v1, %s2423_s26 }
 0x150   : > { %v3611_v48 = vpop.permute.xlu1 %877  ;;  %v3613_v15 = vpop.permute.xlu0 %879 }
 0x152   : > { %1007 = vrot.lane.b32.xlu1 %v4714_v34, %s2423_s26  ;;  %1261 = vrot.lane.b32.xlu0 %v4715_v49, %s2426_s14 }
 0x154   : > { %v3619_v0 = vpop.permute.xlu1 %881  ;;  %v900_v8 = vpop.permute.xlu0 %899 }
 0x155   : > { %4716 = vst [vmem:[#allocation27_spill] sm:$0xff] %v3619_v0  ;;  %v2389_v0 = vunpack.i.h.bf16 %v4720_v54 }
 0x156   : > { %1293 = vrot.lane.b32.xlu1 %v4717_v43, %s2426_s14  ;;  %977 = vrot.lane.b32.xlu0 %v4715_v49, %s2423_s26 }
 0x158   : > { %v3625_v38 = vpop.permute.xlu1 %901  ;;  %v964_v21 = vpop.permute.xlu0 %963 }
 0x15a   : > { %1009 = vrot.lane.b32.xlu1 %v4717_v43, %s2423_s26  ;;  %1071 = vrot.lane.b32.xlu0 %v2573_v59, %s2424_s27  ;;  %v4718_v43 = vld [vmem:[#allocation8_spill] sm:$0xff] }
 0x15c   : > { %v996_v22 = vpop.permute.xlu1 %995  ;;  %v3631_v1 = vpop.permute.xlu0 %965 }
 0x15e   : > { %1103 = vrot.lane.b32.xlu1 %v2775_v50, %s2424_s27  ;;  %1073 = vrot.lane.b32.xlu0 %v2581_v6, %s2424_s27 }
 0x160   : > { %v3637_v34 = vpop.permute.xlu1 %997  ;;  %v1060_v49 = vpop.permute.xlu0 %1059 }
 0x162   : > { %1105 = vrot.lane.b32.xlu1 %v2779_v12, %s2424_s27  ;;  %1167 = vrot.lane.b32.xlu0 %v4718_v43, %s2425_s5  ;;  %v4721_v12 = vld [vmem:[#allocation9_spill] sm:$0xff] }
 0x164   : > { %v1092_v14 = vpop.permute.xlu1 %1091  ;;  %v1062_v59 = vpop.permute.xlu0 %1061 }
 0x166   : > { %1199 = vrot.lane.b32.xlu1 %v4719_v53, %s2425_s5  ;;  %883 = vrot.lane.b32.xlu0 %v4718_v43, %s2422_s25  ;;  %v1364_v43 = vsel %vm1347_vm3, %v4724_v35, %v4723_v52 }
 0x167   : > { %v1397_v41 = vsel %vm1380_vm4, %v1364_v43, %v3285_v18  ;;  %v1480_v18 = vsel %vm1479_vm8, %v1447_v2, %v964_v21  ;;  %v4732_v43 = vld [vmem:[#allocation43_spill] sm:$0xff] }
 0x168   : > { %v3647_v50 = vpop.permute.xlu1 %1093  ;;  %v1156_v6 = vpop.permute.xlu0 %1155  ;;  %v1430_v52 = vsel %vm1413_vm6, %v1397_v41, %v3499_v60  ;;  %v1513_v3 = vsel %vm1512_vm9, %v1480_v18, %v1060_v49  ;;  %v4730_v49 = vld [vmem:[#allocation68_spill] sm:$0xff] }
 0x169   : > { %v1463_v11 = vsel %vm1446_vm7, %v1430_v52, %v900_v8  ;;  %v1546_v60 = vsel %vm1545_vm10, %v1513_v3, %v1156_v6  ;;  %v4729_v8 = vld [vmem:[#allocation2_spill] sm:$0xff]  ;;  %v4733_v3 = vld [vmem:[#allocation59_spill] sm:$0xff] }
 0x16a   : > { %915 = vrot.lane.b32.xlu1 %v4719_v53, %s2422_s25  ;;  %1169 = vrot.lane.b32.xlu0 %v4721_v12, %s2425_s5  ;;  %v4727_v53 = vld [vmem:[#allocation42_spill] sm:$0xff]  ;;  %v1496_v16 = vsel %vm1479_vm8, %v1463_v11, %v996_v22  ;;  %v1349_v21 = vsel %vm1347_vm3, %v4729_v8, %v2389_v0 }
 0x16b   : > { %v1529_v41 = vsel %vm1512_vm9, %v1496_v16, %v1092_v14  ;;  %v1382_v51 = vsel %vm1380_vm4, %v1349_v21, %v2394_v33  ;;  %v4738_v21 = vld [vmem:[#allocation69_spill] sm:$0xff] }
 0x16c   : > { %v1188_v45 = vpop.permute.xlu1 %1187  ;;  %v3655_v62 = vpop.permute.xlu0 %903 }
 0x16d   : > { %v1562_v54 = vsel %vm1545_vm10, %v1529_v41, %v1188_v45  ;;  %v1415_v45 = vsel %vm1413_vm6, %v1382_v51, %v3421_v47 }
 0x16e   : > { %1201 = vrot.lane.b32.xlu1 %v4726_v39, %s2425_s5  ;;  %1263 = vrot.lane.b32.xlu0 %v4727_v53, %s2426_s14  ;;  %v1448_v0 = vsel %vm1446_vm7, %v1415_v45, %v3595_v46  ;;  %v4740_v45 = vld [vmem:[#allocation11_spill] sm:$0xff] }
 0x170   : > { %v1158_v7 = vpop.permute.xlu1 %1157  ;;  %v1190_v19 = vpop.permute.xlu0 %1189 }
 0x172   : > { %1295 = vrot.lane.b32.xlu1 %v4728_v56, %s2426_s14  ;;  %885 = vrot.lane.b32.xlu0 %v4721_v12, %s2422_s25  ;;  %v1481_v12 = vsel %vm1479_vm8, %v1448_v0, %v3631_v1  ;;  %v4741_v0 = vld [vmem:[#allocation75_spill] sm:$0xff] }
 0x174   : > { %v1252_v2 = vpop.permute.xlu1 %1251  ;;  %v1284_v25 = vpop.permute.xlu0 %1283 }
 0x175   : > { %v1579_v11 = vsel %vm1578_vm11, %v1546_v60, %v1252_v2  ;;  %v1595_v32 = vsel %vm1578_vm11, %v1562_v54, %v1284_v25  ;;  %v4734_v60 = vld [vmem:[#allocation10_spill] sm:$0xff]  ;;  %v4735_v2 = vld [vmem:[#allocation32_spill] sm:$0xff] }
 0x176   : > { %917 = vrot.lane.b32.xlu1 %v4726_v39, %s2422_s25  ;;  %979 = vrot.lane.b32.xlu0 %v4727_v53, %s2423_s26  ;;  %v4731_v39 = vld [vmem:[#allocation12_spill] sm:$0xff]  ;;  %v1514_v53 = vsel %vm1512_vm9, %v1481_v12, %v1062_v59 }
 0x177   : > { %2305 = vmatprep.mubr.msk.f32.mxu0 %vm1611_vm12, %v1579_v11  ;;  %2329 = vmatprep.mubr.msk.f32.mxu1 %vm1611_vm12, %v1595_v32  ;;  %v1365_v6 = vsel %vm1347_vm3, %v4731_v39, %v4730_v49  ;;  %v1547_v52 = vsel %vm1545_vm10, %v1514_v53, %v1158_v7  ;;  %v4737_v11 = vld [vmem:[#allocation6_spill] sm:$0xff] }
 0x178   : > { %v3700_v14 = vpop.permute.xlu1 %905  ;;  %v968_v22 = vpop.permute.xlu0 %967  ;;  %v1398_v47 = vsel %vm1380_vm4, %v1365_v6, %v3294_v44 }
 0x179   : > { %v1431_v46 = vsel %vm1413_vm6, %v1398_v47, %v3509_v36 }
 0x17a   : > { %1011 = vrot.lane.b32.xlu1 %v4728_v56, %s2423_s26  ;;  %1265 = vrot.lane.b32.xlu0 %v4732_v43, %s2426_s14  ;;  %v1464_v1 = vsel %vm1446_vm7, %v1431_v46, %v3625_v38 }
 0x17b   : > { %v1497_v33 = vsel %vm1479_vm8, %v1464_v1, %v3637_v34 }
 0x17c   : > { %v1000_v18 = vpop.permute.xlu1 %999  ;;  %v1254_v16 = vpop.permute.xlu0 %1253  ;;  %v1530_v44 = vsel %vm1512_vm9, %v1497_v33, %v3647_v50 }
 0x17d   : > { %v1580_v56 = vsel %vm1578_vm11, %v1547_v52, %v1254_v16  ;;  %v1563_v36 = vsel %vm1545_vm10, %v1530_v44, %v1190_v19  ;;  %v4744_v44 = vld [vmem:[#allocation64_spill] sm:$0xff] }
 0x17e   : > { %1297 = vrot.lane.b32.xlu1 %v4733_v3, %s2426_s14  ;;  %981 = vrot.lane.b32.xlu0 %v4732_v43, %s2423_s26 }
 0x17f   : > { %2306 = vmatmul.mubr.msk.f32.vlgmr.msra.gmra.mrb[0].mxu0 %vm1611_vm12, %v1580_v56 }
 0x180   : > { %v1286_v59 = vpop.permute.xlu1 %1285  ;;  %v970_v38 = vpop.permute.xlu0 %969 }
 0x181   : > { %v1596_v7 = vsel %vm1578_vm11, %v1563_v36, %v1286_v59  ;;  %v4745_v36 = vld [vmem:[#allocation5_spill] sm:$0xff] }
 0x182   : > { %1013 = vrot.lane.b32.xlu1 %v4733_v3, %s2423_s26  ;;  %1075 = vrot.lane.b32.xlu0 %v2593_v10, %s2424_s27  ;;  %v1351_v59 = vsel %vm1347_vm3, %v4745_v36, %v4744_v44  ;;  %v4755_v36 = vld [vmem:[#allocation35_spill] sm:$0xff] }
 0x183   : > { %2330 = vmatmul.mubr.msk.f32.vlgmr.msra.gmra.mrb[0].mxu1 %vm1611_vm12, %v1596_v7  ;;  %v4746_v7 = vld [vmem:[#allocation60_spill] sm:$0xff] }
 0x184   : > { %v1002_v34 = vpop.permute.xlu1 %1001  ;;  %v1064_v41 = vpop.permute.xlu0 %1063 }
 0x186   : > { %1107 = vrot.lane.b32.xlu1 %v2802_v20, %s2424_s27  ;;  %1077 = vrot.lane.b32.xlu0 %v2603_v17, %s2424_s27  ;;  %v4736_v17 = vld [vmem:[#allocation65_spill] sm:$0xff] }
 0x187   : > { %v1350_v32 = vsel %vm1347_vm3, %v4737_v11, %v4736_v17  ;;  %v4748_v17 = vld [vmem:[#allocation70_spill] sm:$0xff]  ;;  %v4749_v11 = vld [vmem:[#allocation15_spill] sm:$0xff] }
 0x188   : > { %v1096_v19 = vpop.permute.xlu1 %1095  ;;  %v1066_v50 = vpop.permute.xlu0 %1065  ;;  %v1383_v49 = vsel %vm1380_vm4, %v1350_v32, %v4741_v0  ;;  %v1367_v32 = vsel %vm1347_vm3, %v4749_v11, %v4748_v17 }
 0x189   : > { %v1416_v12 = vsel %vm1413_vm6, %v1383_v49, %v3423_v29  ;;  %v4743_v29 = vld [vmem:[#allocation44_spill] sm:$0xff] }
 0x18a   : > { %1109 = vrot.lane.b32.xlu1 %v2799_v13, %s2424_s27  ;;  %1171 = vrot.lane.b32.xlu0 %v4734_v60, %s2425_s5  ;;  %v4739_v13 = vld [vmem:[#allocation16_spill] sm:$0xff]  ;;  %v1449_v46 = vsel %vm1446_vm7, %v1416_v12, %v3597_v24 }
 0x18b   : > { %v1366_v51 = vsel %vm1347_vm3, %v4739_v13, %v4738_v21  ;;  %v1482_v16 = vsel %vm1479_vm8, %v1449_v46, %v968_v22  ;;  %v4751_v46 = vld [vmem:[#allocation62_spill] sm:$0xff] }
 0x18c   : > { %v1098_v54 = vpop.permute.xlu1 %1097  ;;  %v1160_v10 = vpop.permute.xlu0 %1159  ;;  %v1399_v6 = vsel %vm1380_vm4, %v1366_v51, %v3296_v40  ;;  %v4742_v40 = vld [vmem:[#allocation33_spill] sm:$0xff] }
 0x18d   : > { %v1432_v43 = vsel %vm1413_vm6, %v1399_v6, %v3511_v58  ;;  %v1515_v58 = vsel %vm1512_vm9, %v1482_v16, %v1064_v41  ;;  %v4747_v41 = vld [vmem:[#allocation78_spill] sm:$0xff] }
 0x18e   : > { %1203 = vrot.lane.b32.xlu1 %v4735_v2, %s2425_s5  ;;  %887 = vrot.lane.b32.xlu0 %v4734_v60, %s2422_s25  ;;  %v1465_v52 = vsel %vm1446_vm7, %v1432_v43, %v3655_v62  ;;  %v1548_v33 = vsel %vm1545_vm10, %v1515_v58, %v1160_v10 }
 0x18f   : > { %v1498_v1 = vsel %vm1479_vm8, %v1465_v52, %v1000_v18 }
 0x190   : > { %v1192_v20 = vpop.permute.xlu1 %1191  ;;  %v3750_v25 = vpop.permute.xlu0 %907  ;;  %v1531_v56 = vsel %vm1512_vm9, %v1498_v1, %v1096_v19  ;;  %v1384_v19 = vsel %vm1380_vm4, %v1351_v59, %v4747_v41  ;;  %v4756_v59 = vld [vmem:[#allocation46_spill] sm:$0xff] }
 0x191   : > { %v1564_v24 = vsel %vm1545_vm10, %v1531_v56, %v1192_v20  ;;  %v1417_v60 = vsel %vm1413_vm6, %v1384_v19, %v3429_v30  ;;  %v1400_v30 = vsel %vm1380_vm4, %v1367_v32, %v3305_v31  ;;  %v4750_v31 = vld [vmem:[#allocation45_spill] sm:$0xff]  ;;  %v1452_v19 = vsel %vm1446_vm7, %v3441_v61, %v3611_v48 }
 0x192   : > { %919 = vrot.lane.b32.xlu1 %v4735_v2, %s2422_s25  ;;  %1173 = vrot.lane.b32.xlu0 %v4740_v45, %s2425_s5  ;;  %v1450_v20 = vsel %vm1446_vm7, %v1417_v60, %v3603_v23  ;;  %v1433_v23 = vsel %vm1413_vm6, %v1400_v30, %v3517_v57 }
 0x193   : > { %v1483_v21 = vsel %vm1479_vm8, %v1450_v20, %v970_v38  ;;  %v1466_v38 = vsel %vm1446_vm7, %v1433_v23, %v3700_v14 }
 0x194   : > { %v1162_v47 = vpop.permute.xlu1 %1161  ;;  %v1194_v53 = vpop.permute.xlu0 %1193  ;;  %v1516_v51 = vsel %vm1512_vm9, %v1483_v21, %v1066_v50  ;;  %v1499_v12 = vsel %vm1479_vm8, %v1466_v38, %v1002_v34 }
 0x195   : > { %v1532_v50 = vsel %vm1512_vm9, %v1499_v12, %v1098_v54 }
 0x196   : > { %1205 = vrot.lane.b32.xlu1 %v4742_v40, %s2425_s5  ;;  %1267 = vrot.lane.b32.xlu0 %v4743_v29, %s2426_s14  ;;  %v1565_v57 = vsel %vm1545_vm10, %v1532_v50, %v1194_v53 }
 0x198   : > { %v1256_v3 = vpop.permute.xlu1 %1255  ;;  %v1288_v62 = vpop.permute.xlu0 %1287 }
 0x199   : > { %v1581_v22 = vsel %vm1578_vm11, %v1548_v33, %v1256_v3  ;;  %v1597_v18 = vsel %vm1578_vm11, %v1564_v24, %v1288_v62  ;;  %v4754_v3 = vld [vmem:[#allocation17_spill] sm:$0xff] }
 0x19a   : > { %1299 = vrot.lane.b32.xlu1 %v4746_v7, %s2426_s14  ;;  %889 = vrot.lane.b32.xlu0 %v4740_v45, %s2422_s25  ;;  %v1549_v45 = vsel %vm1545_vm10, %v1516_v51, %v1162_v47 }
 0x19b   : > { %2308 = vmatprep.mubr.msk.f32.mxu0 %vm1611_vm12, %v1581_v22  ;;  %2332 = vmatprep.mubr.msk.f32.mxu1 %vm1611_vm12, %v1597_v18 }
 0x19c   : > { %v3799_v10 = vpop.permute.xlu1 %909  ;;  %v972_v2 = vpop.permute.xlu0 %971 }
 0x19d   : > { %v1468_v30 = vsel %vm1446_vm7, %v3529_v5, %v3799_v10  ;;  %v4758_v10 = vld [vmem:[#allocation47_spill] sm:$0xff] }
 0x19e   : > { %921 = vrot.lane.b32.xlu1 %v4742_v40, %s2422_s25  ;;  %983 = vrot.lane.b32.xlu0 %v4743_v29, %s2423_s26  ;;  %v4752_v40 = vld [vmem:[#allocation14_spill] sm:$0xff] }
 0x1a0   : > { %v1004_v0 = vpop.permute.xlu1 %1003  ;;  %v1258_v49 = vpop.permute.xlu0 %1257 }
 0x1a1   : > { %v1582_v6 = vsel %vm1578_vm11, %v1549_v45, %v1258_v49 }
 0x1a2   : > { %1015 = vrot.lane.b32.xlu1 %v4746_v7, %s2423_s26  ;;  %1269 = vrot.lane.b32.xlu0 %v4750_v31, %s2426_s14 }
 0x1a3   : > { %2309 = vmatmul.mubr.msk.f32.gmra.mrb[2].mxu0 %vm1611_vm12, %v1582_v6  ;;  %v4759_v6 = vld [vmem:[#allocation66_spill] sm:$0xff] }
 0x1a4   : > { %v1290_v43 = vpop.permute.xlu1 %1289  ;;  %v974_v47 = vpop.permute.xlu0 %973 }
 0x1a5   : > { %v1598_v14 = vsel %vm1578_vm11, %v1565_v57, %v1290_v43  ;;  %v1485_v60 = vsel %vm1479_vm8, %v1452_v19, %v974_v47  ;;  %v4760_v43 = vld [vmem:[#allocation77_spill] sm:$0xff]  ;;  %v4768_v19 = vld [vmem:[#allocation7_spill] sm:$0xff] }
 0x1a6   : > { %1301 = vrot.lane.b32.xlu1 %v4751_v46, %s2426_s14  ;;  %985 = vrot.lane.b32.xlu0 %v4750_v31, %s2423_s26  ;;  %v569_v47 = vrot.slane %v4760_v43, 1 }
 0x1a7   : > { %2333 = vmatmul.mubr.msk.f32.gmra.mrb[2].mxu1 %vm1611_vm12, %v1598_v14  ;;  %v4761_v14 = vld [vmem:[#allocation80_spill] sm:$0xff] }
 0x1a8   : > { %v1006_v34 = vpop.permute.xlu1 %1005  ;;  %v1068_v52 = vpop.permute.xlu0 %1067 }
 0x1a9   : > { %v1501_v48 = vsel %vm1479_vm8, %v1468_v30, %v1006_v34  ;;  %v4769_v30 = vld [vmem:[#allocation37_spill] sm:$0xff] }
 0x1aa   : > { %1017 = vrot.lane.b32.xlu1 %v4751_v46, %s2423_s26  ;;  %1079 = vrot.lane.b32.xlu0 %v2623_v28, %s2424_s27  ;;  %v4753_v28 = vld [vmem:[#allocation34_spill] sm:$0xff]  ;;  %v570_v46 = vrot.slane %v4761_v14, 1 }
 0x1ac   : > { %v1100_v54 = vpop.permute.xlu1 %1099  ;;  %v1070_v53 = vpop.permute.xlu0 %1069 }
 0x1ad   : > { %v1518_v20 = vsel %vm1512_vm9, %v1485_v60, %v1070_v53 }
 0x1ae   : > { %1111 = vrot.lane.b32.xlu1 %v4680_v42, %s2424_s27  ;;  %1081 = vrot.lane.b32.xlu0 %v2620_v27, %s2424_s27  ;;  %v1451_v27 = vsel %vm1446_vm7, %v3433_v55, %v3605_v9 }
 0x1af   : > { %v1484_v33 = vsel %vm1479_vm8, %v1451_v27, %v972_v2  ;;  %v4757_v2 = vld [vmem:[#allocation63_spill] sm:$0xff] }
 0x1b0   : > { %v1102_v16 = vpop.permute.xlu1 %1101  ;;  %v1164_v1 = vpop.permute.xlu0 %1163  ;;  %v1517_v62 = vsel %vm1512_vm9, %v1484_v33, %v1068_v52 }
 0x1b1   : > { %v1550_v55 = vsel %vm1545_vm10, %v1517_v62, %v1164_v1  ;;  %v1534_v51 = vsel %vm1512_vm9, %v1501_v48, %v1102_v16  ;;  %v4763_v1 = vld [vmem:[#allocation76_spill] sm:$0xff]  ;;  %v574_v62 = vrot.slane %v4760_v43, 2 }
 0x1b2   : > { %1113 = vrot.lane.b32.xlu1 %v2824_v63, %s2424_s27  ;;  %1175 = vrot.lane.b32.xlu0 %v4752_v40, %s2425_s5  ;;  %v1467_v63 = vsel %vm1446_vm7, %v3521_v26, %v3750_v25 }
 0x1b3   : > { %v1500_v24 = vsel %vm1479_vm8, %v1467_v63, %v1004_v0 }
 0x1b4   : > { %v1196_v29 = vpop.permute.xlu1 %1195  ;;  %v3846_v58 = vpop.permute.xlu0 %911  ;;  %v1533_v22 = vsel %vm1512_vm9, %v1500_v24, %v1100_v54  ;;  %v571_v54 = vsel %vm405_vm1, %v569_v47, %v570_v46 }
 0x1b5   : > { %v1566_v9 = vsel %vm1545_vm10, %v1533_v22, %v1196_v29  ;;  %v1453_v29 = vsel %vm1446_vm7, %v3445_v4, %v3613_v15  ;;  %v1469_v24 = vsel %vm1446_vm7, %v3533_v37, %v3846_v58  ;;  %v575_v22 = vrot.slane %v4761_v14, 2 }
 0x1b6   : > { %1207 = vrot.lane.b32.xlu1 %v4753_v28, %s2425_s5  ;;  %891 = vrot.lane.b32.xlu0 %v4752_v40, %s2422_s25 }
 0x1b8   : > { %v1166_v42 = vpop.permute.xlu1 %1165  ;;  %v1198_v56 = vpop.permute.xlu0 %1197 }
 0x1b9   : > { %v1551_v17 = vsel %vm1545_vm10, %v1518_v20, %v1166_v42  ;;  %v1567_v23 = vsel %vm1545_vm10, %v1534_v51, %v1198_v56 }
 0x1ba   : > { %923 = vrot.lane.b32.xlu1 %v4753_v28, %s2422_s25  ;;  %1177 = vrot.lane.b32.xlu0 %v4754_v3, %s2425_s5 }
 0x1bc   : > { %v1260_v18 = vpop.permute.xlu1 %1259  ;;  %v1292_v26 = vpop.permute.xlu0 %1291 }
 0x1bd   : > { %v1583_v25 = vsel %vm1578_vm11, %v1550_v55, %v1260_v18  ;;  %v1599_v44 = vsel %vm1578_vm11, %v1566_v9, %v1292_v26 }
 0x1be   : > { %1209 = vrot.lane.b32.xlu1 %v4755_v36, %s2425_s5  ;;  %1271 = vrot.lane.b32.xlu0 %v4756_v59, %s2426_s14 }
 0x1bf   : > { %2311 = vmatprep.mubr.msk.f32.mxu0 %vm1611_vm12, %v1583_v25  ;;  %2335 = vmatprep.mubr.msk.f32.mxu1 %vm1611_vm12, %v1599_v44  ;;  %v4766_v25 = vld [vmem:[#allocation48_spill] sm:$0xff]  ;;  %v576_v44 = vsel %vm486_vm2, %v574_v62, %v575_v22 }
 0x1c0   : > { %v3876_v7 = vpop.permute.xlu1 %913  ;;  %v976_v41 = vpop.permute.xlu0 %975 }
 0x1c1   : > { %v1486_v28 = vsel %vm1479_vm8, %v1453_v29, %v976_v41  ;;  %v4767_v41 = vld [vmem:[#allocation27_spill] sm:$0xff] }
 0x1c2   : > { %1303 = vrot.lane.b32.xlu1 %v4757_v2, %s2426_s14  ;;  %893 = vrot.lane.b32.xlu0 %v4754_v3, %s2422_s25  ;;  %v4765_v3 = vld [vmem:[#allocation19_spill] sm:$0xff]  ;;  %v1454_v60 = vsel %vm1446_vm7, %v4768_v19, %v4767_v41  ;;  %v4781_v19 = vld [vmem:[#allocation53_spill] sm:$0xff] }
 0x1c4   : > { %v1008_v32 = vpop.permute.xlu1 %1007  ;;  %v1262_v21 = vpop.permute.xlu0 %1261 }
 0x1c5   : > { %v1584_v61 = vsel %vm1578_vm11, %v1551_v17, %v1262_v21  ;;  %v1502_v15 = vsel %vm1479_vm8, %v1469_v24, %v1008_v32  ;;  %v4778_v24 = vld [vmem:[#allocation22_spill] sm:$0xff] }
 0x1c6   : > { %925 = vrot.lane.b32.xlu1 %v4755_v36, %s2422_s25  ;;  %987 = vrot.lane.b32.xlu0 %v4756_v59, %s2423_s26 }
 0x1c7   : > { %2312 = vmatmul.mubr.msk.f32.gmra.mrb[4].mxu0 %vm1611_vm12, %v1584_v61  ;;  %v1470_v61 = vsel %vm1446_vm7, %v4769_v30, %v3876_v7 }
 0x1c8   : > { %v1294_v45 = vpop.permute.xlu1 %1293  ;;  %v978_v0 = vpop.permute.xlu0 %977 }
 0x1c9   : > { %v1600_v5 = vsel %vm1578_vm11, %v1567_v23, %v1294_v45 }
 0x1ca   : > { %1019 = vrot.lane.b32.xlu1 %v4757_v2, %s2423_s26  ;;  %1273 = vrot.lane.b32.xlu0 %v4758_v10, %s2426_s14  ;;  %v1487_v2 = vsel %vm1479_vm8, %v1454_v60, %v978_v0 }
 0x1cb   : > { %2336 = vmatmul.mubr.msk.f32.gmra.mrb[4].mxu1 %vm1611_vm12, %v1600_v5 }
 0x1cc   : > { %v1010_v49 = vpop.permute.xlu1 %1009  ;;  %v1072_v38 = vpop.permute.xlu0 %1071 }
 0x1cd   : > { %v1519_v42 = vsel %vm1512_vm9, %v1486_v28, %v1072_v38  ;;  %v1503_v51 = vsel %vm1479_vm8, %v1470_v61, %v1010_v49  ;;  %v4770_v49 = vld [vmem:[#allocation49_spill] sm:$0xff] }
 0x1ce   : > { %1305 = vrot.lane.b32.xlu1 %v4759_v6, %s2426_s14  ;;  %989 = vrot.lane.b32.xlu0 %v4758_v10, %s2423_s26 }
 0x1d0   : > { %v1104_v12 = vpop.permute.xlu1 %1103  ;;  %v1074_v31 = vpop.permute.xlu0 %1073 }
 0x1d1   : > { %v1535_v55 = vsel %vm1512_vm9, %v1502_v15, %v1104_v12  ;;  %v1520_v20 = vsel %vm1512_vm9, %v1487_v2, %v1074_v31 }
 0x1d2   : > { %1021 = vrot.lane.b32.xlu1 %v4759_v6, %s2423_s26  ;;  %1083 = vrot.lane.b32.xlu0 %v4724_v35, %s2424_s27  ;;  %v4762_v35 = vld [vmem:[#allocation18_spill] sm:$0xff] }
 0x1d4   : > { %v1106_v50 = vpop.permute.xlu1 %1105  ;;  %v1168_v57 = vpop.permute.xlu0 %1167 }
 0x1d5   : > { %v1552_v27 = vsel %vm1545_vm10, %v1519_v42, %v1168_v57  ;;  %v1536_v23 = vsel %vm1512_vm9, %v1503_v51, %v1106_v50  ;;  %v4771_v57 = vld [vmem:[#allocation3_spill] sm:$0xff] }
 0x1d6   : > { %1115 = vrot.lane.b32.xlu1 %v4760_v43, %s2424_s27  ;;  %1085 = vrot.lane.b32.xlu0 %v4731_v39, %s2424_s27  ;;  %v4764_v39 = vrot.slane %v4763_v1, 7  ;;  %v2395_v43 = vpack.i.bf16 %v4729_v8, %v4771_v57  ;;  %v4774_v1 = vld [vmem:[#allocation23_spill] sm:$0xff] }
 0x1d8   : > { %v1200_v34 = vpop.permute.xlu1 %1199  ;;  %v3920_v52 = vpop.permute.xlu0 %883  ;;  %v372_v40 = vsel %vm239_vm0, %v4764_v39, 0.0 }
 0x1d9   : > { %v572_v56 = vrot.slane %v372_v40, 1  ;;  %v1568_v37 = vsel %vm1545_vm10, %v1535_v55, %v1200_v34  ;;  %v577_v45 = vrot.slane %v372_v40, 2  ;;  %v1455_v8 = vsel %vm1446_vm7, %v4774_v1, %v3920_v52  ;;  %v4775_v40 = vld [vmem:[#allocation21_spill] sm:$0xff] }
 0x1da   : > { %1117 = vrot.lane.b32.xlu1 %v4761_v14, %s2424_s27  ;;  %1179 = vrot.lane.b32.xlu0 %v4762_v35, %s2425_s5 }
 0x1db   : > { %v573_v9 = vsel %vm405_vm1, %v570_v46, %v572_v56  ;;  %v578_v38 = vsel %vm486_vm2, %v575_v22, %v577_v45 }
 0x1dc   : > { %v3927_v53 = vpop.permute.xlu1 %915  ;;  %v1170_v16 = vpop.permute.xlu0 %1169 }
 0x1dd   : > { %v1553_v17 = vsel %vm1545_vm10, %v1520_v20, %v1170_v16 }
 0x1de   : > { %1211 = vrot.lane.b32.xlu1 %v571_v54, %s2425_s5  ;;  %895 = vrot.lane.b32.xlu0 %v4762_v35, %s2422_s25  ;;  %v4772_v35 = vld [vmem:[#allocation20_spill] sm:$0xff] }
 0x1e0   : > { %v1202_v63 = vpop.permute.xlu1 %1201  ;;  %v1264_v33 = vpop.permute.xlu0 %1263 }
 0x1e1   : > { %v1585_v4 = vsel %vm1578_vm11, %v1552_v27, %v1264_v33  ;;  %v1569_v0 = vsel %vm1545_vm10, %v1536_v23, %v1202_v63  ;;  %v4777_v27 = vld [vmem:[#allocation79_spill] sm:$0xff] }
 0x1e2   : > { %927 = vrot.lane.b32.xlu1 %v571_v54, %s2422_s25  ;;  %1181 = vrot.lane.b32.xlu0 %v4765_v3, %s2425_s5  ;;  %v4773_v54 = vld [vmem:[#allocation4_spill] sm:$0xff]  ;;  %v1471_v63 = vsel %vm1446_vm7, %v4777_v27, %v3927_v53  ;;  %v4785_v27 = vld [vmem:[#allocation26_spill] sm:$0xff] }
 0x1e3   : > { %2314 = vmatprep.mubr.msk.f32.mxu0 %vm1611_vm12, %v1585_v4  ;;  %v4779_v4 = vld [vmem:[#allocation51_spill] sm:$0xff] }
 0x1e4   : > { %v1296_v58 = vpop.permute.xlu1 %1295  ;;  %v3955_v18 = vpop.permute.xlu0 %885 }
 0x1e5   : > { %v1601_v26 = vsel %vm1578_vm11, %v1568_v37, %v1296_v58  ;;  %v4780_v37 = vld [vmem:[#allocation24_spill] sm:$0xff] }
 0x1e6   : > { %1213 = vrot.lane.b32.xlu1 %v573_v9, %s2425_s5  ;;  %1275 = vrot.lane.b32.xlu0 %v4766_v25, %s2426_s14  ;;  %v1456_v58 = vsel %vm1446_vm7, %v4780_v37, %v3955_v18 }
 0x1e7   : > { %2338 = vmatprep.mubr.msk.f32.mxu1 %vm1611_vm12, %v1601_v26 }
 0x1e8   : > { %v3963_v36 = vpop.permute.xlu1 %917  ;;  %v980_v59 = vpop.permute.xlu0 %979 }
 0x1e9   : > { %v1488_v39 = vsel %vm1479_vm8, %v1455_v8, %v980_v59  ;;  %v1472_v60 = vsel %vm1446_vm7, %v4781_v19, %v3963_v36 }
 0x1ea   : > { %1307 = vrot.lane.b32.xlu1 %v576_v44, %s2426_s14  ;;  %897 = vrot.lane.b32.xlu0 %v4765_v3, %s2422_s25 }
 0x1ec   : > { %v1012_v32 = vpop.permute.xlu1 %1011  ;;  %v1266_v21 = vpop.permute.xlu0 %1265 }
 0x1ed   : > { %v1586_v48 = vsel %vm1578_vm11, %v1553_v17, %v1266_v21  ;;  %v1504_v33 = vsel %vm1479_vm8, %v1471_v63, %v1012_v32 }
 0x1ee   : > { %929 = vrot.lane.b32.xlu1 %v573_v9, %s2422_s25  ;;  %991 = vrot.lane.b32.xlu0 %v4766_v25, %s2423_s26 }
 0x1ef   : > { %2315 = vmatmul.mubr.msk.f32.gmra.mrb[6].mxu0 %vm1611_vm12, %v1586_v48 }
 0x1f0   : > { %v1298_v5 = vpop.permute.xlu1 %1297  ;;  %v982_v10 = vpop.permute.xlu0 %981 }
 0x1f1   : > { %v1602_v7 = vsel %vm1578_vm11, %v1569_v0, %v1298_v5  ;;  %v1489_v26 = vsel %vm1479_vm8, %v1456_v58, %v982_v10 }
 0x1f2   : > { %1023 = vrot.lane.b32.xlu1 %v576_v44, %s2423_s26  ;;  %1277 = vrot.lane.b32.xlu0 %v4770_v49, %s2426_s14 }
 0x1f3   : > { %2339 = vmatmul.mubr.msk.f32.gmra.mrb[6].mxu1 %vm1611_vm12, %v1602_v7 }
 0x1f4   : > { %v1014_v6 = vpop.permute.xlu1 %1013  ;;  %v1076_v12 = vpop.permute.xlu0 %1075 }
 0x1f5   : > { %v1521_v29 = vsel %vm1512_vm9, %v1488_v39, %v1076_v12  ;;  %v1505_v20 = vsel %vm1479_vm8, %v1472_v60, %v1014_v6  ;;  %v4786_v60 = vld [vmem:[#allocation31_spill] sm:$0xff] }
 0x1f6   : > { %1309 = vrot.lane.b32.xlu1 %v578_v38, %s2426_s14  ;;  %993 = vrot.lane.b32.xlu0 %v4770_v49, %s2423_s26  ;;  %v4782_v49 = vld [vmem:[#allocation71_spill] sm:$0xff] }
 0x1f8   : > { %v1108_v31 = vpop.permute.xlu1 %1107  ;;  %v1078_v50 = vpop.permute.xlu0 %1077 }
 0x1f9   : > { %v1537_v15 = vsel %vm1512_vm9, %v1504_v33, %v1108_v31  ;;  %v1522_v25 = vsel %vm1512_vm9, %v1489_v26, %v1078_v50 }
 0x1fa   : > { %1025 = vrot.lane.b32.xlu1 %v578_v38, %s2423_s26  ;;  %1087 = vrot.lane.b32.xlu0 %v4739_v13, %s2424_s27 }
 0x1fc   : > { %v1110_v47 = vpop.permute.xlu1 %1109  ;;  %v1172_v14 = vpop.permute.xlu0 %1171 }
 0x1fd   : > { %v1554_v28 = vsel %vm1545_vm10, %v1521_v29, %v1172_v14  ;;  %v1538_v18 = vsel %vm1512_vm9, %v1505_v20, %v1110_v47 }
 0x1fe   : > { %2396 = vrot.lane.b32.xlu1 %v2395_v43, %s2424_s27  ;;  %1089 = vrot.lane.b32.xlu0 %v4749_v11, %s2424_s27  ;;  %v4776_v11 = vld [vmem:[#allocation50_spill] sm:$0xff]  ;;  %v4783_v43 = vld [vmem:[#allocation25_spill] sm:$0xff] }
 0x200   : > { %v1204_v46 = vpop.permute.xlu1 %1203  ;;  %v888_v34 = vpop.permute.xlu0 %887 }
 0x201   : > { %v1570_v3 = vsel %vm1545_vm10, %v1537_v15, %v1204_v46  ;;  %v1457_v38 = vsel %vm1446_vm7, %v4782_v49, %v888_v34 }
 0x202   : > { %1183 = vrot.lane.b32.xlu1 %v4772_v35, %s2425_s5  ;;  %2401 = vrot.lane.b32.xlu0 %v4773_v54, %s2425_s5 }
 0x204   : > { %v920_v16 = vpop.permute.xlu1 %919  ;;  %v1174_v13 = vpop.permute.xlu0 %1173 }
 0x205   : > { %v1555_v44 = vsel %vm1545_vm10, %v1522_v25, %v1174_v13  ;;  %v1473_v47 = vsel %vm1446_vm7, %v4783_v43, %v920_v16 }
 0x206   : > { %1185 = vrot.lane.b32.xlu1 %v4775_v40, %s2425_s5  ;;  %1279 = vrot.lane.b32.xlu0 %v4776_v11, %s2426_s14  ;;  %v4784_v40 = vld [vmem:[#allocation72_spill] sm:$0xff] }
 0x208   : > { %v1206_v42 = vpop.permute.xlu1 %1205  ;;  %v1268_v56 = vpop.permute.xlu0 %1267 }
 0x209   : > { %v1587_v52 = vsel %vm1578_vm11, %v1554_v28, %v1268_v56  ;;  %v1571_v17 = vsel %vm1545_vm10, %v1538_v18, %v1206_v42 }
 0x20a   : > { %2406 = vrot.lane.b32.xlu1 %v4778_v24, %s2426_s14  ;;  %1281 = vrot.lane.b32.xlu0 %v4779_v4, %s2426_s14 }
 0x20b   : > { %2317 = vmatprep.mubr.msk.f32.mxu0 %vm1611_vm12, %v1587_v52 }
 0x20c   : > { %v1300_v62 = vpop.permute.xlu1 %1299  ;;  %v890_v22 = vpop.permute.xlu0 %889 }
 0x20d   : > { %v1603_v53 = vsel %vm1578_vm11, %v1570_v3, %v1300_v62  ;;  %v1458_v16 = vsel %vm1446_vm7, %v4784_v40, %v890_v22 }
 0x20e   : > { %2341 = vmatprep.mubr.msk.f32.mxu1 %vm1611_vm12, %v1603_v53 }
 0x210   : > { %v922_v55 = vpop.permute.xlu1 %921  ;;  %v984_v9 = vpop.permute.xlu0 %983 }
 0x211   : > { %v1490_v6 = vsel %vm1479_vm8, %v1457_v38, %v984_v9  ;;  %v1474_v63 = vsel %vm1446_vm7, %v4785_v27, %v922_v55 }
 0x214   : > { %v1016_v59 = vpop.permute.xlu1 %1015  ;;  %v1270_v41 = vpop.permute.xlu0 %1269 }
 0x215   : > { %v1588_v2 = vsel %vm1578_vm11, %v1555_v44, %v1270_v41  ;;  %v1506_v46 = vsel %vm1479_vm8, %v1473_v47, %v1016_v59 }
 0x216   : > { %2318 = vmatmul.mubr.msk.f32.gmra.mrb[8].mxu0 %vm1611_vm12, %v1588_v2 }
 0x218   : > { %v1302_v32 = vpop.permute.xlu1 %1301  ;;  %v986_v21 = vpop.permute.xlu0 %985 }
 0x219   : > { %v1604_v30 = vsel %vm1578_vm11, %v1571_v17, %v1302_v32  ;;  %v1491_v11 = vsel %vm1479_vm8, %v1458_v16, %v986_v21 }
 0x21a   : > { %2342 = vmatmul.mubr.msk.f32.gmra.mrb[8].mxu1 %vm1611_vm12, %v1604_v30 }
 0x21c   : > { %v1018_v61 = vpop.permute.xlu1 %1017  ;;  %v1080_v48 = vpop.permute.xlu0 %1079 }
 0x21d   : > { %v1523_v12 = vsel %vm1512_vm9, %v1490_v6, %v1080_v48  ;;  %v1507_v33 = vsel %vm1479_vm8, %v1474_v63, %v1018_v61  ;;  %v4787_v48 = vld [vmem:[#allocation38_spill] sm:$0xff] }
 0x220   : > { %v1112_v51 = vpop.permute.xlu1 %1111  ;;  %v1082_v36 = vpop.permute.xlu0 %1081 }
 0x221   : > { %v1539_v35 = vsel %vm1512_vm9, %v1506_v46, %v1112_v51  ;;  %v1524_v29 = vsel %vm1512_vm9, %v1491_v11, %v1082_v36 }
 0x224   : > { %v1114_v23 = vpop.permute.xlu1 %1113  ;;  %v1176_v45 = vpop.permute.xlu0 %1175 }
 0x225   : > { %v1556_v31 = vsel %vm1545_vm10, %v1523_v12, %v1176_v45  ;;  %v1540_v24 = vsel %vm1512_vm9, %v1507_v33, %v1114_v23  ;;  %v4788_v12 = vld [vmem:[#allocation36_spill] sm:$0xff] }
 0x228   : > { %v1208_v0 = vpop.permute.xlu1 %1207  ;;  %v892_v5 = vpop.permute.xlu0 %891 }
 0x229   : > { %v1572_v34 = vsel %vm1545_vm10, %v1539_v35, %v1208_v0  ;;  %v1459_v2 = vsel %vm1446_vm7, %v4786_v60, %v892_v5 }
 0x22c   : > { %v924_v10 = vpop.permute.xlu1 %923  ;;  %v1178_v7 = vpop.permute.xlu0 %1177 }
 0x22d   : > { %v1557_v28 = vsel %vm1545_vm10, %v1524_v29, %v1178_v7  ;;  %v1475_v51 = vsel %vm1446_vm7, %v4787_v48, %v924_v10 }
 0x230   : > { %v1210_v50 = vpop.permute.xlu1 %1209  ;;  %v1272_v57 = vpop.permute.xlu0 %1271 }
 0x231   : > { %v1589_v14 = vsel %vm1578_vm11, %v1556_v31, %v1272_v57  ;;  %v1573_v4 = vsel %vm1545_vm10, %v1540_v24, %v1210_v50 }
 0x232   : > { %2320 = vmatprep.mubr.msk.f32.mxu0 %vm1611_vm12, %v1589_v14  ;;  %v4789_v14 = vld [vmem:[#allocation54_spill] sm:$0xff] }
 0x234   : > { %v1304_v54 = vpop.permute.xlu1 %1303  ;;  %v894_v13 = vpop.permute.xlu0 %893 }
 0x235   : > { %v1605_v1 = vsel %vm1578_vm11, %v1572_v34, %v1304_v54  ;;  %v1460_v10 = vsel %vm1446_vm7, %v4788_v12, %v894_v13 }
 0x236   : > { %2344 = vmatprep.mubr.msk.f32.mxu1 %vm1611_vm12, %v1605_v1 }
 0x238   : > { %v926_v8 = vpop.permute.xlu1 %925  ;;  %v988_v39 = vpop.permute.xlu0 %987 }
 0x239   : > { %v1492_v20 = vsel %vm1479_vm8, %v1459_v2, %v988_v39  ;;  %v1476_v46 = vsel %vm1446_vm7, %v4789_v14, %v926_v8  ;;  %v4793_v2 = vld [vmem:[#allocation55_spill] sm:$0xff] }
 0x23c   : > { %v1020_v42 = vpop.permute.xlu1 %1019  ;;  %v1274_v56 = vpop.permute.xlu0 %1273 }
 0x23d   : > { %v1590_v52 = vsel %vm1578_vm11, %v1557_v28, %v1274_v56  ;;  %v1508_v23 = vsel %vm1479_vm8, %v1475_v51, %v1020_v42  ;;  %v4790_v56 = vld [vmem:[#allocation52_spill] sm:$0xff] }
 0x23e   : > { %2321 = vmatmul.mubr.msk.f32.gmra.mrb[10].mxu0 %vm1611_vm12, %v1590_v52 }
 0x240   : > { %v1306_v15 = vpop.permute.xlu1 %1305  ;;  %v990_v3 = vpop.permute.xlu0 %989 }
 0x241   : > { %v1606_v62 = vsel %vm1578_vm11, %v1573_v4, %v1306_v15  ;;  %v1493_v31 = vsel %vm1479_vm8, %v1460_v10, %v990_v3 }
 0x242   : > { %2345 = vmatmul.mubr.msk.f32.gmra.mrb[10].mxu1 %vm1611_vm12, %v1606_v62 }
 0x244   : > { %v1022_v22 = vpop.permute.xlu1 %1021  ;;  %v1084_v53 = vpop.permute.xlu0 %1083 }
 0x245   : > { %v1525_v17 = vsel %vm1512_vm9, %v1492_v20, %v1084_v53  ;;  %v1509_v34 = vsel %vm1479_vm8, %v1476_v46, %v1022_v22  ;;  %v4791_v22 = vld [vmem:[#allocation73_spill] sm:$0xff] }
 0x248   : > { %v1116_v9 = vpop.permute.xlu1 %1115  ;;  %v1086_v55 = vpop.permute.xlu0 %1085 }
 0x249   : > { %v1541_v45 = vsel %vm1512_vm9, %v1508_v23, %v1116_v9  ;;  %v1526_v50 = vsel %vm1512_vm9, %v1493_v31, %v1086_v55 }
 0x24c   : > { %v1118_v37 = vpop.permute.xlu1 %1117  ;;  %v1180_v58 = vpop.permute.xlu0 %1179 }
 0x24d   : > { %v1558_v21 = vsel %vm1545_vm10, %v1525_v17, %v1180_v58  ;;  %v1542_v54 = vsel %vm1512_vm9, %v1509_v34, %v1118_v37  ;;  %v4792_v37 = vld [vmem:[#allocation39_spill] sm:$0xff] }
 0x250   : > { %v1212_v26 = vpop.permute.xlu1 %1211  ;;  %v896_v25 = vpop.permute.xlu0 %895 }
 0x251   : > { %v1574_v0 = vsel %vm1545_vm10, %v1541_v45, %v1212_v26  ;;  %v1461_v27 = vsel %vm1446_vm7, %v4790_v56, %v896_v25 }
 0x252   : > { %v4074_v44 = vpop.f32.mrb[0].mxu0 }
 0x253   : > { %v4076_v59 = vpop.f32.mrb[1].mxu0 }
 0x254   : > { %v928_v41 = vpop.permute.xlu1 %927  ;;  %v1182_v19 = vpop.permute.xlu0 %1181 }
 0x255   : > { %v1559_v57 = vsel %vm1545_vm10, %v1526_v50, %v1182_v19  ;;  %v1477_v58 = vsel %vm1446_vm7, %v4792_v37, %v928_v41 }
 0x256   : > { %v4081_v18 = vpop.f32.mrb[0].mxu1 }
 0x257   : > { %v4084_v32 = vpop.f32.mrb[1].mxu1 }
 0x258   : > { %v1214_v30 = vpop.permute.xlu1 %1213  ;;  %v1276_v61 = vpop.permute.xlu0 %1275 }
 0x259   : > { %v1591_v36 = vsel %vm1578_vm11, %v1558_v21, %v1276_v61  ;;  %v1575_v13 = vsel %vm1545_vm10, %v1542_v54, %v1214_v30 }
 0x25a   : > { %2323 = vmatprep.mubr.msk.f32.mxu0 %vm1611_vm12, %v1591_v36 }
 0x25c   : > { %v1308_v5 = vpop.permute.xlu1 %1307  ;;  %v898_v7 = vpop.permute.xlu0 %897 }
 0x25d   : > { %v1607_v49 = vsel %vm1578_vm11, %v1574_v0, %v1308_v5  ;;  %v1462_v53 = vsel %vm1446_vm7, %v4791_v22, %v898_v7 }
 0x25e   : > { %2347 = vmatprep.mubr.msk.f32.mxu1 %vm1611_vm12, %v1607_v49 }
 0x260   : > { %v930_v38 = vpop.permute.xlu1 %929  ;;  %v992_v6 = vpop.permute.xlu0 %991 }
 0x261   : > { %v1494_v63 = vsel %vm1479_vm8, %v1461_v27, %v992_v6  ;;  %v1478_v20 = vsel %vm1446_vm7, %v4793_v2, %v930_v38 }
 0x264   : > { %v1024_v43 = vpop.permute.xlu1 %1023  ;;  %v1278_v47 = vpop.permute.xlu0 %1277 }
 0x265   : > { %v1592_v35 = vsel %vm1578_vm11, %v1559_v57, %v1278_v47  ;;  %v1510_v17 = vsel %vm1479_vm8, %v1477_v58, %v1024_v43 }
 0x266   : > { %2324 = vmatmul.mubr.msk.f32.gmra.mrb[12].mxu0 %vm1611_vm12, %v1592_v35 }
 0x268   : > { %v1310_v1 = vpop.permute.xlu1 %1309  ;;  %v994_v39 = vpop.permute.xlu0 %993 }
 0x269   : > { %v1608_v40 = vsel %vm1578_vm11, %v1575_v13, %v1310_v1  ;;  %v1495_v26 = vsel %vm1479_vm8, %v1462_v53, %v994_v39 }
 0x26a   : > { %2348 = vmatmul.mubr.msk.f32.gmra.mrb[12].mxu1 %vm1611_vm12, %v1608_v40 }
 0x26c   : > { %v1026_v16 = vpop.permute.xlu1 %1025  ;;  %v1088_v11 = vpop.permute.xlu0 %1087 }
 0x26d   : > { %v1527_v33 = vsel %vm1512_vm9, %v1494_v63, %v1088_v11  ;;  %v1511_v61 = vsel %vm1479_vm8, %v1478_v20, %v1026_v16  ;;  %v2427_v63 = vmov (!%p2253_p4), 0.0  }
 0x26e   : > { %1942 = vst.msk [vmem:[%s4467_s3] sm:$0x3] (!%p2253_p4), %vm1941_vm13, %v2427_v63 }
 0x270   : > { %v2397_v29 = vpop.permute.xlu1 %2396  ;;  %v1090_v8 = vpop.permute.xlu0 %1089 }
 0x271   : > { %v2398_v4 = vunpack.i.l.bf16 %v2397_v29  ;;  %v2399_v9 = vunpack.i.h.bf16 %v2397_v29  ;;  %v1528_v21 = vsel %vm1512_vm9, %v1495_v26, %v1090_v8 }
 0x273   : > { %v1543_v41 = vsel %vm1512_vm9, %v1510_v17, %v2398_v4  ;;  %v1544_v23 = vsel %vm1512_vm9, %v1511_v61, %v2399_v9 }
 0x274   : > { %v1184_v28 = vpop.permute.xlu1 %1183  ;;  %v2402_v42 = vpop.permute.xlu0 %2401 }
 0x275   : > { %v1560_v15 = vsel %vm1545_vm10, %v1527_v33, %v1184_v28  ;;  %v2404_v25 = vunpack.i.h.bf16 %v2402_v42  ;;  %v2403_v19 = vunpack.i.l.bf16 %v2402_v42 }
 0x276   : > { %v4113_v52 = vpop.f32.mrb[2].mxu0 }
 0x277   : > { %v4116_v24 = vpop.f32.mrb[3].mxu0  ;;  %v1576_v7 = vsel %vm1545_vm10, %v1543_v41, %v2403_v19  ;;  %v1577_v49 = vsel %vm1545_vm10, %v1544_v23, %v2404_v25 }
 0x278   : > { %v1186_v3 = vpop.permute.xlu1 %1185  ;;  %v1280_v62 = vpop.permute.xlu0 %1279 }
 0x279   : > { %v1593_v55 = vsel %vm1578_vm11, %v1560_v15, %v1280_v62  ;;  %v1561_v48 = vsel %vm1545_vm10, %v1528_v21, %v1186_v3 }
 0x27a   : > { %v4125_v60 = vpop.f32.mrb[2].mxu1  ;;  %2326 = vmatprep.mubr.msk.f32.mxu0 %vm1611_vm12, %v1593_v55 }
 0x27b   : > { %v4132_v30 = vpop.f32.mrb[3].mxu1 }
 0x27c   : > { %v2407_v51 = vpop.permute.xlu1 %2406  ;;  %v1282_v36 = vpop.permute.xlu0 %1281 }
 0x27d   : > { %v2409_v45 = vunpack.i.h.bf16 %v2407_v51  ;;  %v2408_v0 = vunpack.i.l.bf16 %v2407_v51  ;;  %v1594_v5 = vsel %vm1578_vm11, %v1561_v48, %v1282_v36 }
 0x27e   : > { %2327 = vmatmul.mubr.msk.f32.gmra.mrb[14].mxu0 %vm1611_vm12, %v1594_v5 }
 0x27f   : > { %v1609_v38 = vsel %vm1578_vm11, %v1576_v7, %v2408_v0  ;;  %v1610_v6 = vsel %vm1578_vm11, %v1577_v49, %v2409_v45 }
 0x280   : > { %2350 = vmatprep.mubr.msk.f32.mxu1 %vm1611_vm12, %v1609_v38 }
 0x281   : > { %2351 = vmatmul.mubr.msk.f32.gmra.mrb[14].mxu1 %vm1611_vm12, %v1610_v6 }
 0x29a   : > { %v4146_v12 = vpop.f32.mrb[4].mxu0 }
 0x29b   : > { %v4148_v10 = vpop.f32.mrb[5].mxu0 }
 0x29e   : > { %v4150_v31 = vpop.f32.mrb[4].mxu1 }
 0x29f   : > { %v4152_v50 = vpop.f32.mrb[5].mxu1 }
 0x2c2   : > { %v4154_v57 = vpop.f32.mrb[6].mxu0 }
 0x2c3   : > { %v4156_v43 = vpop.f32.mrb[7].mxu0 }
 0x2c6   : > { %v4158_v47 = vpop.f32.mrb[6].mxu1 }
 0x2c7   : > { %v4160_v14 = vpop.f32.mrb[7].mxu1 }
 0x2e9   : > { %v4162_v46 = vpop.f32.mrb[8].mxu0 }
 0x2ea   : > { %v4164_v35 = vpop.f32.mrb[9].mxu0 }
 0x2ed   : > { %v4166_v34 = vpop.f32.mrb[8].mxu1 }
 0x2ee   : > { %v4168_v54 = vpop.f32.mrb[9].mxu1 }
 0x311   : > { %v4170_v13 = vpop.f32.mrb[10].mxu0 }
 0x312   : > { %v4172_v1 = vpop.f32.mrb[11].mxu0 }
 0x315   : > { %v4174_v39 = vpop.f32.mrb[10].mxu1 }
 0x316   : > { %v4176_v40 = vpop.f32.mrb[11].mxu1 }
 0x339   : > { %v4178_v16 = vpop.f32.mrb[12].mxu0 }
 0x33a   : > { %v4180_v11 = vpop.f32.mrb[13].mxu0 }
 0x33d   : > { %v4182_v29 = vpop.f32.mrb[12].mxu1 }
 0x33e   : > { %v4184_v8 = vpop.f32.mrb[13].mxu1 }
 0x34f   : > { %1940 = sbr.rel (%p2253_p4) target bundleno = 854 (0x356), region = 32 }
 0x351   : > { %v4186_v28 = vpop.f32.mrb[14].mxu0 }
 0x352   : > { %v4188_v42 = vpop.f32.mrb[15].mxu0 }
 0x354   : > { %v4190_v56 = vpop.f32.mrb[14].mxu1 }
 0x355   : > { %v4192_v27 = vpop.f32.mrb[15].mxu1 }
 0x356 PF: > { %v1944_v33 = vsel %vm1347_vm3, %v4076_v59, 0.0  ;;  %v1945_v4 = vsel %vm1347_vm3, %v4074_v44, 0.0  ;;  %v1947_v15 = vsel %vm1347_vm3, %v4116_v24, 0.0  ;;  %2118 = vst.msk [vmem:[%s2481_s21] sm:$0xff] %vm1347_vm3, %v4076_v59  ;;  %2119 = vst.msk [vmem:[%s2481_s21 + $0x8] sm:$0xff] %vm1347_vm3, %v4074_v44  ;;  %v1949_v62 = vsel %vm1347_vm3, %v4113_v52, 0.0 }
 0x357   : > { %2120 = vst.msk [vmem:[%s2481_s21 + $0x10] sm:$0xff] %vm1347_vm3, %v4116_v24  ;;  %2121 = vst.msk [vmem:[%s2481_s21 + $0x18] sm:$0xff] %vm1347_vm3, %v4113_v52  ;;  %v1946_v3 = vadd.f32 %v1945_v4, %v1944_v33  ;;  %v1951_v53 = vsel %vm1347_vm3, %v4148_v10, 0.0  ;;  %v1953_v55 = vsel %vm1347_vm3, %v4146_v12, 0.0  ;;  %v1955_v58 = vsel %vm1347_vm3, %v4156_v43, 0.0 }
 0x358   : > { %2122 = vst.msk [vmem:[%s2481_s21 + $0x20] sm:$0xff] %vm1347_vm3, %v4148_v10  ;;  %2123 = vst.msk [vmem:[%s2481_s21 + $0x28] sm:$0xff] %vm1347_vm3, %v4146_v12  ;;  %v1957_v25 = vsel %vm1347_vm3, %v4154_v57, 0.0  ;;  %v1959_v2 = vsel %vm1347_vm3, %v4164_v35, 0.0  ;;  %v1961_v17 = vsel %vm1347_vm3, %v4162_v46, 0.0  ;;  %v2013_v21 = vmul.f32 %v4076_v59, %v4076_v59 }
 0x359   : > { %2124 = vst.msk [vmem:[%s2481_s21 + $0x30] sm:$0xff] %vm1347_vm3, %v4156_v43  ;;  %2125 = vst.msk [vmem:[%s2481_s21 + $0x38] sm:$0xff] %vm1347_vm3, %v4154_v57  ;;  %v1948_v22 = vadd.f32 %v1947_v15, %v1946_v3  ;;  %v2014_v61 = vmul.f32 %v4074_v44, %v4074_v44  ;;  %v2015_v41 = vmul.f32 %v4116_v24, %v4116_v24  ;;  %v1963_v51 = vsel %vm1347_vm3, %v4172_v1, 0.0 }
 0x35a   : > { %2126 = vst.msk [vmem:[%s2481_s21 + $0x40] sm:$0xff] %vm1347_vm3, %v4164_v35  ;;  %2127 = vst.msk [vmem:[%s2481_s21 + $0x48] sm:$0xff] %vm1347_vm3, %v4162_v46  ;;  %v2016_v36 = vmul.f32 %v4113_v52, %v4113_v52  ;;  %v1965_v45 = vsel %vm1347_vm3, %v4170_v13, 0.0  ;;  %v2017_v59 = vmul.f32 %v4148_v10, %v4148_v10  ;;  %v2045_v0 = vsel %vm1347_vm3, %v2013_v21, 0.0 }
 0x35b   : > { %2128 = vst.msk [vmem:[%s2481_s21 + $0x50] sm:$0xff] %vm1347_vm3, %v4172_v1  ;;  %2129 = vst.msk [vmem:[%s2481_s21 + $0x58] sm:$0xff] %vm1347_vm3, %v4170_v13  ;;  %v1950_v9 = vadd.f32 %v1949_v62, %v1948_v22  ;;  %v2046_v44 = vsel %vm1347_vm3, %v2014_v61, 0.0  ;;  %v2048_v24 = vsel %vm1347_vm3, %v2015_v41, 0.0  ;;  %v1967_v49 = vsel %vm1347_vm3, %v4180_v11, 0.0 }
 0x35c   : > { %2130 = vst.msk [vmem:[%s2481_s21 + $0x60] sm:$0xff] %vm1347_vm3, %v4180_v11  ;;  %2131 = vst.msk [vmem:[%s2481_s21 + $0x68] sm:$0xff] %vm1347_vm3, %v4178_v16  ;;  %v2047_v7 = vadd.f32 %v2046_v44, %v2045_v0  ;;  %v2018_v52 = vmul.f32 %v4146_v12, %v4146_v12  ;;  %v2050_v38 = vsel %vm1347_vm3, %v2016_v36, 0.0  ;;  %v1969_v10 = vsel %vm1347_vm3, %v4178_v16, 0.0 }
 0x35d   : > { %2132 = vst.msk [vmem:[%s2481_s21 + $0x70] sm:$0xff] %vm1347_vm3, %v4188_v42  ;;  %2133 = vst.msk [vmem:[%s2481_s21 + $0x78] sm:$0xff] %vm1347_vm3, %v4186_v28  ;;  %v1952_v37 = vadd.f32 %v1951_v53, %v1950_v9  ;;  %v2019_v33 = vmul.f32 %v4156_v43, %v4156_v43  ;;  %v2052_v4 = vsel %vm1347_vm3, %v2017_v59, 0.0  ;;  %v1971_v62 = vsel %vm1347_vm3, %v4188_v42, 0.0 }
 0x35e   : > { %2134 = vst.msk [vmem:[%s2481_s21 + $0x80] sm:$0xff] %vm1347_vm3, %v4084_v32  ;;  %2135 = vst.msk [vmem:[%s2481_s21 + $0x88] sm:$0xff] %vm1347_vm3, %v4081_v18  ;;  %v2049_v63 = vadd.f32 %v2048_v24, %v2047_v7  ;;  %v2020_v12 = vmul.f32 %v4154_v57, %v4154_v57  ;;  %v2054_v22 = vsel %vm1347_vm3, %v2018_v52, 0.0  ;;  %v2021_v43 = vmul.f32 %v4164_v35, %v4164_v35 }
 0x35f   : > { %2136 = vst.msk [vmem:[%s2481_s21 + $0x90] sm:$0xff] %vm1347_vm3, %v4132_v30  ;;  %2137 = vst.msk [vmem:[%s2481_s21 + $0x98] sm:$0xff] %vm1347_vm3, %v4125_v60  ;;  %v1954_v26 = vadd.f32 %v1953_v55, %v1952_v37  ;;  %v1973_v55 = vsel %vm1347_vm3, %v4186_v28, 0.0  ;;  %v2056_v37 = vsel %vm1347_vm3, %v2019_v33, 0.0  ;;  %v2022_v57 = vmul.f32 %v4162_v46, %v4162_v46 }
 0x360   : > { %2138 = vst.msk [vmem:[%s2481_s21 + $0xa0] sm:$0xff] %vm1347_vm3, %v4152_v50  ;;  %2139 = vst.msk [vmem:[%s2481_s21 + $0xa8] sm:$0xff] %vm1347_vm3, %v4150_v31  ;;  %v2051_v3 = vadd.f32 %v2050_v38, %v2049_v63  ;;  %v2023_v35 = vmul.f32 %v4172_v1, %v4172_v1  ;;  %v2060_v21 = vsel %vm1347_vm3, %v2021_v43, 0.0  ;;  %v2024_v46 = vmul.f32 %v4170_v13, %v4170_v13 }
 0x361   : > { %2140 = vst.msk [vmem:[%s2481_s21 + $0xb0] sm:$0xff] %vm1347_vm3, %v4160_v14  ;;  %2141 = vst.msk [vmem:[%s2481_s21 + $0xb8] sm:$0xff] %vm1347_vm3, %v4158_v47  ;;  %v1956_v19 = vadd.f32 %v1955_v58, %v1954_v26  ;;  %v2025_v1 = vmul.f32 %v4180_v11, %v4180_v11  ;;  %v1983_v24 = vsel %vm1347_vm3, %v4152_v50, 0.0  ;;  %v2026_v13 = vmul.f32 %v4178_v16, %v4178_v16 }
 0x362   : > { %2142 = vst.msk [vmem:[%s2481_s21 + $0xc0] sm:$0xff] %vm1347_vm3, %v4168_v54  ;;  %2143 = vst.msk [vmem:[%s2481_s21 + $0xc8] sm:$0xff] %vm1347_vm3, %v4166_v34  ;;  %v2053_v9 = vadd.f32 %v2052_v4, %v2051_v3  ;;  %v2064_v59 = vsel %vm1347_vm3, %v2023_v35, 0.0  ;;  %v1985_v52 = vsel %vm1347_vm3, %v4150_v31, 0.0  ;;  %v2027_v11 = vmul.f32 %v4188_v42, %v4188_v42 }
 0x363   : > { %2144 = vst.msk [vmem:[%s2481_s21 + $0xd0] sm:$0xff] %vm1347_vm3, %v4176_v40  ;;  %2145 = vst.msk [vmem:[%s2481_s21 + $0xd8] sm:$0xff] %vm1347_vm3, %v4174_v39  ;;  %v1958_v20 = vadd.f32 %v1957_v25, %v1956_v19  ;;  %v1975_v25 = vsel %vm1347_vm3, %v4084_v32, 0.0  ;;  %v2058_v19 = vsel %vm1347_vm3, %v2020_v12, 0.0  ;;  %v2068_v38 = vsel %vm1347_vm3, %v2025_v1, 0.0 }
 0x364   : > { %2146 = vst.msk [vmem:[%s2481_s21 + $0xe0] sm:$0xff] %vm1347_vm3, %v4184_v8  ;;  %2147 = vst.msk [vmem:[%s2481_s21 + $0xe8] sm:$0xff] %vm1347_vm3, %v4182_v29  ;;  %v2055_v26 = vadd.f32 %v2054_v22, %v2053_v9  ;;  %v2028_v16 = vmul.f32 %v4186_v28, %v4186_v28  ;;  %v2070_v33 = vsel %vm1347_vm3, %v2026_v13, 0.0  ;;  %v1989_v3 = vsel %vm1347_vm3, %v4158_v47, 0.0 }
 0x365   : > { %2148 = vst.msk [vmem:[%s2481_s21 + $0xf0] sm:$0xff] %vm1347_vm3, %v4192_v27  ;;  %2149 = vst.msk [vmem:[%s2481_s21 + $0xf8] sm:$0xff] %vm1347_vm3, %v4190_v56  ;;  %v1960_v48 = vadd.f32 %v1959_v2, %v1958_v20  ;;  %v2029_v42 = vmul.f32 %v4084_v32, %v4084_v32  ;;  %v2030_v28 = vmul.f32 %v4081_v18, %v4081_v18  ;;  %vm2116_vm14 = vcmask 25600  }
 0x366   : > { %v2057_v20 = vadd.f32 %v2056_v37, %v2055_v26  ;;  %v2074_v9 = vsel %vm1347_vm3, %v2028_v16, 0.0  ;;  %v1993_v37 = vsel %vm1347_vm3, %v4166_v34, 0.0  ;;  %v2031_v32 = vmul.f32 %v4132_v30, %v4132_v30 }
 0x367   : > { %v1962_v23 = vadd.f32 %v1961_v17, %v1960_v48  ;;  %v1977_v17 = vsel %vm1347_vm3, %v4081_v18, 0.0  ;;  %v1979_v48 = vsel %vm1347_vm3, %v4132_v30, 0.0  ;;  %v2032_v18 = vmul.f32 %v4125_v60, %v4125_v60 }
 0x368   : > { %v2059_v41 = vadd.f32 %v2058_v19, %v2057_v20  ;;  %v2078_v19 = vsel %vm1347_vm3, %v2030_v28, 0.0  ;;  %v2033_v30 = vmul.f32 %v4152_v50, %v4152_v50  ;;  %v2080_v35 = vsel %vm1347_vm3, %v2031_v32, 0.0 }
 0x369   : > { %v1964_v5 = vadd.f32 %v1963_v51, %v1962_v23  ;;  %v2062_v51 = vsel %vm1347_vm3, %v2022_v57, 0.0  ;;  %v1995_v57 = vsel %vm1347_vm3, %v4176_v40, 0.0  ;;  %v2035_v50 = vmul.f32 %v4160_v14, %v4160_v14 }
 0x36a   : > { %v2061_v23 = vadd.f32 %v2060_v21, %v2059_v41  ;;  %v1999_v41 = vsel %vm1347_vm3, %v4184_v8, 0.0  ;;  %v2037_v13 = vmul.f32 %v4168_v54, %v4168_v54 }
 0x36b   : > { %v1966_v6 = vadd.f32 %v1965_v45, %v1964_v5  ;;  %v1981_v45 = vsel %vm1347_vm3, %v4125_v60, 0.0  ;;  %v2066_v5 = vsel %vm1347_vm3, %v2024_v46, 0.0  ;;  %v2034_v60 = vmul.f32 %v4150_v31, %v4150_v31 }
 0x36c   : > { %v2063_v44 = vadd.f32 %v2062_v51, %v2061_v23  ;;  %v2084_v23 = vsel %vm1347_vm3, %v2033_v30, 0.0 }
 0x36d   : > { %v1968_v15 = vadd.f32 %v1967_v49, %v1966_v6 }
 0x36e   : > { %v2065_v49 = vadd.f32 %v2064_v59, %v2063_v44  ;;  %v2036_v59 = vmul.f32 %v4158_v47, %v4158_v47 }
 0x36f   : > { %v1970_v53 = vadd.f32 %v1969_v10, %v1968_v15  ;;  %v1987_v10 = vsel %vm1347_vm3, %v4160_v14, 0.0 }
 0x370   : > { %v2067_v63 = vadd.f32 %v2066_v5, %v2065_v49  ;;  %v2088_v5 = vsel %vm1347_vm3, %v2035_v50, 0.0  ;;  %v2090_v49 = vsel %vm1347_vm3, %v2036_v59, 0.0 }
 0x371   : > { %v1972_v58 = vadd.f32 %v1971_v62, %v1970_v53  ;;  %v2072_v62 = vsel %vm1347_vm3, %v2027_v11, 0.0  ;;  %v1991_v53 = vsel %vm1347_vm3, %v4168_v54, 0.0  ;;  %v2005_v11 = vsel %vm1347_vm3, %v4190_v56, 0.0 }
 0x372   : > { %v2069_v15 = vadd.f32 %v2068_v38, %v2067_v63  ;;  %v2039_v38 = vmul.f32 %v4176_v40, %v4176_v40  ;;  %v2040_v54 = vmul.f32 %v4174_v39, %v4174_v39 }
 0x373   : > { %v1974_v2 = vadd.f32 %v1973_v55, %v1972_v58  ;;  %v2076_v58 = vsel %vm1347_vm3, %v2029_v42, 0.0 }
 0x374   : > { %v2071_v22 = vadd.f32 %v2070_v33, %v2069_v15  ;;  %v2041_v33 = vmul.f32 %v4184_v8, %v4184_v8  ;;  %v2098_v40 = vsel %vm1347_vm3, %v2040_v54, 0.0 }
 0x375   : > { %v1976_v61 = vadd.f32 %v1975_v25, %v1974_v2 }
 0x376   : > { %v2073_v43 = vadd.f32 %v2072_v62, %v2071_v22 }
 0x377   : > { %v1978_v36 = vadd.f32 %v1977_v17, %v1976_v61  ;;  %v1997_v17 = vsel %vm1347_vm3, %v4174_v39, 0.0  ;;  %v2043_v39 = vmul.f32 %v4192_v27, %v4192_v27 }
 0x378   : > { %v2075_v25 = vadd.f32 %v2074_v9, %v2073_v43 }
 0x379   : > { %v1980_v0 = vadd.f32 %v1979_v48, %v1978_v36  ;;  %v2082_v48 = vsel %vm1347_vm3, %v2032_v18, 0.0  ;;  %v2001_v36 = vsel %vm1347_vm3, %v4182_v29, 0.0 }
 0x37a   : > { %v2077_v20 = vadd.f32 %v2076_v58, %v2075_v25 }
 0x37b   : > { %v1982_v7 = vadd.f32 %v1981_v45, %v1980_v0  ;;  %v2086_v0 = vsel %vm1347_vm3, %v2034_v60, 0.0 }
 0x37c   : > { %v2079_v61 = vadd.f32 %v2078_v19, %v2077_v20  ;;  %v1943_v20 = vld [vmem:[%s4467_s3] sm:$0x3] }
 0x37d   : > { %v1984_v6 = vadd.f32 %v1983_v24, %v1982_v7  ;;  %v2003_v24 = vsel %vm1347_vm3, %v4192_v27, 0.0  ;;  %v2038_v7 = vmul.f32 %v4166_v34, %v4166_v34 }
 0x37e   : > { %v2081_v51 = vadd.f32 %v2080_v35, %v2079_v61 }
 0x37f   : > { %v1986_v4 = vadd.f32 %v1985_v52, %v1984_v6  ;;  %v2092_v6 = vsel %vm1347_vm3, %v2037_v13, 0.0 }
 0x380   : > { %v2083_v1 = vadd.f32 %v2082_v48, %v2081_v51 }
 0x381   : > { %v1988_v12 = vadd.f32 %v1987_v10, %v1986_v4  ;;  %v2094_v10 = vsel %vm1347_vm3, %v2038_v7, 0.0  ;;  %v2096_v4 = vsel %vm1347_vm3, %v2039_v38, 0.0 }
 0x382   : > { %v2085_v44 = vadd.f32 %v2084_v23, %v2083_v1 }
 0x383   : > { %v1990_v55 = vadd.f32 %v1989_v3, %v1988_v12  ;;  %v2042_v3 = vmul.f32 %v4182_v29, %v4182_v29  ;;  %v2100_v12 = vsel %vm1347_vm3, %v2041_v33, 0.0 }
 0x384   : > { %v2087_v14 = vadd.f32 %v2086_v0, %v2085_v44 }
 0x385   : > { %v1992_v26 = vadd.f32 %v1991_v53, %v1990_v55  ;;  %v2044_v53 = vmul.f32 %v4190_v56, %v4190_v56  ;;  %v2102_v8 = vsel %vm1347_vm3, %v2042_v3, 0.0  ;;  %v2104_v55 = vsel %vm1347_vm3, %v2043_v39, 0.0 }
 0x386   : > { %v2089_v47 = vadd.f32 %v2088_v5, %v2087_v14 }
 0x387   : > { %v1994_v2 = vadd.f32 %v1993_v37, %v1992_v26  ;;  %v2106_v43 = vsel %vm1347_vm3, %v2044_v53, 0.0 }
 0x388   : > { %v2091_v63 = vadd.f32 %v2090_v49, %v2089_v47 }
 0x389   : > { %v1996_v21 = vadd.f32 %v1995_v57, %v1994_v2 }
 0x38a   : > { %v2093_v34 = vadd.f32 %v2092_v6, %v2091_v63 }
 0x38b   : > { %v1998_v46 = vadd.f32 %v1997_v17, %v1996_v21 }
 0x38c   : > { %v2095_v15 = vadd.f32 %v2094_v10, %v2093_v34 }
 0x38d   : > { %v2000_v45 = vadd.f32 %v1999_v41, %v1998_v46 }
 0x38e   : > { %v2097_v62 = vadd.f32 %v2096_v4, %v2095_v15 }
 0x38f   : > { %v2002_v31 = vadd.f32 %v2001_v36, %v2000_v45 }
 0x390   : > { %v2099_v22 = vadd.f32 %v2098_v40, %v2097_v62 }
 0x391   : > { %v2004_v52 = vadd.f32 %v2003_v24, %v2002_v31 }
 0x392   : > { %v2101_v9 = vadd.f32 %v2100_v12, %v2099_v22 }
 0x393   : > { %v2006_v16 = vadd.f32 %v2005_v11, %v2004_v52 }
 0x394   : > { %v2103_v29 = vadd.f32 %v2102_v8, %v2101_v9 }
 0x395   : > { %v2007_v42 = vrot.slane %v2006_v16, 4 }
 0x396   : > { %v2105_v32 = vadd.f32 %v2104_v55, %v2103_v29 }
 0x397   : > { %v2008_v28 = vadd.f32 %v2007_v42, %v2006_v16 }
 0x398   : > { %v2107_v58 = vadd.f32 %v2106_v43, %v2105_v32 }
 0x399   : > { %v2009_v37 = vrot.slane %v2008_v28, 2 }
 0x39a   : > { %v2108_v27 = vrot.slane %v2107_v58, 4 }
 0x39b   : > { %v2010_v26 = vadd.f32 %v2009_v37, %v2008_v28 }
 0x39c   : > { %v2109_v25 = vadd.f32 %v2108_v27, %v2107_v58 }
 0x39d   : > { %v2011_v57 = vrot.slane %v2010_v26, 1 }
 0x39e   : > { %v2110_v18 = vrot.slane %v2109_v25, 2 }
 0x39f   : > { %v2012_v2 = vadd.f32 %v2011_v57, %v2010_v26 }
 0x3a0   : > { %v2111_v19 = vadd.f32 %v2110_v18, %v2109_v25 }
 0x3a2   : > { %v2112_v56 = vrot.slane %v2111_v19, 1 }
 0x3a4   : > { %v2113_v17 = vadd.f32 %v2112_v56, %v2111_v19 }
 0x3a6   : > { %v2114_v30 = vsel %vm239_vm0, %v2012_v2, %v2113_v17 }
 0x3a7   : > { %v2115_v35 = vadd.f32 %v2114_v30, %v1943_v20 }
 0x3a9   : > { %2117 = vst.msk [vmem:[%s4467_s3] sm:$0x3] %vm2116_vm14, %v2115_v35 }
 0x3aa PF: > { %s14_s12 = sadd.s32 1, %s2416_s12  }
 0x3ab   : > { %p11_p5 = scmp.ge.s32.totalorder %s14_s12, 4  }
 0x3ad   :  { %13 = sbr.rel (!%p11_p5) target bundleno = 1 (0x1), region = 70 }

// kernel: residual_block_nhwc.4
= control target key start
LH: loop header
LB: loop body
LE: loop exit
PB: predicated region body
PF: predicated region fallthrough
CT: control target
= control target key end

     0   :  { %s2751_s21 = smov 0   ;;  %s4863_s0 = inlined_call_operand.vmem [shape: f32[2,256,4], index: 0, kind: input, shape index: {}]   ;;  %s4864_s1 = inlined_call_operand.vmem [shape: f32[2,4], index: 1, kind: input, shape index: {}]   ;;  %s4865_s2 = inlined_call_operand.vmem [shape: f32[1,4], index: 2, kind: input, shape index: {}]   ;;  %s4866_s3 = inlined_call_operand.vmem [shape: f32[1,4], index: 3, kind: input, shape index: {}]   ;;  %s4867_s4 = inlined_call_operand.vmem [shape: f32[36,4], index: 4, kind: input, shape index: {}]   ;;  %s4868_s5 = inlined_call_operand.vmem [shape: f32[2,256,4], index: 5, kind: output, shape index: {0}]   ;;  %s4869_s6 = inlined_call_operand.vmem [shape: f32[2,4], index: 6, kind: output, shape index: {1}]  }
   0x1 LB: > { %s2757_s22 = sadd.s32 4294967295, %s2703_s21   ;;  %p2499_p0 = scmp.ge.s32.totalorder %s2703_s21, 1  ;;  %s2703_s21 = sphi %s2751_s21, %s17_s21  }
   0x2   : > { %p210_p1 = scmp.lt.s32.totalorder %s2703_s21, 3 }
   0x4   : > { %p211_p2 = pnand %p2499_p0, %p210_p1 }
   0x6   : > { %214 = sbr.rel (%p211_p2) target bundleno = 983 (0x3d7), region = 40 }
   0xd   : > { %vm523_vm0 = vcmask 1040384   ;;  %p240_p3 = scmp.lt.s32.totalorder %s2757_s22, 1  ;;  %v2705_v0 = vmov 0.0   ;;  %v250_v2 = vld [vmem:[%s4864_s1] sm:$0x3]  ;;  %vm689_vm1 = vcmask 1046528   ;;  %v265_v24 = vlaneseq }
   0xe   : > { %v2762_v1 = vrot.slane %v2705_v0, 7  ;;  %v253_v3 = vmul.f32 0.001953125, %v250_v2  ;;  %vm770_vm2 = vcmask 1045504   ;;  %s2706_s30 = smov 4   ;;  %v2707_v22 = vmov 1966171168  }
   0xf   : > { %s2768_s25 = scalar_select %p240_p3, %s2757_s22, 1  ;;  %v263_v23 = vunpack.c.l.s4 %v2707_v22  ;;  %v266_v26 = vshrl.u32 %v265_v24, 7  ;;  %v251_v31 = vld [vmem:[%s4865_s2] sm:$0x1] }
  0x10   : > { %5002 = vst [vmem:[#allocation2_spill] sm:$0xff] %v2762_v1  ;;  %v2772_v4 = vsel %vm523_vm0, 0.0, %v2762_v1  ;;  %v640_v5 = vsel %vm523_vm0, %v2762_v1, 0.0  ;;  %v691_v6 = vrot.slane %v2762_v1, 1  ;;  %v254_v10 = vmul.f32 %v253_v3, %v253_v3  ;;  %v252_v34 = vld [vmem:[%s4866_s3] sm:$0x1] }
  0x11   : > { %5003 = vst [vmem:[#allocation3_spill] sm:$0xff] %v2772_v4  ;;  %v690_v7 = vrot.slane %v2772_v4, 1  ;;  %v693_v8 = vrot.slane %v640_v5, 1  ;;  %v774_v9 = vrot.slane %v640_v5, 2  ;;  %s2540_s26 = sshll.u32 %s2768_s25, 8  ;;  %v771_v11 = vrot.slane %v2772_v4, 2 }
  0x12   : > { %s2782_s29 = scalar_lea.vmem %s4868_s5, %s2540_s26  ;;  %v772_v12 = vrot.slane %v2762_v1, 2  ;;  %v256_v15 = vrot.slane %v254_v10, 7  ;;  %v264_v25 = vunpack.c.0.s8 %v263_v23  ;;  %s2799_s9 = scalar_lea.vmem %s4863_s0, %s2540_s26  ;;  %v316_v33 = vsub.s32 0, %v266_v26 }
  0x13   : > { %v692_v13 = vsel %vm689_vm1, %v690_v7, %v691_v6  ;;  %v694_v14 = vsel %vm689_vm1, %v691_v6, %v693_v8  ;;  %v281_v36 = vld [vmem:[%s2799_s9] sm:$0xff]  ;;  %v282_v37 = vld [vmem:[%s2799_s9 + $0x8] sm:$0xff]  ;;  %v283_v38 = vld [vmem:[%s2799_s9 + $0x10] sm:$0xff]  ;;  %s2708_s14 = smov 8   ;;  %s2709_s15 = smov 12  }
  0x14   : > { %v2788_v16 = vpack.i.bf16 %v694_v14, %v692_v13  ;;  %v258_v17 = vsub.f32 %v253_v3, %v256_v15  ;;  %v773_v18 = vsel %vm770_vm2, %v771_v11, %v772_v12  ;;  %v775_v19 = vsel %vm770_vm2, %v772_v12, %v774_v9  ;;  %v284_v39 = vld [vmem:[%s2799_s9 + $0x18] sm:$0xff]  ;;  %v285_v40 = vld [vmem:[%s2799_s9 + $0x20] sm:$0xff]  ;;  %v286_v43 = vld [vmem:[%s2799_s9 + $0x28] sm:$0xff]  ;;  %s2710_s16 = smov 16   ;;  %s2711_s17 = smov 20  }
  0x15   : > { %v2794_v20 = vpack.i.bf16 %v775_v19, %v773_v18  ;;  %v267_v27 = vsub.s32 %v264_v25, %v266_v26  ;;  %v287_v44 = vld [vmem:[%s2799_s9 + $0x30] sm:$0xff]  ;;  %v288_v45 = vld [vmem:[%s2799_s9 + $0x38] sm:$0xff]  ;;  %v289_v46 = vld [vmem:[%s2799_s9 + $0x40] sm:$0xff]  ;;  %s2712_s18 = smov 24   ;;  %s2713_s25 = smov 28  }
  0x16   : > { %5004 = vst [vmem:[#allocation4_spill] sm:$0xff] %v2788_v16  ;;  %2671 = vrot.lane.b32.xlu0 %v2788_v16, %s2706_s30  ;;  %v259_v21 = vadd.f32 1e-05, %v258_v17  ;;  %v290_v47 = vld [vmem:[%s2799_s9 + $0x48] sm:$0xff]  ;;  %v291_v48 = vld [vmem:[%s2799_s9 + $0x50] sm:$0xff]  ;;  %v292_v53 = vld [vmem:[%s2799_s9 + $0x58] sm:$0xff] }
  0x17   : > { %5005 = vst [vmem:[#allocation5_spill] sm:$0xff] %v2794_v20  ;;  %v293_v54 = vld [vmem:[%s2799_s9 + $0x60] sm:$0xff]  ;;  %v294_v55 = vld [vmem:[%s2799_s9 + $0x68] sm:$0xff]  ;;  %p2537_p4 = scmp.ne.s32.totalorder %s2757_s22, 0 }
  0x18   : > { %2695 = vrsqrt.f32 %v259_v21 }
  0x22   : > { %v2696_v28 = vpop.eup %2695 }
  0x23   : > { %v268_v29 = vrot.slane %v2696_v28, %v267_v27 }
  0x25   : > { %v269_v30 = vcombine.high %v268_v29, %v268_v29 }
  0x27   : > { %v276_v32 = vrot.slane %v269_v30, %v267_v27 }
  0x29   : > { %v278_v35 = vmul.f32 %v276_v32, %v251_v31 }
  0x2b   : > { %v279_v41 = vmul.f32 %v278_v35, %v253_v3  ;;  %v2812_v42 = vrot.slane %v278_v35, %v316_v33 }
  0x2d   : > { %v280_v49 = vsub.f32 %v252_v34, %v279_v41  ;;  %v319_v50 = vmul.f32 %v2812_v42, %v281_v36  ;;  %v320_v51 = vmul.f32 %v2812_v42, %v282_v37  ;;  %v321_v52 = vmul.f32 %v2812_v42, %v283_v38 }
  0x2e   : > { %v322_v56 = vmul.f32 %v2812_v42, %v284_v39  ;;  %v323_v57 = vmul.f32 %v2812_v42, %v285_v40  ;;  %v324_v58 = vmul.f32 %v2812_v42, %v286_v43  ;;  %v325_v59 = vmul.f32 %v2812_v42, %v287_v44 }
  0x2f   : > { %v2830_v60 = vrot.slane %v280_v49, %v316_v33  ;;  %v326_v61 = vmul.f32 %v2812_v42, %v288_v45  ;;  %v2834_v62 = vmul.f32 %v2812_v42, %v289_v46  ;;  %v328_v63 = vmul.f32 %v2812_v42, %v290_v47 }
  0x30   : > { %v2838_v0 = vmul.f32 %v2812_v42, %v291_v48  ;;  %v2841_v2 = vmul.f32 %v2812_v42, %v292_v53  ;;  %v2844_v3 = vmul.f32 %v2812_v42, %v293_v54  ;;  %v2847_v5 = vmul.f32 %v2812_v42, %v294_v55 }
  0x31   : > { %v357_v6 = vadd.f32 %v2830_v60, %v319_v50  ;;  %v358_v7 = vadd.f32 %v2830_v60, %v320_v51  ;;  %v359_v8 = vadd.f32 %v2830_v60, %v321_v52  ;;  %v360_v9 = vadd.f32 %v2830_v60, %v322_v56 }
  0x32   : > { %v361_v10 = vadd.f32 %v2830_v60, %v323_v57  ;;  %v362_v11 = vadd.f32 %v2830_v60, %v324_v58  ;;  %v363_v12 = vadd.f32 %v2830_v60, %v325_v59  ;;  %v364_v13 = vadd.f32 %v2830_v60, %v326_v61 }
  0x33   : > { %vm389_vm3 = vcmp.ge.f32.partialorder %v357_v6, 0.0  ;;  %vm390_vm4 = vcmp.ge.f32.partialorder %v358_v7, 0.0  ;;  %v421_v14 = vmul.f32 0.2, %v357_v6  ;;  %v422_v15 = vmul.f32 0.2, %v358_v7 }
  0x34   : > { %vm391_vm5 = vcmp.ge.f32.partialorder %v359_v8, 0.0  ;;  %vm392_vm6 = vcmp.ge.f32.partialorder %v360_v9, 0.0  ;;  %v423_v17 = vmul.f32 0.2, %v359_v8  ;;  %v424_v18 = vmul.f32 0.2, %v360_v9 }
  0x35   : > { %v453_v19 = vsel %vm389_vm3, %v357_v6, %v421_v14  ;;  %v454_v21 = vsel %vm390_vm4, %v358_v7, %v422_v15  ;;  %vm393_vm7 = vcmp.ge.f32.partialorder %v361_v10, 0.0  ;;  %vm394_vm8 = vcmp.ge.f32.partialorder %v362_v11, 0.0 }
  0x36   : > { %v526_v22 = vrot.slane %v453_v19, 7  ;;  %v527_v23 = vrot.slane %v454_v21, 7  ;;  %v455_v24 = vsel %vm391_vm5, %v359_v8, %v423_v17  ;;  %v456_v25 = vsel %vm392_vm6, %v360_v9, %v424_v18 }
  0x37   : > { %v529_v26 = vrot.slane %v455_v24, 7  ;;  %v530_v27 = vrot.slane %v456_v25, 7  ;;  %v425_v28 = vmul.f32 0.2, %v361_v10  ;;  %v426_v29 = vmul.f32 0.2, %v362_v11 }
  0x38   : > { %v2858_v30 = vsel %vm523_vm0, %v526_v22, %v527_v23  ;;  %v2861_v31 = vsel %vm523_vm0, %v527_v23, 0.0  ;;  %v2864_v32 = vsel %vm523_vm0, 0.0, %v526_v22  ;;  %vm395_vm9 = vcmp.ge.f32.partialorder %v363_v12, 0.0 }
  0x39   : > { %5006 = vst [vmem:[#allocation6_spill] sm:$0xff] %v2858_v30  ;;  %5007 = vst [vmem:[#allocation7_spill] sm:$0xff] %v2864_v32  ;;  %v696_v33 = vrot.slane %v2858_v30, 1  ;;  %v698_v34 = vrot.slane %v2861_v31, 1  ;;  %v695_v35 = vrot.slane %v2864_v32, 1  ;;  %v2870_v36 = vsel %vm523_vm0, %v529_v26, %v530_v27 }
  0x3a   : > { %v2873_v37 = vsel %vm523_vm0, 0.0, %v529_v26  ;;  %v701_v38 = vrot.slane %v2870_v36, 1  ;;  %v2877_v39 = vsel %vm523_vm0, %v530_v27, 0.0  ;;  %v457_v40 = vsel %vm393_vm7, %v361_v10, %v425_v28 }
  0x3b   : > { %v2881_v41 = vsel %vm689_vm1, %v696_v33, %v698_v34  ;;  %v2884_v43 = vsel %vm689_vm1, %v695_v35, %v696_v33  ;;  %v700_v44 = vrot.slane %v2873_v37, 1  ;;  %v703_v45 = vrot.slane %v2877_v39, 1 }
  0x3c   : > { %869 = vrot.lane.b32.xlu1 %v2881_v41, %s2706_s30  ;;  %867 = vrot.lane.b32.xlu0 %v2884_v43, %s2706_s30  ;;  %v458_v46 = vsel %vm394_vm8, %v362_v11, %v426_v29  ;;  %v532_v47 = vrot.slane %v457_v40, 7  ;;  %vm396_vm10 = vcmp.ge.f32.partialorder %v364_v13, 0.0  ;;  %v427_v48 = vmul.f32 0.2, %v363_v12 }
  0x3d   : > { %v2894_v49 = vsel %vm689_vm1, %v700_v44, %v701_v38  ;;  %v2897_v50 = vsel %vm689_vm1, %v701_v38, %v703_v45  ;;  %v533_v51 = vrot.slane %v458_v46, 7  ;;  %v428_v52 = vmul.f32 0.2, %v364_v13 }
  0x3e   : > { %v2900_v53 = vsel %vm523_vm0, 0.0, %v532_v47  ;;  %v459_v54 = vsel %vm395_vm9, %v363_v12, %v427_v48  ;;  %v365_v55 = vadd.f32 %v2830_v60, %v2834_v62  ;;  %v366_v56 = vadd.f32 %v2830_v60, %v328_v63  ;;  %v296_v48 = vld [vmem:[%s2799_s9 + $0x78] sm:$0xff] }
  0x3f   : > { %v2907_v57 = vsel %vm523_vm0, %v532_v47, %v533_v51  ;;  %v705_v58 = vrot.slane %v2900_v53, 1  ;;  %v2911_v59 = vsel %vm523_vm0, %v533_v51, 0.0  ;;  %v460_v61 = vsel %vm396_vm10, %v364_v13, %v428_v52 }
  0x40   : > { %871 = vrot.lane.b32.xlu1 %v2894_v49, %s2706_s30  ;;  %873 = vrot.lane.b32.xlu0 %v2897_v50, %s2706_s30  ;;  %v706_v6 = vrot.slane %v2907_v57, 1  ;;  %v708_v62 = vrot.slane %v2911_v59, 1  ;;  %v535_v63 = vrot.slane %v459_v54, 7  ;;  %v536_v7 = vrot.slane %v460_v61, 7 }
  0x41   : > { %vm397_vm11 = vcmp.ge.f32.partialorder %v365_v55, 0.0  ;;  %vm398_vm12 = vcmp.ge.f32.partialorder %v366_v56, 0.0  ;;  %v429_v8 = vmul.f32 0.2, %v365_v55  ;;  %v430_v9 = vmul.f32 0.2, %v366_v56 }
  0x42   : > { %v2920_v10 = vsel %vm689_vm1, %v705_v58, %v706_v6  ;;  %v2923_v11 = vsel %vm689_vm1, %v706_v6, %v708_v62  ;;  %v2926_v12 = vsel %vm523_vm0, %v535_v63, %v536_v7  ;;  %v2929_v13 = vsel %vm523_vm0, 0.0, %v535_v63 }
  0x43   : > { %5008 = vst [vmem:[#allocation8_spill] sm:$0xff] %v2920_v10  ;;  %5009 = vst [vmem:[#allocation9_spill] sm:$0xff] %v2923_v11  ;;  %v710_v14 = vrot.slane %v2929_v13, 1  ;;  %v711_v15 = vrot.slane %v2926_v12, 1  ;;  %v2934_v17 = vsel %vm523_vm0, %v536_v7, 0.0  ;;  %v461_v18 = vsel %vm397_vm11, %v365_v55, %v429_v8  ;;  %v297_v7 = vld [vmem:[%s2799_s9 + $0x80] sm:$0xff] }
  0x44   : > { %875 = vrot.lane.b32.xlu1 %v2920_v10, %s2706_s30  ;;  %877 = vrot.lane.b32.xlu0 %v2923_v11, %s2706_s30  ;;  %v713_v19 = vrot.slane %v2934_v17, 1  ;;  %v462_v21 = vsel %vm398_vm12, %v366_v56, %v430_v9  ;;  %v538_v22 = vrot.slane %v461_v18, 7  ;;  %v367_v23 = vadd.f32 %v2830_v60, %v2838_v0 }
  0x45   : > { %v2944_v24 = vsel %vm689_vm1, %v710_v14, %v711_v15  ;;  %v539_v25 = vrot.slane %v462_v21, 7  ;;  %v368_v26 = vadd.f32 %v2830_v60, %v2841_v2  ;;  %v369_v27 = vadd.f32 %v2830_v60, %v2844_v3  ;;  %v295_v2 = vld [vmem:[%s2799_s9 + $0x70] sm:$0xff] }
  0x46   : > { %5010 = vst [vmem:[#allocation10_spill] sm:$0xff] %v2944_v24  ;;  %v2951_v28 = vsel %vm689_vm1, %v711_v15, %v713_v19  ;;  %v2954_v29 = vsel %vm523_vm0, 0.0, %v538_v22  ;;  %vm399_vm13 = vcmp.ge.f32.partialorder %v367_v23, 0.0  ;;  %v431_v33 = vmul.f32 0.2, %v367_v23 }
  0x47   : > { %5011 = vst [vmem:[#allocation11_spill] sm:$0xff] %v2951_v28  ;;  %v2957_v0 = vsel %vm523_vm0, %v538_v22, %v539_v25  ;;  %v715_v34 = vrot.slane %v2954_v29, 1  ;;  %v2961_v35 = vsel %vm523_vm0, %v539_v25, 0.0  ;;  %vm400_vm14 = vcmp.ge.f32.partialorder %v368_v26, 0.0 }
  0x48   : > { %879 = vrot.lane.b32.xlu1 %v2944_v24, %s2706_s30  ;;  %881 = vrot.lane.b32.xlu0 %v2951_v28, %s2706_s30  ;;  %v716_v3 = vrot.slane %v2957_v0, 1  ;;  %v718_v38 = vrot.slane %v2961_v35, 1  ;;  %v432_v40 = vmul.f32 0.2, %v368_v26  ;;  %v463_v44 = vsel %vm399_vm13, %v367_v23, %v431_v33 }
  0x49   : > { %v541_v45 = vrot.slane %v463_v44, 7  ;;  %v370_v46 = vadd.f32 %v2830_v60, %v2847_v5  ;;  %vm401_vm15 = vcmp.ge.f32.partialorder %v369_v27, 0.0  ;;  %v433_v47 = vmul.f32 0.2, %v369_v27 }
  0x4a   : > { %v2974_v51 = vsel %vm689_vm1, %v715_v34, %v716_v3  ;;  %v2977_v52 = vsel %vm689_vm1, %v716_v3, %v718_v38  ;;  %v464_v54 = vsel %vm400_vm14, %v368_v26, %v432_v40  ;;  %v333_v55 = vmul.f32 %v2812_v42, %v295_v2  ;;  %v298_v26 = vld [vmem:[%s2799_s9 + $0x88] sm:$0xff]  ;;  %v299_v38 = vld [vmem:[%s2799_s9 + $0x90] sm:$0xff] }
  0x4b   : > { %5012 = vst [vmem:[#allocation12_spill] sm:$0xff] %v2974_v51  ;;  %5013 = vst [vmem:[#allocation13_spill] sm:$0xff] %v2977_v52  ;;  %v542_v56 = vrot.slane %v464_v54, 7  ;;  %v2981_v58 = vsel %vm523_vm0, 0.0, %v541_v45  ;;  %vm402_vm3 = vcmp.ge.f32.partialorder %v370_v46, 0.0  ;;  %v465_v6 = vsel %vm401_vm15, %v369_v27, %v433_v47 }
  0x4c   : > { %v434_v61 = vmul.f32 0.2, %v370_v46  ;;  %883 = vrot.lane.b32.xlu1 %v2974_v51, %s2706_s30  ;;  %885 = vrot.lane.b32.xlu0 %v2977_v52, %s2706_s30  ;;  %v720_v5 = vrot.slane %v2981_v58, 1  ;;  %v334_v62 = vmul.f32 %v2812_v42, %v296_v48  ;;  %v371_v63 = vadd.f32 %v2830_v60, %v333_v55  ;;  %v300_v55 = vld [vmem:[%s2799_s9 + $0x98] sm:$0xff] }
  0x4d   : > { %v2992_v8 = vsel %vm523_vm0, %v541_v45, %v542_v56  ;;  %v2995_v9 = vsel %vm523_vm0, %v542_v56, 0.0  ;;  %v544_v15 = vrot.slane %v465_v6, 7  ;;  %v335_v27 = vmul.f32 %v2812_v42, %v297_v7 }
  0x4e   : > { %v466_v14 = vsel %vm402_vm3, %v370_v46, %v434_v61  ;;  %v721_v18 = vrot.slane %v2992_v8, 1  ;;  %v723_v19 = vrot.slane %v2995_v9, 1  ;;  %v372_v22 = vadd.f32 %v2830_v60, %v334_v62 }
  0x4f   : > { %v545_v21 = vrot.slane %v466_v14, 7  ;;  %v3001_v23 = vsel %vm523_vm0, 0.0, %v544_v15  ;;  %vm403_vm4 = vcmp.ge.f32.partialorder %v371_v63, 0.0  ;;  %v435_v25 = vmul.f32 0.2, %v371_v63 }
  0x50   : > { %v3006_v33 = vsel %vm689_vm1, %v720_v5, %v721_v18  ;;  %v3009_v34 = vsel %vm689_vm1, %v721_v18, %v723_v19  ;;  %v725_v3 = vrot.slane %v3001_v23, 1  ;;  %vm404_vm5 = vcmp.ge.f32.partialorder %v372_v22, 0.0 }
  0x51   : > { %5014 = vst [vmem:[#allocation14_spill] sm:$0xff] %v3006_v33  ;;  %5015 = vst [vmem:[#allocation15_spill] sm:$0xff] %v3009_v34  ;;  %v3012_v2 = vsel %vm523_vm0, %v544_v15, %v545_v21  ;;  %887 = vrot.lane.b32.xlu1 %v3006_v33, %s2706_s30  ;;  %889 = vrot.lane.b32.xlu0 %v3009_v34, %s2706_s30  ;;  %v3022_v44 = vsel %vm523_vm0, %v545_v21, 0.0  ;;  %v436_v45 = vmul.f32 0.2, %v372_v22 }
  0x52   : > { %v726_v40 = vrot.slane %v3012_v2, 1  ;;  %v728_v46 = vrot.slane %v3022_v44, 1  ;;  %v467_v47 = vsel %vm403_vm4, %v371_v63, %v435_v25  ;;  %v336_v48 = vmul.f32 %v2812_v42, %v298_v26  ;;  %v301_v26 = vld [vmem:[%s2799_s9 + $0xa0] sm:$0xff] }
  0x53   : > { %v373_v54 = vadd.f32 %v2830_v60, %v335_v27  ;;  %v468_v61 = vsel %vm404_vm5, %v372_v22, %v436_v45  ;;  %v547_v5 = vrot.slane %v467_v47, 7  ;;  %v337_v6 = vmul.f32 %v2812_v42, %v299_v38 }
  0x54   : > { %v3030_v56 = vsel %vm689_vm1, %v725_v3, %v726_v40  ;;  %v3034_v62 = vsel %vm689_vm1, %v726_v40, %v728_v46  ;;  %v548_v7 = vrot.slane %v468_v61, 7  ;;  %v374_v14 = vadd.f32 %v2830_v60, %v336_v48  ;;  %v302_v48 = vld [vmem:[%s2799_s9 + $0xa8] sm:$0xff] }
  0x55   : > { %5016 = vst [vmem:[#allocation16_spill] sm:$0xff] %v3030_v56  ;;  %5017 = vst [vmem:[#allocation17_spill] sm:$0xff] %v3034_v62  ;;  %vm405_vm6 = vcmp.ge.f32.partialorder %v373_v54, 0.0  ;;  %891 = vrot.lane.b32.xlu1 %v3030_v56, %s2706_s30  ;;  %893 = vrot.lane.b32.xlu0 %v3034_v62, %s2706_s30  ;;  %v3042_v63 = vsel %vm523_vm0, 0.0, %v547_v5  ;;  %v437_v15 = vmul.f32 0.2, %v373_v54  ;;  %v338_v18 = vmul.f32 %v2812_v42, %v300_v55 }
  0x56   : > { %5018 = vst [vmem:[#allocation18_spill] sm:$0xff] %v3042_v63  ;;  %v375_v19 = vadd.f32 %v2830_v60, %v337_v6  ;;  %v3047_v21 = vsel %vm523_vm0, %v547_v5, %v548_v7  ;;  %v730_v22 = vrot.slane %v3042_v63, 1  ;;  %v3051_v25 = vsel %vm523_vm0, %v548_v7, 0.0  ;;  %v306_v56 = vld [vmem:[%s2799_s9 + $0xc8] sm:$0xff] }
  0x57   : > { %5019 = vst [vmem:[#allocation19_spill] sm:$0xff] %v3047_v21  ;;  %vm406_vm7 = vcmp.ge.f32.partialorder %v374_v14, 0.0  ;;  %v731_v27 = vrot.slane %v3047_v21, 1  ;;  %v733_v3 = vrot.slane %v3051_v25, 1  ;;  %v438_v38 = vmul.f32 0.2, %v374_v14 }
  0x58   : > { %v469_v40 = vsel %vm405_vm6, %v373_v54, %v437_v15  ;;  %v376_v46 = vadd.f32 %v2830_v60, %v338_v18  ;;  %vm407_vm8 = vcmp.ge.f32.partialorder %v375_v19, 0.0  ;;  %v439_v47 = vmul.f32 0.2, %v375_v19 }
  0x59   : > { %v550_v45 = vrot.slane %v469_v40, 7  ;;  %v3059_v55 = vsel %vm689_vm1, %v730_v22, %v731_v27  ;;  %v3062_v61 = vsel %vm689_vm1, %v731_v27, %v733_v3  ;;  %v470_v5 = vsel %vm406_vm7, %v374_v14, %v438_v38  ;;  %v303_v27 = vld [vmem:[%s2799_s9 + $0xb0] sm:$0xff] }
  0x5a   : > { %5020 = vst [vmem:[#allocation20_spill] sm:$0xff] %v3059_v55  ;;  %5021 = vst [vmem:[#allocation21_spill] sm:$0xff] %v3062_v61  ;;  %v339_v6 = vmul.f32 %v2812_v42, %v301_v26  ;;  %895 = vrot.lane.b32.xlu1 %v3059_v55, %s2706_s30  ;;  %897 = vrot.lane.b32.xlu0 %v3062_v61, %s2706_s30  ;;  %v551_v54 = vrot.slane %v470_v5, 7  ;;  %vm408_vm9 = vcmp.ge.f32.partialorder %v376_v46, 0.0  ;;  %v440_v15 = vmul.f32 0.2, %v376_v46 }
  0x5b   : > { %v3070_v7 = vsel %vm523_vm0, 0.0, %v550_v45  ;;  %v471_v22 = vsel %vm407_vm8, %v375_v19, %v439_v47  ;;  %v340_v14 = vmul.f32 %v2812_v42, %v302_v48 }
  0x5c   : > { %5022 = vst [vmem:[#allocation22_spill] sm:$0xff] %v3070_v7  ;;  %v735_v18 = vrot.slane %v3070_v7, 1  ;;  %v377_v26 = vadd.f32 %v2830_v60, %v339_v6  ;;  %v3077_v3 = vsel %vm523_vm0, %v550_v45, %v551_v54  ;;  %v3080_v38 = vsel %vm523_vm0, %v551_v54, 0.0  ;;  %v304_v45 = vld [vmem:[%s2799_s9 + $0xb8] sm:$0xff] }
  0x5d   : > { %5023 = vst [vmem:[#allocation23_spill] sm:$0xff] %v3077_v3  ;;  %v472_v40 = vsel %vm408_vm9, %v376_v46, %v440_v15  ;;  %v553_v5 = vrot.slane %v471_v22, 7  ;;  %v736_v16 = vrot.slane %v3077_v3, 1  ;;  %v738_v61 = vrot.slane %v3080_v38, 1 }
  0x5e   : > { %v554_v55 = vrot.slane %v472_v40, 7  ;;  %v378_v19 = vadd.f32 %v2830_v60, %v340_v14  ;;  %vm409_vm10 = vcmp.ge.f32.partialorder %v377_v26, 0.0  ;;  %v441_v48 = vmul.f32 0.2, %v377_v26  ;;  %v305_v14 = vld [vmem:[%s2799_s9 + $0xc0] sm:$0xff] }
  0x5f   : > { %v3086_v47 = vsel %vm523_vm0, 0.0, %v553_v5  ;;  %v341_v6 = vmul.f32 %v2812_v42, %v303_v27  ;;  %v3091_v54 = vsel %vm689_vm1, %v735_v18, %v736_v16  ;;  %v3094_v46 = vsel %vm689_vm1, %v736_v16, %v738_v61 }
  0x60   : > { %5024 = vst [vmem:[#allocation24_spill] sm:$0xff] %v3091_v54  ;;  %5025 = vst [vmem:[#allocation25_spill] sm:$0xff] %v3094_v46  ;;  %v3097_v15 = vsel %vm523_vm0, %v553_v5, %v554_v55  ;;  %v740_v22 = vrot.slane %v3086_v47, 1  ;;  %899 = vrot.lane.b32.xlu1 %v3091_v54, %s2706_s30  ;;  %901 = vrot.lane.b32.xlu0 %v3094_v46, %s2706_s30  ;;  %v3107_v18 = vsel %vm523_vm0, %v554_v55, 0.0  ;;  %vm410_vm11 = vcmp.ge.f32.partialorder %v378_v19, 0.0 }
  0x61   : > { %v741_v27 = vrot.slane %v3097_v15, 1  ;;  %v442_v16 = vmul.f32 0.2, %v378_v19  ;;  %v743_v61 = vrot.slane %v3107_v18, 1  ;;  %v473_v40 = vsel %vm409_vm10, %v377_v26, %v441_v48 }
  0x62   : > { %v342_v5 = vmul.f32 %v2812_v42, %v304_v45  ;;  %v379_v62 = vadd.f32 %v2830_v60, %v341_v6  ;;  %v556_v1 = vrot.slane %v473_v40, 7  ;;  %v343_v55 = vmul.f32 %v2812_v42, %v305_v14  ;;  %v307_v14 = vld [vmem:[%s2799_s9 + $0xd0] sm:$0xff] }
  0x63   : > { %v3115_v34 = vsel %vm689_vm1, %v740_v22, %v741_v27  ;;  %v474_v33 = vsel %vm410_vm11, %v378_v19, %v442_v16  ;;  %v3119_v4 = vsel %vm689_vm1, %v741_v27, %v743_v61  ;;  %v344_v48 = vmul.f32 %v2812_v42, %v306_v56 }
  0x64   : > { %5026 = vst [vmem:[#allocation26_spill] sm:$0xff] %v3115_v34  ;;  %5027 = vst [vmem:[#allocation27_spill] sm:$0xff] %v3119_v4  ;;  %v557_v52 = vrot.slane %v474_v33, 7  ;;  %v380_v51 = vadd.f32 %v2830_v60, %v342_v5  ;;  %vm411_vm12 = vcmp.ge.f32.partialorder %v379_v62, 0.0  ;;  %903 = vrot.lane.b32.xlu1 %v3115_v34, %s2706_s30  ;;  %905 = vrot.lane.b32.xlu0 %v3119_v4, %s2706_s30  ;;  %v3127_v26 = vsel %vm523_vm0, 0.0, %v556_v1 }
  0x65   : > { %v443_v19 = vmul.f32 0.2, %v379_v62  ;;  %v381_v45 = vadd.f32 %v2830_v60, %v343_v55  ;;  %v745_v6 = vrot.slane %v3127_v26, 1  ;;  %v382_v56 = vadd.f32 %v2830_v60, %v344_v48 }
  0x66   : > { %v3132_v33 = vsel %vm523_vm0, %v556_v1, %v557_v52  ;;  %v3136_v22 = vsel %vm523_vm0, %v557_v52, 0.0  ;;  %vm412_vm13 = vcmp.ge.f32.partialorder %v380_v51, 0.0  ;;  %v444_v61 = vmul.f32 0.2, %v380_v51  ;;  %v308_v1 = vld [vmem:[%s2799_s9 + $0xd8] sm:$0xff] }
  0x67   : > { %v746_v27 = vrot.slane %v3132_v33, 1  ;;  %v748_v16 = vrot.slane %v3136_v22, 1  ;;  %v475_v40 = vsel %vm411_vm12, %v379_v62, %v443_v19  ;;  %vm413_vm14 = vcmp.ge.f32.partialorder %v381_v45, 0.0 }
  0x68   : > { %v559_v5 = vrot.slane %v475_v40, 7  ;;  %v445_v55 = vmul.f32 0.2, %v381_v45  ;;  %v476_v34 = vsel %vm412_vm13, %v380_v51, %v444_v61  ;;  %v345_v46 = vmul.f32 %v2812_v42, %v307_v14 }
  0x69   : > { %v3144_v4 = vsel %vm689_vm1, %v745_v6, %v746_v27  ;;  %v3147_v52 = vsel %vm689_vm1, %v746_v27, %v748_v16  ;;  %v560_v62 = vrot.slane %v476_v34, 7  ;;  %vm414_vm15 = vcmp.ge.f32.partialorder %v382_v56, 0.0  ;;  %v309_v16 = vld [vmem:[%s2799_s9 + $0xe0] sm:$0xff] }
  0x6a   : > { %5028 = vst [vmem:[#allocation28_spill] sm:$0xff] %v3144_v4  ;;  %5029 = vst [vmem:[#allocation29_spill] sm:$0xff] %v3147_v52  ;;  %907 = vrot.lane.b32.xlu1 %v3144_v4, %s2706_s30  ;;  %909 = vrot.lane.b32.xlu0 %v3147_v52, %s2706_s30  ;;  %v3155_v19 = vsel %vm523_vm0, 0.0, %v559_v5  ;;  %v446_v48 = vmul.f32 0.2, %v382_v56  ;;  %v477_v27 = vsel %vm413_vm14, %v381_v45, %v445_v55  ;;  %vm1992_vm9 = vcmask 1043456  }
  0x6b   : > { %5030 = vst [vmem:[#allocation30_spill] sm:$0xff] %v3155_v19  ;;  %v750_v6 = vrot.slane %v3155_v19, 1  ;;  %v346_v51 = vmul.f32 %v2812_v42, %v308_v1  ;;  %v383_v14 = vadd.f32 %v2830_v60, %v345_v46  ;;  %v3162_v61 = vsel %vm523_vm0, %v559_v5, %v560_v62  ;;  %v310_v1 = vld [vmem:[%s2799_s9 + $0xe8] sm:$0xff] }
  0x6c   : > { %5031 = vst [vmem:[#allocation31_spill] sm:$0xff] %v3162_v61  ;;  %v3165_v40 = vsel %vm523_vm0, %v560_v62, 0.0  ;;  %v478_v34 = vsel %vm414_vm15, %v382_v56, %v446_v48  ;;  %v562_v52 = vrot.slane %v477_v27, 7  ;;  %v751_v4 = vrot.slane %v3162_v61, 1 }
  0x6d   : > { %v753_v54 = vrot.slane %v3165_v40, 1  ;;  %v563_v28 = vrot.slane %v478_v34, 7  ;;  %v384_v45 = vadd.f32 %v2830_v60, %v346_v51  ;;  %vm415_vm3 = vcmp.ge.f32.partialorder %v383_v14, 0.0 }
  0x6e   : > { %v3171_v55 = vsel %vm523_vm0, 0.0, %v562_v52  ;;  %v447_v46 = vmul.f32 0.2, %v383_v14  ;;  %v347_v5 = vmul.f32 %v2812_v42, %v309_v16  ;;  %v3176_v62 = vsel %vm689_vm1, %v750_v6, %v751_v4 }
  0x6f   : > { %5032 = vst [vmem:[#allocation32_spill] sm:$0xff] %v3171_v55  ;;  %5033 = vst [vmem:[#allocation33_spill] sm:$0xff] %v3176_v62  ;;  %v3179_v56 = vsel %vm689_vm1, %v751_v4, %v753_v54  ;;  %v3182_v48 = vsel %vm523_vm0, %v562_v52, %v563_v28  ;;  %v755_v27 = vrot.slane %v3171_v55, 1  ;;  %911 = vrot.lane.b32.xlu1 %v3176_v62, %s2706_s30  ;;  %v3191_v16 = vsel %vm523_vm0, %v563_v28, 0.0 }
  0x70   : > { %5034 = vst [vmem:[#allocation34_spill] sm:$0xff] %v3179_v56  ;;  %5035 = vst [vmem:[#allocation35_spill] sm:$0xff] %v3182_v48  ;;  %913 = vrot.lane.b32.xlu0 %v3179_v56, %s2706_s30  ;;  %v756_v51 = vrot.slane %v3182_v48, 1  ;;  %vm416_vm4 = vcmp.ge.f32.partialorder %v384_v45, 0.0  ;;  %v448_v6 = vmul.f32 0.2, %v384_v45  ;;  %v479_v54 = vsel %vm415_vm3, %v383_v14, %v447_v46 }
  0x71   : > { %v758_v4 = vrot.slane %v3191_v16, 1  ;;  %v348_v52 = vmul.f32 %v2812_v42, %v310_v1  ;;  %v385_v34 = vadd.f32 %v2830_v60, %v347_v5  ;;  %v565_v11 = vrot.slane %v479_v54, 7 }
  0x72   : > { %v3197_v24 = vsel %vm689_vm1, %v755_v27, %v756_v51  ;;  %v480_v62 = vsel %vm416_vm4, %v384_v45, %v448_v6  ;;  %vm1631_vm10 = vcmask 31744   ;;  %vm1664_vm11 = vcmask 64512  }
  0x73   : > { %5036 = vst [vmem:[#allocation36_spill] sm:$0xff] %v3197_v24  ;;  %v3200_v56 = vsel %vm689_vm1, %v756_v51, %v758_v4  ;;  %v566_v10 = vrot.slane %v480_v62, 7  ;;  %v386_v28 = vadd.f32 %v2830_v60, %v348_v52  ;;  %vm417_vm5 = vcmp.ge.f32.partialorder %v385_v34, 0.0  ;;  %915 = vrot.lane.b32.xlu1 %v3197_v24, %s2706_s30 }
  0x74   : > { %5037 = vst [vmem:[#allocation37_spill] sm:$0xff] %v3200_v56  ;;  %917 = vrot.lane.b32.xlu0 %v3200_v56, %s2706_s30  ;;  %v3208_v14 = vsel %vm523_vm0, 0.0, %v565_v11  ;;  %v449_v46 = vmul.f32 0.2, %v385_v34  ;;  %vm1697_vm12 = vcmask 97280   ;;  %vm1730_vm13 = vcmask 130048  }
  0x75   : > { %5038 = vst [vmem:[#allocation38_spill] sm:$0xff] %v3208_v14  ;;  %v3211_v45 = vsel %vm523_vm0, %v565_v11, %v566_v10  ;;  %v760_v1 = vrot.slane %v3208_v14, 1  ;;  %v3215_v5 = vsel %vm523_vm0, %v566_v10, 0.0  ;;  %vm418_vm6 = vcmp.ge.f32.partialorder %v386_v28, 0.0 }
  0x76   : > { %5039 = vst [vmem:[#allocation39_spill] sm:$0xff] %v3211_v45  ;;  %v761_v62 = vrot.slane %v3211_v45, 1  ;;  %v763_v27 = vrot.slane %v3215_v5, 1  ;;  %v450_v51 = vmul.f32 0.2, %v386_v28  ;;  %v481_v6 = vsel %vm417_vm5, %v385_v34, %v449_v46 }
  0x77   : > { %v568_v4 = vrot.slane %v481_v6, 7  ;;  %vm1763_vm14 = vcmask 162816   ;;  %vm1796_vm15 = vcmask 195584   ;;  %vm1829_vm3 = vcmask 228352  }
  0x78   : > { %v3220_v54 = vsel %vm689_vm1, %v760_v1, %v761_v62  ;;  %v3223_v52 = vsel %vm689_vm1, %v761_v62, %v763_v27  ;;  %v482_v11 = vsel %vm418_vm6, %v386_v28, %v450_v51  ;;  %v776_v27 = vrot.slane %v2864_v32, 2 }
  0x79   : > { %5040 = vst [vmem:[#allocation40_spill] sm:$0xff] %v3220_v54  ;;  %5041 = vst [vmem:[#allocation41_spill] sm:$0xff] %v3223_v52  ;;  %919 = vrot.lane.b32.xlu1 %v3220_v54, %s2706_s30  ;;  %921 = vrot.lane.b32.xlu0 %v3223_v52, %s2706_s30  ;;  %v569_v10 = vrot.slane %v482_v11, 7  ;;  %v3230_v56 = vsel %vm523_vm0, 0.0, %v568_v4  ;;  %v777_v51 = vrot.slane %v2858_v30, 2  ;;  %v781_v52 = vrot.slane %v2873_v37, 2 }
  0x7a   : > { %5042 = vst [vmem:[#allocation42_spill] sm:$0xff] %v3230_v56  ;;  %v765_v34 = vrot.slane %v3230_v56, 1  ;;  %v782_v54 = vrot.slane %v2870_v36, 2  ;;  %vm1862_vm4 = vcmask 261120   ;;  %vm1895_vm5 = vcmask 293888  }
  0x7b   : > { %v3234_v46 = vsel %vm523_vm0, %v568_v4, %v569_v10  ;;  %v3237_v1 = vsel %vm523_vm0, %v569_v10, 0.0  ;;  %v779_v4 = vrot.slane %v2861_v31, 2  ;;  %v3255_v10 = vsel %vm770_vm2, %v776_v27, %v777_v51 }
  0x7c   : > { %5043 = vst [vmem:[#allocation43_spill] sm:$0xff] %v3234_v46  ;;  %v766_v28 = vrot.slane %v3234_v46, 1  ;;  %v768_v62 = vrot.slane %v3237_v1, 1  ;;  %v784_v31 = vrot.slane %v2877_v39, 2  ;;  %v787_v27 = vrot.slane %v2907_v57, 2 }
  0x7d   : > { %v791_v39 = vrot.slane %v2929_v13, 2 }
  0x7e   : > { %v3244_v6 = vsel %vm689_vm1, %v765_v34, %v766_v28  ;;  %v3247_v11 = vsel %vm689_vm1, %v766_v28, %v768_v62  ;;  %v3264_v34 = vsel %vm770_vm2, %v777_v51, %v779_v4  ;;  %v3267_v28 = vsel %vm770_vm2, %v781_v52, %v782_v54 }
  0x7f   : > { %5044 = vst [vmem:[#allocation44_spill] sm:$0xff] %v3244_v6  ;;  %5045 = vst [vmem:[#allocation45_spill] sm:$0xff] %v3247_v11  ;;  %923 = vrot.lane.b32.xlu1 %v3244_v6, %s2706_s30  ;;  %925 = vrot.lane.b32.xlu0 %v3247_v11, %s2706_s30  ;;  %v786_v62 = vrot.slane %v2900_v53, 2  ;;  %v3278_v51 = vsel %vm770_vm2, %v782_v54, %v784_v31  ;;  %v792_v4 = vrot.slane %v2926_v12, 2  ;;  %v794_v54 = vrot.slane %v2934_v17, 2 }
  0x80   : > { %v796_v31 = vrot.slane %v2954_v29, 2  ;;  %v799_v6 = vrot.slane %v2961_v35, 2  ;;  %v801_v17 = vrot.slane %v2981_v58, 2 }
  0x81   : > { %v3281_v52 = vsel %vm770_vm2, %v786_v62, %v787_v27  ;;  %v797_v62 = vrot.slane %v2957_v0, 2 }
  0x83   : > { %2676 = vrot.lane.b32.xlu1 %v2794_v20, %s2708_s14  ;;  %963 = vrot.lane.b32.xlu0 %v3255_v10, %s2708_s14  ;;  %v789_v20 = vrot.slane %v2911_v59, 2  ;;  %v3293_v59 = vsel %vm770_vm2, %v791_v39, %v792_v4  ;;  %v802_v39 = vrot.slane %v2992_v8, 2  ;;  %v3316_v24 = vsel %vm770_vm2, %v797_v62, %v799_v6 }
  0x84   : > { %5046 = vst [vmem:[#allocation46_spill] sm:$0xff] %v3293_v59  ;;  %5049 = vst [vmem:[#allocation49_spill] sm:$0xff] %v3316_v24 }
  0x85   : > { %v3290_v11 = vsel %vm770_vm2, %v787_v27, %v789_v20  ;;  %v3304_v20 = vsel %vm770_vm2, %v792_v4, %v794_v54  ;;  %v3307_v27 = vsel %vm770_vm2, %v796_v31, %v797_v62  ;;  %v3319_v35 = vsel %vm770_vm2, %v801_v17, %v802_v39 }
  0x86   : > { %5047 = vst [vmem:[#allocation47_spill] sm:$0xff] %v3304_v20  ;;  %5048 = vst [vmem:[#allocation48_spill] sm:$0xff] %v3307_v27  ;;  %v804_v4 = vrot.slane %v2995_v9, 2  ;;  %v806_v54 = vrot.slane %v3001_v23, 2  ;;  %v807_v31 = vrot.slane %v3012_v2, 2  ;;  %v811_v9 = vrot.slane %v3042_v63, 2 }
  0x87   : > { %965 = vrot.lane.b32.xlu1 %v3264_v34, %s2708_s14  ;;  %967 = vrot.lane.b32.xlu0 %v3267_v28, %s2708_s14  ;;  %5050 = vst [vmem:[#allocation50_spill] sm:$0xff] %v3319_v35  ;;  %v812_v17 = vrot.slane %v3047_v21, 2 }
  0x88   : > { %v3330_v6 = vsel %vm770_vm2, %v802_v39, %v804_v4  ;;  %v3333_v62 = vsel %vm770_vm2, %v806_v54, %v807_v31  ;;  %v816_v4 = vrot.slane %v3070_v7, 2  ;;  %v817_v54 = vrot.slane %v3077_v3, 2 }
  0x89   : > { %5051 = vst [vmem:[#allocation51_spill] sm:$0xff] %v3330_v6  ;;  %5052 = vst [vmem:[#allocation52_spill] sm:$0xff] %v3333_v62  ;;  %v3346_v39 = vsel %vm770_vm2, %v811_v9, %v812_v17  ;;  %v822_v9 = vrot.slane %v3097_v15, 2 }
  0x8a   : > { %5054 = vst [vmem:[#allocation54_spill] sm:$0xff] %v3346_v39 }
  0x8b   : > { %969 = vrot.lane.b32.xlu1 %v3278_v51, %s2708_s14  ;;  %971 = vrot.lane.b32.xlu0 %v3281_v52, %s2708_s14 }
  0x8f   : > { %973 = vrot.lane.b32.xlu1 %v3290_v11, %s2708_s14  ;;  %975 = vrot.lane.b32.xlu0 %v3293_v59, %s2708_s14 }
  0x93   : > { %977 = vrot.lane.b32.xlu1 %v3304_v20, %s2708_s14  ;;  %979 = vrot.lane.b32.xlu0 %v3307_v27, %s2708_s14  ;;  %v809_v27 = vrot.slane %v3022_v44, 2  ;;  %v842_v20 = vrot.slane %v3211_v45, 2 }
  0x95   : > { %v3343_v44 = vsel %vm770_vm2, %v807_v31, %v809_v27  ;;  %v3359_v27 = vsel %vm770_vm2, %v816_v4, %v817_v54  ;;  %v821_v31 = vrot.slane %v3086_v47, 2  ;;  %v827_v4 = vrot.slane %v3132_v33, 2 }
  0x96   : > { %5053 = vst [vmem:[#allocation53_spill] sm:$0xff] %v3343_v44  ;;  %5056 = vst [vmem:[#allocation56_spill] sm:$0xff] %v3359_v27 }
  0x97   : > { %981 = vrot.lane.b32.xlu1 %v3316_v24, %s2708_s14  ;;  %983 = vrot.lane.b32.xlu0 %v3319_v35, %s2708_s14  ;;  %v814_v35 = vrot.slane %v3051_v25, 2  ;;  %v839_v24 = vrot.slane %v3191_v16, 2 }
  0x99   : > { %v3356_v25 = vsel %vm770_vm2, %v812_v17, %v814_v35  ;;  %v3372_v35 = vsel %vm770_vm2, %v821_v31, %v822_v9  ;;  %v826_v17 = vrot.slane %v3127_v26, 2  ;;  %v832_v31 = vrot.slane %v3162_v61, 2 }
  0x9a   : > { %5055 = vst [vmem:[#allocation55_spill] sm:$0xff] %v3356_v25 }
  0x9b   : > { %985 = vrot.lane.b32.xlu1 %v3330_v6, %s2708_s14  ;;  %987 = vrot.lane.b32.xlu0 %v3333_v62, %s2708_s14  ;;  %v819_v62 = vrot.slane %v3080_v38, 2  ;;  %v837_v6 = vrot.slane %v3182_v48, 2 }
  0x9d   : > { %v3369_v38 = vsel %vm770_vm2, %v817_v54, %v819_v62  ;;  %v829_v62 = vrot.slane %v3136_v22, 2  ;;  %v831_v54 = vrot.slane %v3155_v19, 2  ;;  %v836_v22 = vrot.slane %v3171_v55, 2 }
  0x9e   : > { %5057 = vst [vmem:[#allocation57_spill] sm:$0xff] %v3369_v38  ;;  %v3426_v16 = vsel %vm770_vm2, %v837_v6, %v839_v24 }
  0x9f   : > { %989 = vrot.lane.b32.xlu1 %v3343_v44, %s2708_s14  ;;  %991 = vrot.lane.b32.xlu0 %v3346_v39, %s2708_s14  ;;  %v824_v39 = vrot.slane %v3107_v18, 2  ;;  %v3384_v18 = vsel %vm770_vm2, %v826_v17, %v827_v4  ;;  %v3389_v44 = vpop.permute.xlu0 %2671  ;;  %v3400_v17 = vsel %vm770_vm2, %v831_v54, %v832_v31  ;;  %v841_v54 = vrot.slane %v3208_v14, 2  ;;  %5065 = vst [vmem:[#allocation65_spill] sm:$0xff] %v3426_v16 }
  0xa0   : > { %5058 = vst [vmem:[#allocation58_spill] sm:$0xff] %v3389_v44  ;;  %5060 = vst [vmem:[#allocation60_spill] sm:$0xff] %v3400_v17 }
  0xa3   : > { %993 = vrot.lane.b32.xlu1 %v3356_v25, %s2708_s14  ;;  %995 = vrot.lane.b32.xlu0 %v3359_v27, %s2708_s14  ;;  %v3381_v25 = vsel %vm770_vm2, %v822_v9, %v824_v39  ;;  %v834_v39 = vrot.slane %v3165_v40, 2  ;;  %v3397_v9 = vsel %vm770_vm2, %v827_v4, %v829_v62  ;;  %v3417_v62 = vsel %vm770_vm2, %v836_v22, %v837_v6 }
  0xa4   : > { %5059 = vst [vmem:[#allocation59_spill] sm:$0xff] %v3397_v9  ;;  %5064 = vst [vmem:[#allocation64_spill] sm:$0xff] %v3417_v62  ;;  %v844_v22 = vrot.slane %v3215_v5, 2  ;;  %v849_v5 = vrot.slane %v3237_v1, 2 }
  0xa5   : > { %v3414_v4 = vsel %vm770_vm2, %v832_v31, %v834_v39  ;;  %v3433_v39 = vsel %vm770_vm2, %v841_v54, %v842_v20 }
  0xa6   : > { %5063 = vst [vmem:[#allocation63_spill] sm:$0xff] %v3414_v4  ;;  %5066 = vst [vmem:[#allocation66_spill] sm:$0xff] %v3433_v39 }
  0xa7   : > { %997 = vrot.lane.b32.xlu1 %v3369_v38, %s2708_s14  ;;  %999 = vrot.lane.b32.xlu0 %v3372_v35, %s2708_s14 }
  0xab   : > { %1001 = vrot.lane.b32.xlu1 %v3381_v25, %s2708_s14  ;;  %1003 = vrot.lane.b32.xlu0 %v3384_v18, %s2708_s14 }
  0xae   : > { %v3409_v44 = vpop.permute.xlu1 %869  ;;  %v3411_v40 = vpop.permute.xlu0 %867 }
  0xaf   : > { %1005 = vrot.lane.b32.xlu1 %v3397_v9, %s2708_s14  ;;  %1007 = vrot.lane.b32.xlu0 %v3400_v17, %s2708_s14  ;;  %5061 = vst [vmem:[#allocation61_spill] sm:$0xff] %v3409_v44  ;;  %5062 = vst [vmem:[#allocation62_spill] sm:$0xff] %v3411_v40  ;;  %v846_v40 = vrot.slane %v3230_v56, 2  ;;  %v847_v17 = vrot.slane %v3234_v46, 2  ;;  %v311_v9 = vld [vmem:[%s2799_s9 + $0xf0] sm:$0xff] }
  0xb1   : > { %v3450_v54 = vsel %vm770_vm2, %v846_v40, %v847_v17 }
  0xb2   : > { %v3428_v44 = vpop.permute.xlu1 %871  ;;  %v3430_v31 = vpop.permute.xlu0 %873  ;;  %5068 = vst [vmem:[#allocation68_spill] sm:$0xff] %v3450_v54 }
  0xb3   : > { %1009 = vrot.lane.b32.xlu1 %v3414_v4, %s2708_s14  ;;  %1011 = vrot.lane.b32.xlu0 %v3417_v62, %s2708_s14  ;;  %v3447_v62 = vsel %vm770_vm2, %v842_v20, %v844_v22  ;;  %v3462_v4 = vsel %vm770_vm2, %v847_v17, %v849_v5 }
  0xb4   : > { %5067 = vst [vmem:[#allocation67_spill] sm:$0xff] %v3447_v62  ;;  %5069 = vst [vmem:[#allocation69_spill] sm:$0xff] %v3462_v4 }
  0xb6   : > { %v3442_v24 = vpop.permute.xlu1 %875  ;;  %v3444_v6 = vpop.permute.xlu0 %877 }
  0xb7   : > { %1013 = vrot.lane.b32.xlu1 %v3426_v16, %s2708_s14  ;;  %1015 = vrot.lane.b32.xlu0 %v3433_v39, %s2708_s14 }
  0xba   : > { %v3457_v16 = vpop.permute.xlu1 %879  ;;  %v3459_v39 = vpop.permute.xlu0 %881 }
  0xbb   : > { %1017 = vrot.lane.b32.xlu1 %v3447_v62, %s2708_s14  ;;  %1019 = vrot.lane.b32.xlu0 %v3450_v54, %s2708_s14 }
  0xbe   : > { %v3468_v1 = vpop.permute.xlu1 %883  ;;  %v3470_v20 = vpop.permute.xlu0 %885 }
  0xbf   : > { %1021 = vrot.lane.b32.xlu1 %v3462_v4, %s2708_s14  ;;  %1055 = vrot.lane.b32.xlu0 %v2864_v32, %s2709_s15 }
  0xc3   : > { %1057 = vrot.lane.b32.xlu1 %v2858_v30, %s2709_s15  ;;  %1059 = vrot.lane.b32.xlu0 %v2873_v37, %s2709_s15  ;;  %v3476_v40 = vpop.permute.xlu1 %887  ;;  %v3478_v17 = vpop.permute.xlu0 %889 }
  0xc7   : > { %1061 = vrot.lane.b32.xlu1 %v2870_v36, %s2709_s15  ;;  %1063 = vrot.lane.b32.xlu0 %v2900_v53, %s2709_s15  ;;  %v3484_v22 = vpop.permute.xlu1 %891  ;;  %v3486_v5 = vpop.permute.xlu0 %893 }
  0xcb   : > { %1065 = vrot.lane.b32.xlu1 %v2907_v57, %s2709_s15  ;;  %1067 = vrot.lane.b32.xlu0 %v2929_v13, %s2709_s15 }
  0xcc   : > { %v3492_v4 = vpop.permute.xlu1 %895  ;;  %v3494_v54 = vpop.permute.xlu0 %897 }
  0xcd   : > { %5070 = vst [vmem:[#allocation70_spill] sm:$0xff] %v3492_v4  ;;  %5071 = vst [vmem:[#allocation71_spill] sm:$0xff] %v3494_v54 }
  0xcf   : > { %1069 = vrot.lane.b32.xlu1 %v2926_v12, %s2709_s15  ;;  %1071 = vrot.lane.b32.xlu0 %v2954_v29, %s2709_s15 }
  0xd2   : > { %v3504_v62 = vpop.permute.xlu1 %899  ;;  %v3506_v30 = vpop.permute.xlu0 %901 }
  0xd3   : > { %1073 = vrot.lane.b32.xlu1 %v2957_v0, %s2709_s15  ;;  %1075 = vrot.lane.b32.xlu0 %v2981_v58, %s2709_s15  ;;  %5072 = vst [vmem:[#allocation72_spill] sm:$0xff] %v3504_v62  ;;  %5073 = vst [vmem:[#allocation73_spill] sm:$0xff] %v3506_v30 }
  0xd6   : > { %v3512_v32 = vpop.permute.xlu1 %903  ;;  %v3514_v54 = vpop.permute.xlu0 %905 }
  0xd7   : > { %1077 = vrot.lane.b32.xlu1 %v2992_v8, %s2709_s15  ;;  %1079 = vrot.lane.b32.xlu0 %v3001_v23, %s2709_s15 }
  0xdb   : > { %1081 = vrot.lane.b32.xlu1 %v3012_v2, %s2709_s15  ;;  %1083 = vrot.lane.b32.xlu0 %v3042_v63, %s2709_s15  ;;  %v349_v63 = vmul.f32 %v2812_v42, %v311_v9 }
  0xdc   : > { %v3520_v62 = vpop.permute.xlu1 %907  ;;  %v3522_v30 = vpop.permute.xlu0 %909 }
  0xdd   : > { %5074 = vst [vmem:[#allocation74_spill] sm:$0xff] %v3520_v62  ;;  %5075 = vst [vmem:[#allocation75_spill] sm:$0xff] %v3522_v30 }
  0xdf   : > { %1085 = vrot.lane.b32.xlu1 %v3047_v21, %s2709_s15  ;;  %1087 = vrot.lane.b32.xlu0 %v3070_v7, %s2709_s15  ;;  %v312_v21 = vld [vmem:[%s2799_s9 + $0xf8] sm:$0xff]  ;;  %v387_v7 = vadd.f32 %v2830_v60, %v349_v63  ;;  %s2714_s9 = smov 32  }
  0xe1   : > { %v3528_v4 = vpop.permute.xlu1 %911  ;;  %vm419_vm7 = vcmp.ge.f32.partialorder %v387_v7, 0.0 }
  0xe2   : > { %v3530_v59 = vpop.permute.xlu0 %913 }
  0xe3   : > { %5076 = vst [vmem:[#allocation76_spill] sm:$0xff] %v3530_v59  ;;  %1089 = vrot.lane.b32.xlu1 %v3077_v3, %s2709_s15  ;;  %1091 = vrot.lane.b32.xlu0 %v3086_v47, %s2709_s15  ;;  %v350_v3 = vmul.f32 %v2812_v42, %v312_v21 }
  0xe5   : > { %v3538_v30 = vpop.permute.xlu1 %915  ;;  %v388_v59 = vadd.f32 %v2830_v60, %v350_v3 }
  0xe6   : > { %5077 = vst [vmem:[#allocation77_spill] sm:$0xff] %v3538_v30  ;;  %v3540_v62 = vpop.permute.xlu0 %917  ;;  %v451_v30 = vmul.f32 0.2, %v387_v7 }
  0xe7   : > { %5078 = vst [vmem:[#allocation78_spill] sm:$0xff] %v3540_v62  ;;  %1093 = vrot.lane.b32.xlu1 %v3097_v15, %s2709_s15  ;;  %1095 = vrot.lane.b32.xlu0 %v3127_v26, %s2709_s15  ;;  %vm420_vm8 = vcmp.ge.f32.partialorder %v388_v59, 0.0 }
  0xe8   : > { %v483_v21 = vsel %vm419_vm7, %v387_v7, %v451_v30 }
  0xe9   : > { %v571_v60 = vrot.slane %v483_v21, 7 }
  0xeb   : > { %1097 = vrot.lane.b32.xlu1 %v3132_v33, %s2709_s15  ;;  %1099 = vrot.lane.b32.xlu0 %v3155_v19, %s2709_s15  ;;  %v3553_v9 = vpop.permute.xlu1 %919  ;;  %v3555_v62 = vpop.permute.xlu0 %921  ;;  %v452_v19 = vmul.f32 0.2, %v388_v59  ;;  %v3581_v30 = vsel %vm523_vm0, 0.0, %v571_v60 }
  0xec   : > { %5079 = vst [vmem:[#allocation79_spill] sm:$0xff] %v3553_v9  ;;  %5080 = vst [vmem:[#allocation80_spill] sm:$0xff] %v3555_v62 }
  0xed   : > { %v3574_v9 = vsel %vm420_vm8, %v388_v59, %v452_v19  ;;  %5086 = vst [vmem:[#allocation86_spill] sm:$0xff] %v3581_v30 }
  0xee   : > { %5085 = vst [vmem:[#allocation85_spill] sm:$0xff] %v3574_v9  ;;  %v4980_v7 = vrot.slane %v3574_v9, 7  ;;  %v5089_v9 = vld [vmem:[#allocation8_spill] sm:$0xff] }
  0xef   : > { %1101 = vrot.lane.b32.xlu1 %v3162_v61, %s2709_s15  ;;  %1103 = vrot.lane.b32.xlu0 %v3171_v55, %s2709_s15  ;;  %v5095_v55 = vld [vmem:[#allocation25_spill] sm:$0xff] }
  0xf0   : > { %v3595_v19 = vsel %vm523_vm0, %v571_v60, %v4980_v7 }
  0xf1   : > { %v3562_v42 = vpop.permute.xlu1 %923  ;;  %v3564_v63 = vpop.permute.xlu0 %925  ;;  %5088 = vst [vmem:[#allocation88_spill] sm:$0xff] %v3595_v19 }
  0xf2   : > { %5081 = vst [vmem:[#allocation81_spill] sm:$0xff] %v3562_v42  ;;  %5082 = vst [vmem:[#allocation82_spill] sm:$0xff] %v3564_v63  ;;  %v5092_v42 = vld [vmem:[#allocation11_spill] sm:$0xff] }
  0xf3   : > { %1105 = vrot.lane.b32.xlu1 %v3182_v48, %s2709_s15  ;;  %1107 = vrot.lane.b32.xlu0 %v3208_v14, %s2709_s15 }
  0xf5   : > { %v3570_v3 = vpop.permute.xlu1 %2676  ;;  %v3572_v62 = vpop.permute.xlu0 %963 }
  0xf6   : > { %5083 = vst [vmem:[#allocation83_spill] sm:$0xff] %v3570_v3  ;;  %5084 = vst [vmem:[#allocation84_spill] sm:$0xff] %v3572_v62 }
  0xf7   : > { %1109 = vrot.lane.b32.xlu1 %v3211_v45, %s2709_s15  ;;  %1111 = vrot.lane.b32.xlu0 %v3230_v56, %s2709_s15  ;;  %v5093_v45 = vld [vmem:[#allocation24_spill] sm:$0xff] }
  0xf9   : > { %v3584_v63 = vpop.permute.xlu1 %965  ;;  %v3586_v21 = vpop.permute.xlu0 %967 }
  0xfa   : > { %5087 = vst [vmem:[#allocation87_spill] sm:$0xff] %v3584_v63 }
  0xfb   : > { %1113 = vrot.lane.b32.xlu1 %v3234_v46, %s2709_s15  ;;  %1115 = vrot.lane.b32.xlu0 %v3581_v30, %s2709_s15  ;;  %v5090_v30 = vld [vmem:[#allocation9_spill] sm:$0xff] }
  0xfd   : > { %v3597_v59 = vpop.permute.xlu1 %969  ;;  %v3599_v62 = vpop.permute.xlu0 %971 }
  0xff   : > { %1117 = vrot.lane.b32.xlu1 %v3595_v19, %s2709_s15  ;;  %1151 = vrot.lane.b32.xlu0 %v2884_v43, %s2710_s16 }
 0x101   : > { %v3605_v63 = vpop.permute.xlu1 %973  ;;  %v3607_v3 = vpop.permute.xlu0 %975 }
 0x103   : > { %1153 = vrot.lane.b32.xlu1 %v2881_v41, %s2710_s16  ;;  %1155 = vrot.lane.b32.xlu0 %v2894_v49, %s2710_s16  ;;  %v5091_v41 = vld [vmem:[#allocation10_spill] sm:$0xff] }
 0x105   : > { %v3613_v60 = vpop.permute.xlu1 %977  ;;  %v3615_v7 = vpop.permute.xlu0 %979 }
 0x107   : > { %1157 = vrot.lane.b32.xlu1 %v2897_v50, %s2710_s16  ;;  %1159 = vrot.lane.b32.xlu0 %v5089_v9, %s2710_s16 }
 0x109   : > { %v3621_v43 = vpop.permute.xlu1 %981  ;;  %v3623_v19 = vpop.permute.xlu0 %983 }
 0x10b   : > { %1161 = vrot.lane.b32.xlu1 %v5090_v30, %s2710_s16  ;;  %1163 = vrot.lane.b32.xlu0 %v5091_v41, %s2710_s16 }
 0x10d   : > { %v3629_v46 = vpop.permute.xlu1 %985  ;;  %v3631_v56 = vpop.permute.xlu0 %987 }
 0x10f   : > { %1165 = vrot.lane.b32.xlu1 %v5092_v42, %s2710_s16  ;;  %1183 = vrot.lane.b32.xlu0 %v5093_v45, %s2710_s16 }
 0x111   : > { %v3637_v14 = vpop.permute.xlu1 %989  ;;  %v3639_v48 = vpop.permute.xlu0 %991 }
 0x112   : > { %5094 = vst [vmem:[#allocation8_spill] sm:$0xff] %v3639_v48 }
 0x113   : > { %1185 = vrot.lane.b32.xlu1 %v5095_v55, %s2710_s16  ;;  %1247 = vrot.lane.b32.xlu0 %v3255_v10, %s2711_s17 }
 0x115   : > { %v3645_v41 = vpop.permute.xlu1 %993  ;;  %v3647_v61 = vpop.permute.xlu0 %995 }
 0x116   : > { %5096 = vst [vmem:[#allocation9_spill] sm:$0xff] %v3645_v41  ;;  %5097 = vst [vmem:[#allocation89_spill] sm:$0xff] %v3647_v61  ;;  %v487_v41 = vld [vmem:[%s4867_s4 + $0x10] sm:$0xff] }
 0x117   : > { %1279 = vrot.lane.b32.xlu1 %v3359_v27, %s2711_s17  ;;  %1249 = vrot.lane.b32.xlu0 %v3264_v34, %s2711_s17  ;;  %v485_v27 = vld [vmem:[%s4867_s4] sm:$0xff]  ;;  %v486_v34 = vld [vmem:[%s4867_s4 + $0x8] sm:$0xff] }
 0x119   : > { %v3653_v45 = vpop.permute.xlu1 %997  ;;  %v3655_v48 = vpop.permute.xlu0 %999 }
 0x11a   : > { %5098 = vst [vmem:[#allocation90_spill] sm:$0xff] %v3653_v45 }
 0x11b   : > { %1281 = vrot.lane.b32.xlu1 %v3369_v38, %s2711_s17  ;;  %1343 = vrot.lane.b32.xlu0 %v2873_v37, %s2712_s18  ;;  %v2637_v38 = vpack.c.bf16 %v486_v34, %v485_v27  ;;  %v488_v27 = vld [vmem:[%s4867_s4 + $0x18] sm:$0xff] }
 0x11c   : > { %v2641_v34 = vpack.c.bf16 %v488_v27, %v487_v41 }
 0x11d   : > { %v3661_v10 = vpop.permute.xlu1 %1001  ;;  %v3663_v55 = vpop.permute.xlu0 %1003  ;;  %2638 = vmatprep.subr.bf16.mxu0 %v2637_v38  ;;  %2645 = vmatprep.subr.bf16.mxu1 %v2637_v38 }
 0x11e   : > { %2640 = vmatpush3.bf16.msra.mxu0 %v2637_v38  ;;  %2648 = vmatpush3.bf16.msra.mxu1 %v2637_v38  ;;  %v5102_v38 = vld [vmem:[#allocation26_spill] sm:$0xff] }
 0x11f   : > { %1375 = vrot.lane.b32.xlu1 %v3086_v47, %s2712_s18  ;;  %1345 = vrot.lane.b32.xlu0 %v2870_v36, %s2712_s18 }
 0x120   : > { %2642 = vmatprep.subr.bf16.mxu0 %v2641_v34  ;;  %2646 = vmatprep.subr.bf16.mxu1 %v2641_v34 }
 0x121   : > { %v3675_v45 = vpop.permute.xlu1 %1005  ;;  %v3677_v61 = vpop.permute.xlu0 %1007 }
 0x122   : > { %5099 = vst [vmem:[#allocation91_spill] sm:$0xff] %v3677_v61  ;;  %2644 = vmatpush3.bf16.msra.mxu0 %v2641_v34  ;;  %2649 = vmatpush3.bf16.msra.mxu1 %v2641_v34 }
 0x123   : > { %1377 = vrot.lane.b32.xlu1 %v3097_v15, %s2712_s18  ;;  %1439 = vrot.lane.b32.xlu0 %v2894_v49, %s2713_s25  ;;  %v489_v49 = vld [vmem:[%s4867_s4 + $0x20] sm:$0xf] }
 0x124   : > { %2587 = vmatprep.subr.msk.mxu0 %vm1992_vm9, %v489_v49  ;;  %2647 = vmatprep.subr.msk.mxu1 %vm1992_vm9, %v489_v49 }
 0x125   : > { %v3689_v42 = vpop.permute.xlu1 %1009  ;;  %v3691_v61 = vpop.permute.xlu0 %1011 }
 0x126   : > { %5100 = vst [vmem:[#allocation92_spill] sm:$0xff] %v3689_v42  ;;  %5101 = vst [vmem:[#allocation93_spill] sm:$0xff] %v3691_v61  ;;  %v5104_v61 = vld [vmem:[#allocation27_spill] sm:$0xff]  ;;  %2588 = vmatpush3.msk.msra.mxu0 %vm1992_vm9, %v489_v49  ;;  %2650 = vmatpush3.msk.msra.mxu1 %vm1992_vm9, %v489_v49 }
 0x127   : > { %1471 = vrot.lane.b32.xlu1 %v5102_v38, %s2713_s25  ;;  %1187 = vrot.lane.b32.xlu0 %v5102_v38, %s2710_s16 }
 0x129   : > { %v3700_v41 = vpop.permute.xlu1 %1013  ;;  %v3702_v27 = vpop.permute.xlu0 %1015 }
 0x12a   : > { %5103 = vst [vmem:[#allocation26_spill] sm:$0xff] %v3702_v27 }
 0x12b   : > { %1441 = vrot.lane.b32.xlu1 %v2897_v50, %s2713_s25  ;;  %1473 = vrot.lane.b32.xlu0 %v5104_v61, %s2713_s25 }
 0x12d   : > { %v3708_v38 = vpop.permute.xlu1 %1017  ;;  %v3710_v42 = vpop.permute.xlu0 %1019 }
 0x12f   : > { %1535 = vrot.lane.b32.xlu1 %v3267_v28, %s2714_s9  ;;  %1567 = vrot.lane.b32.xlu0 %v3372_v35, %s2714_s9 }
 0x131   : > { %v3716_v34 = vpop.permute.xlu1 %1021  ;;  %v3718_v27 = vpop.permute.xlu0 %1055 }
 0x132   : > { %5105 = vst [vmem:[#allocation27_spill] sm:$0xff] %v3718_v27  ;;  %v1636_v27 = vsel %vm1631_vm10, %v2873_v37, %v3428_v44  ;;  %v1637_v37 = vsel %vm1631_vm10, %v2870_v36, %v3430_v31  ;;  %v1638_v44 = vsel %vm1631_vm10, %v2900_v53, %v3442_v24  ;;  %v1639_v36 = vsel %vm1631_vm10, %v2907_v57, %v3444_v6 }
 0x133   : > { %1189 = vrot.lane.b32.xlu1 %v5104_v61, %s2710_s16  ;;  %1251 = vrot.lane.b32.xlu0 %v3267_v28, %s2711_s17  ;;  %v1669_v61 = vsel %vm1664_vm11, %v1636_v27, %v3586_v21  ;;  %v1671_v21 = vsel %vm1664_vm11, %v1638_v44, %v3599_v62  ;;  %v1640_v62 = vsel %vm1631_vm10, %v2929_v13, %v3457_v16 }
 0x134   : > { %v1672_v31 = vsel %vm1664_vm11, %v1639_v36, %v3605_v63  ;;  %v1673_v24 = vsel %vm1664_vm11, %v1640_v62, %v3607_v3  ;;  %v1641_v16 = vsel %vm1631_vm10, %v2926_v12, %v3459_v39  ;;  %v1642_v6 = vsel %vm1631_vm10, %v2954_v29, %v3468_v1 }
 0x135   : > { %v3724_v50 = vpop.permute.xlu1 %1057  ;;  %v3726_v49 = vpop.permute.xlu0 %1059  ;;  %v1674_v63 = vsel %vm1664_vm11, %v1641_v16, %v3613_v60  ;;  %v1675_v3 = vsel %vm1664_vm11, %v1642_v6, %v3615_v7  ;;  %v1643_v39 = vsel %vm1631_vm10, %v2957_v0, %v3470_v20  ;;  %v1644_v1 = vsel %vm1631_vm10, %v2981_v58, %v3476_v40  ;;  %v5112_v20 = vld [vmem:[#allocation28_spill] sm:$0xff] }
 0x136   : > { %5106 = vst [vmem:[#allocation94_spill] sm:$0xff] %v3724_v50  ;;  %5107 = vst [vmem:[#allocation95_spill] sm:$0xff] %v3726_v49  ;;  %v1676_v7 = vsel %vm1664_vm11, %v1643_v39, %v3621_v43  ;;  %v1677_v60 = vsel %vm1664_vm11, %v1644_v1, %v3623_v19  ;;  %v1645_v40 = vsel %vm1631_vm10, %v2992_v8, %v3478_v17  ;;  %v5115_v17 = vld [vmem:[#allocation29_spill] sm:$0xff] }
 0x137   : > { %1283 = vrot.lane.b32.xlu1 %v3372_v35, %s2711_s17  ;;  %1537 = vrot.lane.b32.xlu0 %v3278_v51, %s2714_s9  ;;  %v1670_v35 = vsel %vm1664_vm11, %v1637_v37, %v3597_v59  ;;  %v1646_v19 = vsel %vm1631_vm10, %v3001_v23, %v3484_v22  ;;  %v1678_v43 = vsel %vm1664_vm11, %v1645_v40, %v3629_v46 }
 0x138   : > { %v1679_v62 = vsel %vm1664_vm11, %v1646_v19, %v3631_v56  ;;  %v1647_v46 = vsel %vm1631_vm10, %v3012_v2, %v3486_v5 }
 0x139   : > { %v3737_v28 = vpop.permute.xlu1 %1061  ;;  %v1064_v50 = vpop.permute.xlu0 %1063  ;;  %v1680_v56 = vsel %vm1664_vm11, %v1647_v46, %v3637_v14  ;;  %v1652_v14 = vsel %vm1631_vm10, %v3086_v47, %v3512_v32  ;;  %v5117_v32 = vld [vmem:[#allocation74_spill] sm:$0xff] }
 0x13a   : > { %v3740_v49 = vsel %vm1697_vm12, %v1669_v61, %v1064_v50  ;;  %v1685_v5 = vsel %vm1664_vm11, %v1652_v14, %v3655_v48  ;;  %v1654_v47 = vsel %vm1631_vm10, %v3127_v26, %v5117_v32  ;;  %v5132_v32 = vld [vmem:[#allocation35_spill] sm:$0xff] }
 0x13b   : > { %1569 = vrot.lane.b32.xlu1 %v3381_v25, %s2714_s9  ;;  %1253 = vrot.lane.b32.xlu0 %v3278_v51, %s2711_s17  ;;  %v1687_v39 = vsel %vm1664_vm11, %v1654_v47, %v3663_v55  ;;  %v5120_v55 = vld [vmem:[#allocation30_spill] sm:$0xff] }
 0x13d   : > { %v1066_v27 = vpop.permute.xlu1 %1065  ;;  %v1068_v50 = vpop.permute.xlu0 %1067 }
 0x13e   : > { %v3757_v61 = vsel %vm1697_vm12, %v1670_v35, %v1066_v27  ;;  %v3760_v51 = vsel %vm1697_vm12, %v1671_v21, %v1068_v50 }
 0x13f   : > { %1285 = vrot.lane.b32.xlu1 %v3381_v25, %s2711_s17  ;;  %1347 = vrot.lane.b32.xlu0 %v2900_v53, %s2712_s18 }
 0x141   : > { %v1070_v59 = vpop.permute.xlu1 %1069  ;;  %v1072_v37 = vpop.permute.xlu0 %1071 }
 0x142   : > { %v3777_v25 = vsel %vm1697_vm12, %v1672_v31, %v1070_v59  ;;  %v3780_v53 = vsel %vm1697_vm12, %v1673_v24, %v1072_v37 }
 0x143   : > { %1379 = vrot.lane.b32.xlu1 %v3127_v26, %s2712_s18  ;;  %1349 = vrot.lane.b32.xlu0 %v2907_v57, %s2712_s18  ;;  %v5119_v26 = vld [vmem:[#allocation75_spill] sm:$0xff] }
 0x145   : > { %v1074_v44 = vpop.permute.xlu1 %1073  ;;  %v1076_v35 = vpop.permute.xlu0 %1075 }
 0x146   : > { %v3797_v21 = vsel %vm1697_vm12, %v1674_v63, %v1074_v44  ;;  %v3800_v57 = vsel %vm1697_vm12, %v1675_v3, %v1076_v35 }
 0x147   : > { %5108 = vst [vmem:[#allocation96_spill] sm:$0xff] %v3797_v21  ;;  %5109 = vst [vmem:[#allocation97_spill] sm:$0xff] %v3800_v57  ;;  %1381 = vrot.lane.b32.xlu1 %v3132_v33, %s2712_s18  ;;  %1443 = vrot.lane.b32.xlu0 %v5089_v9, %s2713_s25 }
 0x149   : > { %v1078_v27 = vpop.permute.xlu1 %1077  ;;  %v1080_v50 = vpop.permute.xlu0 %1079 }
 0x14a   : > { %v3817_v36 = vsel %vm1697_vm12, %v1676_v7, %v1078_v27  ;;  %v3820_v9 = vsel %vm1697_vm12, %v1677_v60, %v1080_v50  ;;  %v5121_v50 = vld [vmem:[#allocation91_spill] sm:$0xff] }
 0x14b   : > { %5110 = vst [vmem:[#allocation98_spill] sm:$0xff] %v3817_v36  ;;  %5111 = vst [vmem:[#allocation99_spill] sm:$0xff] %v3820_v9  ;;  %1475 = vrot.lane.b32.xlu1 %v5112_v20, %s2713_s25  ;;  %1191 = vrot.lane.b32.xlu0 %v5112_v20, %s2710_s16  ;;  %v5166_v36 = vld [vmem:[#allocation27_spill] sm:$0xff] }
 0x14d   : > { %v1082_v31 = vpop.permute.xlu1 %1081  ;;  %v1084_v24 = vpop.permute.xlu0 %1083 }
 0x14e   : > { %v3837_v59 = vsel %vm1697_vm12, %v1678_v43, %v1082_v31  ;;  %v3840_v37 = vsel %vm1697_vm12, %v1679_v62, %v1084_v24  ;;  %v5125_v62 = vld [vmem:[#allocation77_spill] sm:$0xff]  ;;  %v5126_v31 = vld [vmem:[#allocation32_spill] sm:$0xff] }
 0x14f   : > { %5113 = vst [vmem:[#allocation28_spill] sm:$0xff] %v3837_v59  ;;  %5114 = vst [vmem:[#allocation100_spill] sm:$0xff] %v3840_v37  ;;  %1445 = vrot.lane.b32.xlu1 %v5090_v30, %s2713_s25  ;;  %1477 = vrot.lane.b32.xlu0 %v5115_v17, %s2713_s25  ;;  %v1658_v24 = vsel %vm1631_vm10, %v5126_v31, %v5125_v62  ;;  %v5162_v37 = vld [vmem:[#allocation3_spill] sm:$0xff]  ;;  %v5163_v59 = vld [vmem:[#allocation37_spill] sm:$0xff] }
 0x151   : > { %v1086_v22 = vpop.permute.xlu1 %1085  ;;  %v3851_v16 = vpop.permute.xlu0 %1087 }
 0x152   : > { %v3854_v6 = vsel %vm1697_vm12, %v1680_v56, %v1086_v22  ;;  %v5128_v56 = vld [vmem:[#allocation93_spill] sm:$0xff] }
 0x153   : > { %5116 = vst [vmem:[#allocation29_spill] sm:$0xff] %v3854_v6  ;;  %1539 = vrot.lane.b32.xlu1 %v3281_v52, %s2714_s9  ;;  %1571 = vrot.lane.b32.xlu0 %v3384_v18, %s2714_s9  ;;  %v1691_v22 = vsel %vm1664_vm11, %v1658_v24, %v5128_v56  ;;  %v5145_v56 = vld [vmem:[#allocation33_spill] sm:$0xff]  ;;  %v5161_v6 = vld [vmem:[#allocation18_spill] sm:$0xff] }
 0x155   : > { %v3860_v30 = vpop.permute.xlu1 %1089  ;;  %v3862_v63 = vpop.permute.xlu0 %1091 }
 0x157   : > { %1193 = vrot.lane.b32.xlu1 %v5115_v17, %s2710_s16  ;;  %1255 = vrot.lane.b32.xlu0 %v3281_v52, %s2711_s17  ;;  %v1653_v52 = vsel %vm1631_vm10, %v3097_v15, %v3514_v54  ;;  %v5118_v15 = vld [vmem:[#allocation59_spill] sm:$0xff]  ;;  %v1655_v54 = vsel %vm1631_vm10, %v3132_v33, %v5119_v26  ;;  %v5123_v33 = vld [vmem:[#allocation76_spill] sm:$0xff] }
 0x158   : > { %v1686_v48 = vsel %vm1664_vm11, %v1653_v52, %v3661_v10  ;;  %v1656_v10 = vsel %vm1631_vm10, %v5120_v55, %v3528_v4  ;;  %v1688_v27 = vsel %vm1664_vm11, %v1655_v54, %v3675_v45  ;;  %v5124_v4 = vld [vmem:[#allocation31_spill] sm:$0xff]  ;;  %v5127_v17 = vld [vmem:[#allocation92_spill] sm:$0xff]  ;;  %v5131_v52 = vld [vmem:[#allocation78_spill] sm:$0xff] }
 0x159   : > { %v3873_v3 = vpop.permute.xlu1 %1093  ;;  %v1096_v44 = vpop.permute.xlu0 %1095  ;;  %v1689_v20 = vsel %vm1664_vm11, %v1656_v10, %v5121_v50  ;;  %v1657_v45 = vsel %vm1631_vm10, %v5124_v4, %v5123_v33  ;;  %v1659_v47 = vsel %vm1631_vm10, %v5132_v32, %v5131_v52  ;;  %v5139_v50 = vld [vmem:[#allocation80_spill] sm:$0xff] }
 0x15a   : > { %v3876_v35 = vsel %vm1697_vm12, %v1685_v5, %v1096_v44  ;;  %v1690_v46 = vsel %vm1664_vm11, %v1657_v45, %v5127_v17 }
 0x15b   : > { %1287 = vrot.lane.b32.xlu1 %v3384_v18, %s2711_s17  ;;  %1541 = vrot.lane.b32.xlu0 %v3290_v11, %s2714_s9 }
 0x15d   : > { %v1098_v1 = vpop.permute.xlu1 %1097  ;;  %v1100_v7 = vpop.permute.xlu0 %1099 }
 0x15e   : > { %v3893_v18 = vsel %vm1697_vm12, %v1686_v48, %v1098_v1  ;;  %v3896_v60 = vsel %vm1697_vm12, %v1687_v39, %v1100_v7  ;;  %v5133_v48 = vld [vmem:[#allocation79_spill] sm:$0xff]  ;;  %v5134_v39 = vld [vmem:[#allocation38_spill] sm:$0xff]  ;;  %v1692_v7 = vsel %vm1664_vm11, %v1659_v47, %v3700_v41 }
 0x15f   : > { %1573 = vrot.lane.b32.xlu1 %v5118_v15, %s2714_s9  ;;  %1257 = vrot.lane.b32.xlu0 %v3290_v11, %s2711_s17  ;;  %v1660_v1 = vsel %vm1631_vm10, %v5134_v39, %v5133_v48  ;;  %v5149_v48 = vld [vmem:[#allocation11_spill] sm:$0xff] }
 0x161   : > { %v1102_v40 = vpop.permute.xlu1 %1101  ;;  %v1104_v19 = vpop.permute.xlu0 %1103 }
 0x162   : > { %v3913_v43 = vsel %vm1697_vm12, %v1688_v27, %v1102_v40  ;;  %v3916_v11 = vsel %vm1697_vm12, %v1689_v20, %v1104_v19  ;;  %v5138_v27 = vld [vmem:[#allocation10_spill] sm:$0xff]  ;;  %v5140_v20 = vld [vmem:[#allocation39_spill] sm:$0xff]  ;;  %v5141_v40 = vld [vmem:[#allocation81_spill] sm:$0xff] }
 0x163   : > { %5122 = vst [vmem:[#allocation74_spill] sm:$0xff] %v3916_v11  ;;  %1289 = vrot.lane.b32.xlu1 %v5118_v15, %s2711_s17  ;;  %1351 = vrot.lane.b32.xlu0 %v2929_v13, %s2712_s18  ;;  %v5135_v15 = vld [vmem:[#allocation26_spill] sm:$0xff]  ;;  %v1661_v41 = vsel %vm1631_vm10, %v5140_v20, %v5139_v50 }
 0x164   : > { %v1693_v26 = vsel %vm1664_vm11, %v1660_v1, %v5135_v15  ;;  %v5142_v19 = vld [vmem:[#allocation42_spill] sm:$0xff]  ;;  %v1694_v45 = vsel %vm1664_vm11, %v1661_v41, %v3708_v38  ;;  %v5153_v41 = vld [vmem:[#allocation47_spill] sm:$0xff] }
 0x165   : > { %v1106_v14 = vpop.permute.xlu1 %1105  ;;  %v1108_v5 = vpop.permute.xlu0 %1107  ;;  %v1662_v33 = vsel %vm1631_vm10, %v5142_v19, %v5141_v40  ;;  %v5150_v1 = vld [vmem:[#allocation34_spill] sm:$0xff] }
 0x166   : > { %v3933_v44 = vsel %vm1697_vm12, %v1690_v46, %v1106_v14  ;;  %v3936_v13 = vsel %vm1697_vm12, %v1691_v22, %v1108_v5  ;;  %v1695_v62 = vsel %vm1664_vm11, %v1662_v33, %v3710_v42  ;;  %v5146_v22 = vld [vmem:[#allocation82_spill] sm:$0xff]  ;;  %v5147_v14 = vld [vmem:[#allocation43_spill] sm:$0xff] }
 0x167   : > { %5129 = vst [vmem:[#allocation59_spill] sm:$0xff] %v3933_v44  ;;  %5130 = vst [vmem:[#allocation75_spill] sm:$0xff] %v3936_v13  ;;  %1383 = vrot.lane.b32.xlu1 %v5120_v55, %s2712_s18  ;;  %1353 = vrot.lane.b32.xlu0 %v2926_v12, %s2712_s18  ;;  %v1663_v38 = vsel %vm1631_vm10, %v5147_v14, %v5146_v22 }
 0x168   : > { %v1696_v42 = vsel %vm1664_vm11, %v1663_v38, %v3716_v34  ;;  %v5152_v34 = vld [vmem:[#allocation60_spill] sm:$0xff] }
 0x169   : > { %v1110_v54 = vpop.permute.xlu1 %1109  ;;  %v1112_v10 = vpop.permute.xlu0 %1111 }
 0x16a   : > { %v3953_v55 = vsel %vm1697_vm12, %v1692_v7, %v1110_v54  ;;  %v3956_v12 = vsel %vm1697_vm12, %v1693_v26, %v1112_v10  ;;  %v5151_v26 = vld [vmem:[#allocation46_spill] sm:$0xff] }
 0x16b   : > { %5136 = vst [vmem:[#allocation30_spill] sm:$0xff] %v3953_v55  ;;  %5137 = vst [vmem:[#allocation91_spill] sm:$0xff] %v3956_v12  ;;  %1385 = vrot.lane.b32.xlu1 %v5124_v4, %s2712_s18  ;;  %1447 = vrot.lane.b32.xlu0 %v5138_v27, %s2713_s25  ;;  %v5165_v12 = vld [vmem:[#allocation8_spill] sm:$0xff] }
 0x16d   : > { %v1114_v24 = vpop.permute.xlu1 %1113  ;;  %v1116_v17 = vpop.permute.xlu0 %1115 }
 0x16e   : > { %v3973_v4 = vsel %vm1697_vm12, %v1694_v45, %v1114_v24  ;;  %v3976_v46 = vsel %vm1697_vm12, %v1695_v62, %v1116_v17  ;;  %v5154_v45 = vld [vmem:[#allocation63_spill] sm:$0xff] }
 0x16f   : > { %5143 = vst [vmem:[#allocation76_spill] sm:$0xff] %v3973_v4  ;;  %5144 = vst [vmem:[#allocation31_spill] sm:$0xff] %v3976_v46  ;;  %1479 = vrot.lane.b32.xlu1 %v5145_v56, %s2713_s25  ;;  %1195 = vrot.lane.b32.xlu0 %v5145_v56, %s2710_s16  ;;  %v5160_v46 = vld [vmem:[#allocation70_spill] sm:$0xff] }
 0x171   : > { %v1118_v5 = vpop.permute.xlu1 %1117  ;;  %v1152_v52 = vpop.permute.xlu0 %1151 }
 0x172   : > { %v3988_v47 = vsel %vm1697_vm12, %v1696_v42, %v1118_v5  ;;  %v5155_v42 = vld [vmem:[#allocation12_spill] sm:$0xff] }
 0x173   : > { %5148 = vst [vmem:[#allocation77_spill] sm:$0xff] %v3988_v47  ;;  %1449 = vrot.lane.b32.xlu1 %v5149_v48, %s2713_s25  ;;  %1481 = vrot.lane.b32.xlu0 %v5150_v1, %s2713_s25  ;;  %v5156_v48 = vld [vmem:[#allocation36_spill] sm:$0xff] }
 0x175   : > { %v3994_v7 = vpop.permute.xlu1 %1153  ;;  %v3996_v15 = vpop.permute.xlu0 %1155 }
 0x177   : > { %1543 = vrot.lane.b32.xlu1 %v5151_v26, %s2714_s9  ;;  %1575 = vrot.lane.b32.xlu0 %v5152_v34, %s2714_s9 }
 0x179   : > { %v4002_v54 = vpop.permute.xlu1 %1157  ;;  %v4004_v10 = vpop.permute.xlu0 %1159 }
 0x17b   : > { %1197 = vrot.lane.b32.xlu1 %v5150_v1, %s2710_s16  ;;  %1259 = vrot.lane.b32.xlu0 %v5151_v26, %s2711_s17  ;;  %v5157_v1 = vld [vmem:[#allocation58_spill] sm:$0xff] }
 0x17c   : > { %v2673_v26 = vunpack.i.l.bf16 %v5157_v1  ;;  %v2674_v11 = vunpack.i.h.bf16 %v5157_v1 }
 0x17d   : > { %v4010_v27 = vpop.permute.xlu1 %1161  ;;  %v4012_v50 = vpop.permute.xlu0 %1163 }
 0x17e   : > { %v1632_v4 = vsel %vm1631_vm10, %v5162_v37, %v2673_v26 }
 0x17f   : > { %1291 = vrot.lane.b32.xlu1 %v5152_v34, %s2711_s17  ;;  %1545 = vrot.lane.b32.xlu0 %v5153_v41, %s2714_s9  ;;  %v5159_v34 = vld [vmem:[#allocation83_spill] sm:$0xff] }
 0x181   : > { %v4018_v40 = vpop.permute.xlu1 %1165  ;;  %v1184_v33 = vpop.permute.xlu0 %1183 }
 0x183   : > { %1577 = vrot.lane.b32.xlu1 %v5154_v45, %s2714_s9  ;;  %1261 = vrot.lane.b32.xlu0 %v5153_v41, %s2711_s17  ;;  %v2678_v41 = vunpack.i.l.bf16 %v5159_v34 }
 0x185   : > { %v4024_v62 = vpop.permute.xlu1 %1185  ;;  %v1248_v24 = vpop.permute.xlu0 %1247  ;;  %v1665_v55 = vsel %vm1664_vm11, %v1632_v4, %v2678_v41  ;;  %v5167_v41 = vld [vmem:[#allocation64_spill] sm:$0xff] }
 0x186   : > { %v1698_v13 = vsel %vm1697_vm12, %v1665_v55, %v5166_v36  ;;  %v2679_v36 = vunpack.i.h.bf16 %v5159_v34  ;;  %v5170_v34 = vld [vmem:[#allocation71_spill] sm:$0xff] }
 0x187   : > { %1293 = vrot.lane.b32.xlu1 %v5154_v45, %s2711_s17  ;;  %1355 = vrot.lane.b32.xlu0 %v2954_v29, %s2712_s18  ;;  %v1731_v44 = vsel %vm1730_vm13, %v1698_v13, %v1152_v52 }
 0x189   : > { %v1280_v17 = vpop.permute.xlu1 %1279  ;;  %v4030_v56 = vpop.permute.xlu0 %1249 }
 0x18b   : > { %1387 = vrot.lane.b32.xlu1 %v5126_v31, %s2712_s18  ;;  %1357 = vrot.lane.b32.xlu0 %v2957_v0, %s2712_s18 }
 0x18d   : > { %v4036_v22 = vpop.permute.xlu1 %1281  ;;  %v1344_v38 = vpop.permute.xlu0 %1343 }
 0x18f   : > { %1389 = vrot.lane.b32.xlu1 %v5132_v32, %s2712_s18  ;;  %1451 = vrot.lane.b32.xlu0 %v5155_v42, %s2713_s25  ;;  %v5158_v32 = vld [vmem:[#allocation13_spill] sm:$0xff] }
 0x191   : > { %v1376_v5 = vpop.permute.xlu1 %1375  ;;  %v1346_v29 = vpop.permute.xlu0 %1345 }
 0x193   : > { %1483 = vrot.lane.b32.xlu1 %v5156_v48, %s2713_s25  ;;  %1167 = vrot.lane.b32.xlu0 %v5155_v42, %s2710_s16  ;;  %v1648_v42 = vsel %vm1631_vm10, %v5161_v6, %v5160_v46 }
 0x194   : > { %v1681_v9 = vsel %vm1664_vm11, %v1648_v42, %v5165_v12  ;;  %v1764_v12 = vsel %vm1763_vm14, %v1731_v44, %v1248_v24  ;;  %v5168_v24 = vld [vmem:[#allocation2_spill] sm:$0xff] }
 0x195   : > { %v4046_v31 = vpop.permute.xlu1 %1377  ;;  %v1440_v0 = vpop.permute.xlu0 %1439  ;;  %v1714_v46 = vsel %vm1697_vm12, %v1681_v9, %v3851_v16  ;;  %v1797_v9 = vsel %vm1796_vm15, %v1764_v12, %v1344_v38 }
 0x196   : > { %v1747_v21 = vsel %vm1730_vm13, %v1714_v46, %v1184_v33  ;;  %v1830_v13 = vsel %vm1829_vm3, %v1797_v9, %v1440_v0  ;;  %v5173_v46 = vld [vmem:[#allocation9_spill] sm:$0xff] }
 0x197   : > { %1199 = vrot.lane.b32.xlu1 %v5156_v48, %s2710_s16  ;;  %1453 = vrot.lane.b32.xlu0 %v5158_v32, %s2713_s25  ;;  %v5164_v48 = vld [vmem:[#allocation48_spill] sm:$0xff]  ;;  %v1780_v4 = vsel %vm1763_vm14, %v1747_v21, %v1280_v17  ;;  %v1633_v17 = vsel %vm1631_vm10, %v5168_v24, %v2674_v11 }
 0x198   : > { %v1813_v16 = vsel %vm1796_vm15, %v1780_v4, %v1376_v5  ;;  %v1666_v38 = vsel %vm1664_vm11, %v1633_v17, %v2679_v36  ;;  %v5169_v5 = vld [vmem:[#allocation94_spill] sm:$0xff]  ;;  %v5176_v17 = vld [vmem:[#allocation40_spill] sm:$0xff] }
 0x199   : > { %v1472_v45 = vpop.permute.xlu1 %1471  ;;  %v4054_v47 = vpop.permute.xlu0 %1187  ;;  %v1699_v0 = vsel %vm1697_vm12, %v1666_v38, %v5169_v5  ;;  %v5178_v5 = vld [vmem:[#allocation7_spill] sm:$0xff] }
 0x19a   : > { %v1846_v55 = vsel %vm1829_vm3, %v1813_v16, %v1472_v45  ;;  %v1732_v11 = vsel %vm1730_vm13, %v1699_v0, %v3994_v7 }
 0x19b   : > { %1485 = vrot.lane.b32.xlu1 %v5163_v59, %s2713_s25  ;;  %1547 = vrot.lane.b32.xlu0 %v5164_v48, %s2714_s9  ;;  %v1765_v42 = vsel %vm1763_vm14, %v1732_v11, %v4030_v56  ;;  %v5179_v11 = vld [vmem:[#allocation72_spill] sm:$0xff] }
 0x19c   : > { %v1798_v4 = vsel %vm1796_vm15, %v1765_v42, %v1346_v29  ;;  %v5182_v42 = vld [vmem:[#allocation84_spill] sm:$0xff] }
 0x19d   : > { %v1442_v26 = vpop.permute.xlu1 %1441  ;;  %v1474_v57 = vpop.permute.xlu0 %1473 }
 0x19e   : > { %v1831_v36 = vsel %vm1829_vm3, %v1798_v4, %v1442_v26  ;;  %v5184_v4 = vld [vmem:[#allocation95_spill] sm:$0xff] }
 0x19f   : > { %1579 = vrot.lane.b32.xlu1 %v5167_v41, %s2714_s9  ;;  %1169 = vrot.lane.b32.xlu0 %v5158_v32, %s2710_s16 }
 0x1a1   : > { %v1536_v44 = vpop.permute.xlu1 %1535  ;;  %v1568_v52 = vpop.permute.xlu0 %1567 }
 0x1a2   : > { %v1863_v21 = vsel %vm1862_vm4, %v1830_v13, %v1536_v44  ;;  %v1879_v33 = vsel %vm1862_vm4, %v1846_v55, %v1568_v52  ;;  %v5174_v55 = vld [vmem:[#allocation65_spill] sm:$0xff] }
 0x1a3   : > { %1201 = vrot.lane.b32.xlu1 %v5163_v59, %s2710_s16  ;;  %1263 = vrot.lane.b32.xlu0 %v5164_v48, %s2711_s17  ;;  %v5171_v59 = vld [vmem:[#allocation19_spill] sm:$0xff]  ;;  %v5172_v48 = vld [vmem:[#allocation49_spill] sm:$0xff] }
 0x1a4   : > { %2589 = vmatprep.mubr.msk.f32.mxu0 %vm1895_vm5, %v1863_v21  ;;  %2613 = vmatprep.mubr.msk.f32.mxu1 %vm1895_vm5, %v1879_v33  ;;  %v1649_v45 = vsel %vm1631_vm10, %v5171_v59, %v5170_v34  ;;  %v5175_v21 = vld [vmem:[#allocation14_spill] sm:$0xff] }
 0x1a5   : > { %v4099_v1 = vpop.permute.xlu1 %1189  ;;  %v1252_v32 = vpop.permute.xlu0 %1251  ;;  %v1682_v12 = vsel %vm1664_vm11, %v1649_v45, %v5173_v46  ;;  %v5181_v45 = vld [vmem:[#allocation15_spill] sm:$0xff]  ;;  %v5183_v46 = vld [vmem:[#allocation89_spill] sm:$0xff] }
 0x1a6   : > { %v1715_v7 = vsel %vm1697_vm12, %v1682_v12, %v3860_v30 }
 0x1a7   : > { %1295 = vrot.lane.b32.xlu1 %v5167_v41, %s2711_s17  ;;  %1549 = vrot.lane.b32.xlu0 %v5172_v48, %s2714_s9  ;;  %v1748_v56 = vsel %vm1730_vm13, %v1715_v7, %v4024_v62 }
 0x1a8   : > { %v1781_v13 = vsel %vm1763_vm14, %v1748_v56, %v4036_v22 }
 0x1a9   : > { %v1284_v9 = vpop.permute.xlu1 %1283  ;;  %v1538_v16 = vpop.permute.xlu0 %1537  ;;  %v1814_v30 = vsel %vm1796_vm15, %v1781_v13, %v4046_v31 }
 0x1aa   : > { %v1864_v41 = vsel %vm1862_vm4, %v1831_v36, %v1538_v16  ;;  %v1847_v29 = vsel %vm1829_vm3, %v1814_v30, %v1474_v57 }
 0x1ab   : > { %1581 = vrot.lane.b32.xlu1 %v5174_v55, %s2714_s9  ;;  %1265 = vrot.lane.b32.xlu0 %v5172_v48, %s2711_s17 }
 0x1ac   : > { %2590 = vmatmul.mubr.msk.f32.vlgmr.msra.gmra.mrb[0].mxu0 %vm1895_vm5, %v1864_v41 }
 0x1ad   : > { %v1570_v26 = vpop.permute.xlu1 %1569  ;;  %v1254_v62 = vpop.permute.xlu0 %1253 }
 0x1ae   : > { %v1880_v44 = vsel %vm1862_vm4, %v1847_v29, %v1570_v26  ;;  %v5185_v29 = vld [vmem:[#allocation41_spill] sm:$0xff]  ;;  %v5186_v26 = vld [vmem:[#allocation50_spill] sm:$0xff] }
 0x1af   : > { %1297 = vrot.lane.b32.xlu1 %v5174_v55, %s2711_s17  ;;  %1359 = vrot.lane.b32.xlu0 %v2981_v58, %s2712_s18 }
 0x1b0   : > { %2614 = vmatmul.mubr.msk.f32.vlgmr.msra.gmra.mrb[0].mxu1 %vm1895_vm5, %v1880_v44 }
 0x1b1   : > { %v1286_v22 = vpop.permute.xlu1 %1285  ;;  %v1348_v52 = vpop.permute.xlu0 %1347 }
 0x1b3   : > { %1391 = vrot.lane.b32.xlu1 %v5134_v39, %s2712_s18  ;;  %1361 = vrot.lane.b32.xlu0 %v2992_v8, %s2712_s18  ;;  %v5177_v8 = vld [vmem:[#allocation62_spill] sm:$0xff] }
 0x1b4   : > { %v1634_v0 = vsel %vm1631_vm10, %v5178_v5, %v5177_v8  ;;  %v5187_v8 = vld [vmem:[#allocation61_spill] sm:$0xff]  ;;  %v5188_v5 = vld [vmem:[#allocation6_spill] sm:$0xff] }
 0x1b5   : > { %v1380_v57 = vpop.permute.xlu1 %1379  ;;  %v1350_v31 = vpop.permute.xlu0 %1349  ;;  %v1667_v48 = vsel %vm1664_vm11, %v1634_v0, %v5182_v42  ;;  %v1635_v0 = vsel %vm1631_vm10, %v5188_v5, %v5187_v8 }
 0x1b6   : > { %v1700_v7 = vsel %vm1697_vm12, %v1667_v48, %v5184_v4  ;;  %v5191_v48 = vld [vmem:[#allocation73_spill] sm:$0xff]  ;;  %v5193_v4 = vld [vmem:[#allocation90_spill] sm:$0xff] }
 0x1b7   : > { %1393 = vrot.lane.b32.xlu1 %v5140_v20, %s2712_s18  ;;  %1455 = vrot.lane.b32.xlu0 %v5175_v21, %s2713_s25  ;;  %v5180_v20 = vld [vmem:[#allocation22_spill] sm:$0xff]  ;;  %v1733_v41 = vsel %vm1730_vm13, %v1700_v7, %v3996_v15 }
 0x1b8   : > { %v1650_v34 = vsel %vm1631_vm10, %v5180_v20, %v5179_v11  ;;  %v1766_v55 = vsel %vm1763_vm14, %v1733_v41, %v1252_v32  ;;  %v5189_v11 = vld [vmem:[#allocation66_spill] sm:$0xff] }
 0x1b9   : > { %v1382_v33 = vpop.permute.xlu1 %1381  ;;  %v1444_v58 = vpop.permute.xlu0 %1443  ;;  %v1683_v12 = vsel %vm1664_vm11, %v1650_v34, %v5183_v46  ;;  %v5192_v46 = vld [vmem:[#allocation23_spill] sm:$0xff] }
 0x1ba   : > { %v1716_v36 = vsel %vm1697_vm12, %v1683_v12, %v3862_v63  ;;  %v1799_v63 = vsel %vm1796_vm15, %v1766_v55, %v1348_v52  ;;  %v5190_v52 = vld [vmem:[#allocation87_spill] sm:$0xff] }
 0x1bb   : > { %1487 = vrot.lane.b32.xlu1 %v5176_v17, %s2713_s25  ;;  %1171 = vrot.lane.b32.xlu0 %v5175_v21, %s2710_s16  ;;  %v1749_v13 = vsel %vm1730_vm13, %v1716_v36, %v4054_v47  ;;  %v1832_v21 = vsel %vm1829_vm3, %v1799_v63, %v1444_v58  ;;  %v5195_v63 = vld [vmem:[#allocation67_spill] sm:$0xff] }
 0x1bc   : > { %v1782_v30 = vsel %vm1763_vm14, %v1749_v13, %v1284_v9 }
 0x1bd   : > { %v1476_v39 = vpop.permute.xlu1 %1475  ;;  %v4149_v38 = vpop.permute.xlu0 %1191  ;;  %v1815_v44 = vsel %vm1796_vm15, %v1782_v30, %v1380_v57  ;;  %v1668_v57 = vsel %vm1664_vm11, %v1635_v0, %v5190_v52  ;;  %v5198_v0 = vld [vmem:[#allocation17_spill] sm:$0xff] }
 0x1be   : > { %v1848_v15 = vsel %vm1829_vm3, %v1815_v44, %v1476_v39  ;;  %v1701_v58 = vsel %vm1697_vm12, %v1668_v57, %v3737_v28 }
 0x1bf   : > { %1203 = vrot.lane.b32.xlu1 %v5176_v17, %s2710_s16  ;;  %1457 = vrot.lane.b32.xlu0 %v5181_v45, %s2713_s25  ;;  %v1734_v42 = vsel %vm1730_vm13, %v1701_v58, %v4002_v54 }
 0x1c0   : > { %v1767_v12 = vsel %vm1763_vm14, %v1734_v42, %v1254_v62  ;;  %v5200_v42 = vld [vmem:[#allocation52_spill] sm:$0xff] }
 0x1c1   : > { %v1446_v16 = vpop.permute.xlu1 %1445  ;;  %v1478_v56 = vpop.permute.xlu0 %1477  ;;  %v1800_v7 = vsel %vm1796_vm15, %v1767_v12, %v1350_v31  ;;  %v1736_v12 = vsel %vm1730_vm13, %v3757_v61, %v4010_v27 }
 0x1c2   : > { %v1833_v36 = vsel %vm1829_vm3, %v1800_v7, %v1446_v16 }
 0x1c3   : > { %1489 = vrot.lane.b32.xlu1 %v5185_v29, %s2713_s25  ;;  %1551 = vrot.lane.b32.xlu0 %v5186_v26, %s2714_s9 }
 0x1c5   : > { %v1540_v17 = vpop.permute.xlu1 %1539  ;;  %v1572_v47 = vpop.permute.xlu0 %1571 }
 0x1c6   : > { %v1865_v32 = vsel %vm1862_vm4, %v1832_v21, %v1540_v17  ;;  %v1881_v9 = vsel %vm1862_vm4, %v1848_v15, %v1572_v47  ;;  %v5196_v17 = vld [vmem:[#allocation16_spill] sm:$0xff] }
 0x1c7   : > { %1583 = vrot.lane.b32.xlu1 %v5189_v11, %s2714_s9  ;;  %1173 = vrot.lane.b32.xlu0 %v5181_v45, %s2710_s16  ;;  %v1651_v45 = vsel %vm1631_vm10, %v5192_v46, %v5191_v48 }
 0x1c8   : > { %2592 = vmatprep.mubr.msk.f32.mxu0 %vm1895_vm5, %v1865_v32  ;;  %2616 = vmatprep.mubr.msk.f32.mxu1 %vm1895_vm5, %v1881_v9  ;;  %v1684_v28 = vsel %vm1664_vm11, %v1651_v45, %v5193_v4 }
 0x1c9   : > { %v4198_v39 = vpop.permute.xlu1 %1193  ;;  %v1256_v34 = vpop.permute.xlu0 %1255  ;;  %v1717_v54 = vsel %vm1697_vm12, %v1684_v28, %v3873_v3  ;;  %v5201_v28 = vld [vmem:[#allocation68_spill] sm:$0xff] }
 0x1ca   : > { %v1750_v62 = vsel %vm1730_vm13, %v1717_v54, %v4099_v1 }
 0x1cb   : > { %1205 = vrot.lane.b32.xlu1 %v5185_v29, %s2710_s16  ;;  %1267 = vrot.lane.b32.xlu0 %v5186_v26, %s2711_s17  ;;  %v1783_v30 = vsel %vm1763_vm14, %v1750_v62, %v1286_v22  ;;  %v5194_v29 = vld [vmem:[#allocation51_spill] sm:$0xff] }
 0x1cc   : > { %v1816_v31 = vsel %vm1796_vm15, %v1783_v30, %v1382_v33 }
 0x1cd   : > { %v1288_v41 = vpop.permute.xlu1 %1287  ;;  %v1542_v13 = vpop.permute.xlu0 %1541  ;;  %v1849_v3 = vsel %vm1829_vm3, %v1816_v31, %v1478_v56 }
 0x1ce   : > { %v1866_v55 = vsel %vm1862_vm4, %v1833_v36, %v1542_v13  ;;  %v1752_v13 = vsel %vm1730_vm13, %v3893_v18, %v4198_v39  ;;  %v5202_v39 = vld [vmem:[#allocation53_spill] sm:$0xff] }
 0x1cf   : > { %1299 = vrot.lane.b32.xlu1 %v5189_v11, %s2711_s17  ;;  %1553 = vrot.lane.b32.xlu0 %v5194_v29, %s2714_s9 }
 0x1d0   : > { %2593 = vmatmul.mubr.msk.f32.gmra.mrb[2].mxu0 %vm1895_vm5, %v1866_v55 }
 0x1d1   : > { %v1574_v16 = vpop.permute.xlu1 %1573  ;;  %v1258_v26 = vpop.permute.xlu0 %1257 }
 0x1d2   : > { %v1882_v1 = vsel %vm1862_vm4, %v1849_v3, %v1574_v16  ;;  %v1769_v4 = vsel %vm1763_vm14, %v1736_v12, %v1258_v26  ;;  %v5203_v16 = vld [vmem:[#allocation69_spill] sm:$0xff]  ;;  %v5210_v12 = vld [vmem:[#allocation54_spill] sm:$0xff] }
 0x1d3   : > { %1585 = vrot.lane.b32.xlu1 %v5195_v63, %s2714_s9  ;;  %1269 = vrot.lane.b32.xlu0 %v5194_v29, %s2711_s17 }
 0x1d4   : > { %2617 = vmatmul.mubr.msk.f32.gmra.mrb[2].mxu1 %vm1895_vm5, %v1882_v1 }
 0x1d5   : > { %v1290_v22 = vpop.permute.xlu1 %1289  ;;  %v1352_v44 = vpop.permute.xlu0 %1351 }
 0x1d6   : > { %v1785_v27 = vsel %vm1763_vm14, %v1752_v13, %v1290_v22 }
 0x1d7   : > { %1301 = vrot.lane.b32.xlu1 %v5195_v63, %s2711_s17  ;;  %1363 = vrot.lane.b32.xlu0 %v3001_v23, %s2712_s18  ;;  %v5197_v23 = vld [vmem:[#allocation44_spill] sm:$0xff] }
 0x1d9   : > { %v1384_v33 = vpop.permute.xlu1 %1383  ;;  %v1354_v56 = vpop.permute.xlu0 %1353 }
 0x1da   : > { %v1802_v7 = vsel %vm1796_vm15, %v1769_v4, %v1354_v56  ;;  %v5205_v56 = vld [vmem:[#allocation88_spill] sm:$0xff] }
 0x1db   : > { %1395 = vrot.lane.b32.xlu1 %v5142_v19, %s2712_s18  ;;  %1365 = vrot.lane.b32.xlu0 %v3012_v2, %s2712_s18  ;;  %v1735_v2 = vsel %vm1730_vm13, %v3740_v49, %v4004_v10 }
 0x1dc   : > { %v1768_v8 = vsel %vm1763_vm14, %v1735_v2, %v1256_v34  ;;  %v5199_v34 = vld [vmem:[#allocation45_spill] sm:$0xff] }
 0x1dd   : > { %v1386_v21 = vpop.permute.xlu1 %1385  ;;  %v1448_v15 = vpop.permute.xlu0 %1447  ;;  %v1801_v11 = vsel %vm1796_vm15, %v1768_v8, %v1352_v44  ;;  %v5204_v44 = vld [vmem:[#allocation86_spill] sm:$0xff] }
 0x1de   : > { %v1834_v49 = vsel %vm1829_vm3, %v1801_v11, %v1448_v15  ;;  %v1818_v62 = vsel %vm1796_vm15, %v1785_v27, %v1386_v21  ;;  %v854_v21 = vrot.slane %v5205_v56, 1 }
 0x1df   : > { %1397 = vrot.lane.b32.xlu1 %v5147_v14, %s2712_s18  ;;  %1459 = vrot.lane.b32.xlu0 %v5196_v17, %s2713_s25  ;;  %v1751_v14 = vsel %vm1730_vm13, %v3876_v35, %v4149_v38 }
 0x1e0   : > { %v1784_v5 = vsel %vm1763_vm14, %v1751_v14, %v1288_v41  ;;  %v1737_v14 = vsel %vm1730_vm13, %v3760_v51, %v4012_v50 }
 0x1e1   : > { %v1480_v47 = vpop.permute.xlu1 %1479  ;;  %v4245_v32 = vpop.permute.xlu0 %1195  ;;  %v1817_v52 = vsel %vm1796_vm15, %v1784_v5, %v1384_v33  ;;  %v853_v33 = vrot.slane %v5204_v44, 1 }
 0x1e2   : > { %v1850_v10 = vsel %vm1829_vm3, %v1817_v52, %v1480_v47 }
 0x1e3   : > { %1491 = vrot.lane.b32.xlu1 %v5197_v23, %s2713_s25  ;;  %1175 = vrot.lane.b32.xlu0 %v5196_v17, %s2710_s16  ;;  %v855_v47 = vsel %vm689_vm1, %v853_v33, %v854_v21 }
 0x1e5   : > { %v1450_v19 = vpop.permute.xlu1 %1449  ;;  %v1482_v9 = vpop.permute.xlu0 %1481 }
 0x1e6   : > { %v1835_v54 = vsel %vm1829_vm3, %v1802_v7, %v1450_v19  ;;  %v1851_v55 = vsel %vm1829_vm3, %v1818_v62, %v1482_v9  ;;  %v5207_v9 = vld [vmem:[#allocation85_spill] sm:$0xff] }
 0x1e7   : > { %1207 = vrot.lane.b32.xlu1 %v5197_v23, %s2710_s16  ;;  %1461 = vrot.lane.b32.xlu0 %v5198_v0, %s2713_s25 }
 0x1e9   : > { %v1544_v57 = vpop.permute.xlu1 %1543  ;;  %v1576_v35 = vpop.permute.xlu0 %1575 }
 0x1ea   : > { %v1867_v38 = vsel %vm1862_vm4, %v1834_v49, %v1544_v57  ;;  %v1883_v58 = vsel %vm1862_vm4, %v1850_v10, %v1576_v35  ;;  %v1753_v10 = vsel %vm1730_vm13, %v3896_v60, %v4245_v32  ;;  %v5209_v57 = vld [vmem:[#allocation21_spill] sm:$0xff]  ;;  %v858_v35 = vrot.slane %v5204_v44, 2 }
 0x1eb   : > { %1493 = vrot.lane.b32.xlu1 %v5199_v34, %s2713_s25  ;;  %1555 = vrot.lane.b32.xlu0 %v5200_v42, %s2714_s9 }
 0x1ec   : > { %2595 = vmatprep.mubr.msk.f32.mxu0 %vm1895_vm5, %v1867_v38  ;;  %2619 = vmatprep.mubr.msk.f32.mxu1 %vm1895_vm5, %v1883_v58  ;;  %v859_v38 = vrot.slane %v5205_v56, 2 }
 0x1ed   : > { %v4275_v48 = vpop.permute.xlu1 %1197  ;;  %v1260_v45 = vpop.permute.xlu0 %1259 }
 0x1ee   : > { %v1770_v8 = vsel %vm1763_vm14, %v1737_v14, %v1260_v45  ;;  %v860_v4 = vsel %vm770_vm2, %v858_v35, %v859_v38  ;;  %v1754_v62 = vsel %vm1730_vm13, %v3913_v43, %v4275_v48  ;;  %v5211_v48 = vld [vmem:[#allocation55_spill] sm:$0xff]  ;;  %v5216_v14 = vld [vmem:[#allocation74_spill] sm:$0xff] }
 0x1ef   : > { %1587 = vrot.lane.b32.xlu1 %v5201_v28, %s2714_s9  ;;  %1177 = vrot.lane.b32.xlu0 %v5198_v0, %s2710_s16 }
 0x1f1   : > { %v1292_v36 = vpop.permute.xlu1 %1291  ;;  %v1546_v41 = vpop.permute.xlu0 %1545 }
 0x1f2   : > { %v1868_v61 = vsel %vm1862_vm4, %v1835_v54, %v1546_v41  ;;  %v1786_v50 = vsel %vm1763_vm14, %v1753_v10, %v1292_v36  ;;  %v1738_v54 = vsel %vm1730_vm13, %v3777_v25, %v4018_v40 }
 0x1f3   : > { %1209 = vrot.lane.b32.xlu1 %v5199_v34, %s2710_s16  ;;  %1271 = vrot.lane.b32.xlu0 %v5200_v42, %s2711_s17 }
 0x1f4   : > { %2596 = vmatmul.mubr.msk.f32.gmra.mrb[4].mxu0 %vm1895_vm5, %v1868_v61 }
 0x1f5   : > { %v1578_v30 = vpop.permute.xlu1 %1577  ;;  %v1262_v29 = vpop.permute.xlu0 %1261 }
 0x1f6   : > { %v1884_v18 = vsel %vm1862_vm4, %v1851_v55, %v1578_v30  ;;  %v1771_v36 = vsel %vm1763_vm14, %v1738_v54, %v1262_v29 }
 0x1f7   : > { %1303 = vrot.lane.b32.xlu1 %v5201_v28, %s2711_s17  ;;  %1557 = vrot.lane.b32.xlu0 %v5202_v39, %s2714_s9 }
 0x1f8   : > { %2620 = vmatmul.mubr.msk.f32.gmra.mrb[4].mxu1 %vm1895_vm5, %v1884_v18 }
 0x1f9   : > { %v1294_v31 = vpop.permute.xlu1 %1293  ;;  %v1356_v3 = vpop.permute.xlu0 %1355 }
 0x1fa   : > { %v1803_v5 = vsel %vm1796_vm15, %v1770_v8, %v1356_v3  ;;  %v1787_v25 = vsel %vm1763_vm14, %v1754_v62, %v1294_v31 }
 0x1fb   : > { %1589 = vrot.lane.b32.xlu1 %v5203_v16, %s2714_s9  ;;  %1273 = vrot.lane.b32.xlu0 %v5202_v39, %s2711_s17 }
 0x1fd   : > { %v1388_v26 = vpop.permute.xlu1 %1387  ;;  %v1358_v1 = vpop.permute.xlu0 %1357 }
 0x1fe   : > { %v1819_v58 = vsel %vm1796_vm15, %v1786_v50, %v1388_v26  ;;  %v1804_v41 = vsel %vm1796_vm15, %v1771_v36, %v1358_v1 }
 0x1ff   : > { %1305 = vrot.lane.b32.xlu1 %v5203_v16, %s2711_s17  ;;  %1367 = vrot.lane.b32.xlu0 %v5161_v6, %s2712_s18  ;;  %v5206_v6 = vld [vmem:[#allocation20_spill] sm:$0xff] }
 0x201   : > { %v1390_v63 = vpop.permute.xlu1 %1389  ;;  %v1452_v22 = vpop.permute.xlu0 %1451 }
 0x202   : > { %v1836_v11 = vsel %vm1829_vm3, %v1803_v5, %v1452_v22  ;;  %v1820_v40 = vsel %vm1796_vm15, %v1787_v25, %v1390_v63  ;;  %v2680_v63 = vpack.i.bf16 %v5168_v24, %v5162_v37  ;;  %v5217_v5 = vld [vmem:[#allocation5_spill] sm:$0xff] }
 0x203   : > { %1399 = vrot.lane.b32.xlu1 %v5204_v44, %s2712_s18  ;;  %1369 = vrot.lane.b32.xlu0 %v5171_v59, %s2712_s18  ;;  %v5208_v59 = vrot.slane %v5207_v9, 7 }
 0x205   : > { %v1484_v15 = vpop.permute.xlu1 %1483  ;;  %v4319_v17 = vpop.permute.xlu0 %1167  ;;  %v656_v2 = vsel %vm523_vm0, %v5208_v59, 0.0 }
 0x206   : > { %v856_v0 = vrot.slane %v656_v2, 1  ;;  %v1852_v60 = vsel %vm1829_vm3, %v1819_v58, %v1484_v15  ;;  %v861_v30 = vrot.slane %v656_v2, 2  ;;  %v5213_v15 = vld [vmem:[#allocation4_spill] sm:$0xff]  ;;  %v1739_v37 = vsel %vm1730_vm13, %v3780_v53, %v4319_v17 }
 0x207   : > { %1401 = vrot.lane.b32.xlu1 %v5205_v56, %s2712_s18  ;;  %1463 = vrot.lane.b32.xlu0 %v5206_v6, %s2713_s25 }
 0x208   : > { %v857_v34 = vsel %vm689_vm1, %v854_v21, %v856_v0  ;;  %v862_v31 = vsel %vm770_vm2, %v859_v38, %v861_v30  ;;  %v5212_v21 = vld [vmem:[#allocation24_spill] sm:$0xff]  ;;  %v5218_v0 = vld [vmem:[#allocation57_spill] sm:$0xff]  ;;  %vm2225_vm1 = vcmask (!%p2537_p4), 25600  }
 0x209   : > { %v4326_v23 = vpop.permute.xlu1 %1199  ;;  %v1454_v19 = vpop.permute.xlu0 %1453 }
 0x20a   : > { %v1837_v13 = vsel %vm1829_vm3, %v1804_v41, %v1454_v19  ;;  %v1755_v8 = vsel %vm1730_vm13, %v5216_v14, %v4326_v23  ;;  %v5224_v14 = vld [vmem:[#allocation30_spill] sm:$0xff] }
 0x20b   : > { %1495 = vrot.lane.b32.xlu1 %v855_v47, %s2713_s25  ;;  %1179 = vrot.lane.b32.xlu0 %v5206_v6, %s2710_s16 }
 0x20d   : > { %v1486_v52 = vpop.permute.xlu1 %1485  ;;  %v1548_v49 = vpop.permute.xlu0 %1547 }
 0x20e   : > { %v1869_v51 = vsel %vm1862_vm4, %v1836_v11, %v1548_v49  ;;  %v1853_v29 = vsel %vm1829_vm3, %v1820_v40, %v1486_v52 }
 0x20f   : > { %1211 = vrot.lane.b32.xlu1 %v855_v47, %s2710_s16  ;;  %1465 = vrot.lane.b32.xlu0 %v5209_v57, %s2713_s25  ;;  %v5214_v47 = vld [vmem:[#allocation25_spill] sm:$0xff] }
 0x210   : > { %2598 = vmatprep.mubr.msk.f32.mxu0 %vm1895_vm5, %v1869_v51 }
 0x211   : > { %v1580_v32 = vpop.permute.xlu1 %1579  ;;  %v4354_v42 = vpop.permute.xlu0 %1169 }
 0x212   : > { %v1885_v45 = vsel %vm1862_vm4, %v1852_v60, %v1580_v32 }
 0x213   : > { %1497 = vrot.lane.b32.xlu1 %v857_v34, %s2713_s25  ;;  %1559 = vrot.lane.b32.xlu0 %v5210_v12, %s2714_s9 }
 0x214   : > { %2622 = vmatprep.mubr.msk.f32.mxu1 %vm1895_vm5, %v1885_v45  ;;  %v5220_v45 = vld [vmem:[#allocation59_spill] sm:$0xff] }
 0x215   : > { %v4362_v28 = vpop.permute.xlu1 %1201  ;;  %v1264_v7 = vpop.permute.xlu0 %1263 }
 0x216   : > { %v1772_v24 = vsel %vm1763_vm14, %v1739_v37, %v1264_v7 }
 0x217   : > { %1591 = vrot.lane.b32.xlu1 %v860_v4, %s2714_s9  ;;  %1181 = vrot.lane.b32.xlu0 %v5209_v57, %s2710_s16  ;;  %v5219_v57 = vld [vmem:[#allocation96_spill] sm:$0xff] }
 0x218   : > { %v1740_v35 = vsel %vm1730_vm13, %v5219_v57, %v4354_v42 }
 0x219   : > { %v1296_v61 = vpop.permute.xlu1 %1295  ;;  %v1550_v27 = vpop.permute.xlu0 %1549 }
 0x21a   : > { %v1870_v55 = vsel %vm1862_vm4, %v1837_v13, %v1550_v27  ;;  %v1788_v17 = vsel %vm1763_vm14, %v1755_v8, %v1296_v61 }
 0x21b   : > { %1213 = vrot.lane.b32.xlu1 %v857_v34, %s2710_s16  ;;  %1275 = vrot.lane.b32.xlu0 %v5210_v12, %s2711_s17  ;;  %v1756_v12 = vsel %vm1730_vm13, %v5220_v45, %v4362_v28 }
 0x21c   : > { %2599 = vmatmul.mubr.msk.f32.gmra.mrb[6].mxu0 %vm1895_vm5, %v1870_v55 }
 0x21d   : > { %v1582_v18 = vpop.permute.xlu1 %1581  ;;  %v1266_v39 = vpop.permute.xlu0 %1265 }
 0x21e   : > { %v1886_v43 = vsel %vm1862_vm4, %v1853_v29, %v1582_v18  ;;  %v1773_v38 = vsel %vm1763_vm14, %v1740_v35, %v1266_v39  ;;  %v5221_v39 = vld [vmem:[#allocation97_spill] sm:$0xff] }
 0x21f   : > { %1307 = vrot.lane.b32.xlu1 %v860_v4, %s2711_s17  ;;  %1561 = vrot.lane.b32.xlu0 %v5211_v48, %s2714_s9 }
 0x220   : > { %2623 = vmatmul.mubr.msk.f32.gmra.mrb[6].mxu1 %vm1895_vm5, %v1886_v43 }
 0x221   : > { %v1298_v3 = vpop.permute.xlu1 %1297  ;;  %v1360_v16 = vpop.permute.xlu0 %1359 }
 0x222   : > { %v1805_v19 = vsel %vm1796_vm15, %v1772_v24, %v1360_v16  ;;  %v1789_v7 = vsel %vm1763_vm14, %v1756_v12, %v1298_v3  ;;  %v5225_v12 = vld [vmem:[#allocation99_spill] sm:$0xff] }
 0x223   : > { %1593 = vrot.lane.b32.xlu1 %v862_v31, %s2714_s9  ;;  %1277 = vrot.lane.b32.xlu0 %v5211_v48, %s2711_s17 }
 0x225   : > { %v1392_v26 = vpop.permute.xlu1 %1391  ;;  %v1362_v1 = vpop.permute.xlu0 %1361 }
 0x226   : > { %v1821_v11 = vsel %vm1796_vm15, %v1788_v17, %v1392_v26  ;;  %v1806_v58 = vsel %vm1796_vm15, %v1773_v38, %v1362_v1  ;;  %v5222_v1 = vld [vmem:[#allocation75_spill] sm:$0xff] }
 0x227   : > { %1309 = vrot.lane.b32.xlu1 %v862_v31, %s2711_s17  ;;  %1371 = vrot.lane.b32.xlu0 %v5180_v20, %s2712_s18 }
 0x229   : > { %v1394_v22 = vpop.permute.xlu1 %1393  ;;  %v1456_v44 = vpop.permute.xlu0 %1455 }
 0x22a   : > { %v1838_v9 = vsel %vm1829_vm3, %v1805_v19, %v1456_v44  ;;  %v1822_v42 = vsel %vm1796_vm15, %v1789_v7, %v1394_v22 }
 0x22b   : > { %2681 = vrot.lane.b32.xlu1 %v2680_v63, %s2712_s18  ;;  %1373 = vrot.lane.b32.xlu0 %v5192_v46, %s2712_s18  ;;  %v5215_v46 = vld [vmem:[#allocation56_spill] sm:$0xff] }
 0x22d   : > { %v1488_v33 = vpop.permute.xlu1 %1487  ;;  %v1172_v56 = vpop.permute.xlu0 %1171 }
 0x22e   : > { %v1854_v52 = vsel %vm1829_vm3, %v1821_v11, %v1488_v33  ;;  %v1741_v43 = vsel %vm1730_vm13, %v5221_v39, %v1172_v56 }
 0x22f   : > { %1467 = vrot.lane.b32.xlu1 %v5212_v21, %s2713_s25  ;;  %2686 = vrot.lane.b32.xlu0 %v5213_v15, %s2713_s25 }
 0x231   : > { %v1204_v6 = vpop.permute.xlu1 %1203  ;;  %v1458_v20 = vpop.permute.xlu0 %1457 }
 0x232   : > { %v1839_v34 = vsel %vm1829_vm3, %v1806_v58, %v1458_v20  ;;  %v1757_v63 = vsel %vm1730_vm13, %v5222_v1, %v1204_v6 }
 0x233   : > { %1469 = vrot.lane.b32.xlu1 %v5214_v47, %s2713_s25  ;;  %1563 = vrot.lane.b32.xlu0 %v5215_v46, %s2714_s9  ;;  %v5223_v47 = vld [vmem:[#allocation98_spill] sm:$0xff] }
 0x235   : > { %v1490_v59 = vpop.permute.xlu1 %1489  ;;  %v1552_v2 = vpop.permute.xlu0 %1551 }
 0x236   : > { %v1871_v53 = vsel %vm1862_vm4, %v1838_v9, %v1552_v2  ;;  %v1855_v54 = vsel %vm1829_vm3, %v1822_v42, %v1490_v59 }
 0x237   : > { %2691 = vrot.lane.b32.xlu1 %v5217_v5, %s2714_s9  ;;  %1565 = vrot.lane.b32.xlu0 %v5218_v0, %s2714_s9 }
 0x238   : > { %2601 = vmatprep.mubr.msk.f32.mxu0 %vm1895_vm5, %v1871_v53 }
 0x239   : > { %v1584_v49 = vpop.permute.xlu1 %1583  ;;  %v1174_v10 = vpop.permute.xlu0 %1173 }
 0x23a   : > { %v1887_v23 = vsel %vm1862_vm4, %v1854_v52, %v1584_v49  ;;  %v1742_v6 = vsel %vm1730_vm13, %v5223_v47, %v1174_v10 }
 0x23b   : > { %2625 = vmatprep.mubr.msk.f32.mxu1 %vm1895_vm5, %v1887_v23 }
 0x23d   : > { %v1206_v51 = vpop.permute.xlu1 %1205  ;;  %v1268_v50 = vpop.permute.xlu0 %1267 }
 0x23e   : > { %v1774_v48 = vsel %vm1763_vm14, %v1741_v43, %v1268_v50  ;;  %v1758_v8 = vsel %vm1730_vm13, %v5224_v14, %v1206_v51 }
 0x241   : > { %v1300_v60 = vpop.permute.xlu1 %1299  ;;  %v1554_v32 = vpop.permute.xlu0 %1553 }
 0x242   : > { %v1872_v4 = vsel %vm1862_vm4, %v1839_v34, %v1554_v32  ;;  %v1790_v44 = vsel %vm1763_vm14, %v1757_v63, %v1300_v60 }
 0x243   : > { %2602 = vmatmul.mubr.msk.f32.gmra.mrb[8].mxu0 %vm1895_vm5, %v1872_v4 }
 0x245   : > { %v1586_v36 = vpop.permute.xlu1 %1585  ;;  %v1270_v41 = vpop.permute.xlu0 %1269 }
 0x246   : > { %v1888_v13 = vsel %vm1862_vm4, %v1855_v54, %v1586_v36  ;;  %v1775_v46 = vsel %vm1763_vm14, %v1742_v6, %v1270_v41 }
 0x247   : > { %2626 = vmatmul.mubr.msk.f32.gmra.mrb[8].mxu1 %vm1895_vm5, %v1888_v13 }
 0x249   : > { %v1302_v61 = vpop.permute.xlu1 %1301  ;;  %v1364_v27 = vpop.permute.xlu0 %1363 }
 0x24a   : > { %v1807_v31 = vsel %vm1796_vm15, %v1774_v48, %v1364_v27  ;;  %v1791_v17 = vsel %vm1763_vm14, %v1758_v8, %v1302_v61  ;;  %v5226_v27 = vld [vmem:[#allocation91_spill] sm:$0xff] }
 0x24d   : > { %v1396_v62 = vpop.permute.xlu1 %1395  ;;  %v1366_v28 = vpop.permute.xlu0 %1365 }
 0x24e   : > { %v1823_v33 = vsel %vm1796_vm15, %v1790_v44, %v1396_v62  ;;  %v1808_v19 = vsel %vm1796_vm15, %v1775_v46, %v1366_v28 }
 0x251   : > { %v1398_v55 = vpop.permute.xlu1 %1397  ;;  %v1460_v25 = vpop.permute.xlu0 %1459 }
 0x252   : > { %v1840_v3 = vsel %vm1829_vm3, %v1807_v31, %v1460_v25  ;;  %v1824_v5 = vsel %vm1796_vm15, %v1791_v17, %v1398_v55  ;;  %v5227_v31 = vld [vmem:[#allocation28_spill] sm:$0xff] }
 0x255   : > { %v1492_v40 = vpop.permute.xlu1 %1491  ;;  %v1176_v30 = vpop.permute.xlu0 %1175 }
 0x256   : > { %v1856_v56 = vsel %vm1829_vm3, %v1823_v33, %v1492_v40  ;;  %v1743_v4 = vsel %vm1730_vm13, %v5225_v12, %v1176_v30 }
 0x259   : > { %v1208_v29 = vpop.permute.xlu1 %1207  ;;  %v1462_v18 = vpop.permute.xlu0 %1461 }
 0x25a   : > { %v1841_v9 = vsel %vm1829_vm3, %v1808_v19, %v1462_v18  ;;  %v1759_v62 = vsel %vm1730_vm13, %v5226_v27, %v1208_v29 }
 0x25d   : > { %v1494_v16 = vpop.permute.xlu1 %1493  ;;  %v1556_v26 = vpop.permute.xlu0 %1555 }
 0x25e   : > { %v1873_v22 = vsel %vm1862_vm4, %v1840_v3, %v1556_v26  ;;  %v1857_v0 = vsel %vm1829_vm3, %v1824_v5, %v1494_v16 }
 0x25f   : > { %2604 = vmatprep.mubr.msk.f32.mxu0 %vm1895_vm5, %v1873_v22  ;;  %v5228_v22 = vld [vmem:[#allocation76_spill] sm:$0xff] }
 0x261   : > { %v1588_v21 = vpop.permute.xlu1 %1587  ;;  %v1178_v15 = vpop.permute.xlu0 %1177 }
 0x262   : > { %v1889_v20 = vsel %vm1862_vm4, %v1856_v56, %v1588_v21  ;;  %v1744_v29 = vsel %vm1730_vm13, %v5227_v31, %v1178_v15 }
 0x263   : > { %2628 = vmatprep.mubr.msk.f32.mxu1 %vm1895_vm5, %v1889_v20 }
 0x265   : > { %v1210_v37 = vpop.permute.xlu1 %1209  ;;  %v1272_v24 = vpop.permute.xlu0 %1271 }
 0x266   : > { %v1776_v7 = vsel %vm1763_vm14, %v1743_v4, %v1272_v24  ;;  %v1760_v44 = vsel %vm1730_vm13, %v5228_v22, %v1210_v37  ;;  %v5232_v4 = vld [vmem:[#allocation77_spill] sm:$0xff] }
 0x269   : > { %v1304_v59 = vpop.permute.xlu1 %1303  ;;  %v1558_v2 = vpop.permute.xlu0 %1557 }
 0x26a   : > { %v1874_v53 = vsel %vm1862_vm4, %v1841_v9, %v1558_v2  ;;  %v1792_v55 = vsel %vm1763_vm14, %v1759_v62, %v1304_v59  ;;  %v5229_v2 = vld [vmem:[#allocation100_spill] sm:$0xff] }
 0x26b   : > { %2605 = vmatmul.mubr.msk.f32.gmra.mrb[10].mxu0 %vm1895_vm5, %v1874_v53 }
 0x26d   : > { %v1590_v11 = vpop.permute.xlu1 %1589  ;;  %v1274_v52 = vpop.permute.xlu0 %1273 }
 0x26e   : > { %v1890_v49 = vsel %vm1862_vm4, %v1857_v0, %v1590_v11  ;;  %v1777_v3 = vsel %vm1763_vm14, %v1744_v29, %v1274_v52 }
 0x26f   : > { %2629 = vmatmul.mubr.msk.f32.gmra.mrb[10].mxu1 %vm1895_vm5, %v1890_v49 }
 0x271   : > { %v1306_v10 = vpop.permute.xlu1 %1305  ;;  %v1368_v23 = vpop.permute.xlu0 %1367 }
 0x272   : > { %v1809_v54 = vsel %vm1796_vm15, %v1776_v7, %v1368_v23  ;;  %v1793_v56 = vsel %vm1763_vm14, %v1760_v44, %v1306_v10  ;;  %v5230_v10 = vld [vmem:[#allocation29_spill] sm:$0xff] }
 0x275   : > { %v1400_v50 = vpop.permute.xlu1 %1399  ;;  %v1370_v51 = vpop.permute.xlu0 %1369 }
 0x276   : > { %v1825_v25 = vsel %vm1796_vm15, %v1792_v55, %v1400_v50  ;;  %v1810_v16 = vsel %vm1796_vm15, %v1777_v3, %v1370_v51 }
 0x279   : > { %v1402_v57 = vpop.permute.xlu1 %1401  ;;  %v1464_v35 = vpop.permute.xlu0 %1463 }
 0x27a   : > { %v1842_v41 = vsel %vm1829_vm3, %v1809_v54, %v1464_v35  ;;  %v1826_v21 = vsel %vm1796_vm15, %v1793_v56, %v1402_v57  ;;  %v5231_v57 = vld [vmem:[#allocation31_spill] sm:$0xff] }
 0x27d   : > { %v1496_v38 = vpop.permute.xlu1 %1495  ;;  %v1180_v58 = vpop.permute.xlu0 %1179 }
 0x27e   : > { %v1858_v40 = vsel %vm1829_vm3, %v1825_v25, %v1496_v38  ;;  %v1745_v14 = vsel %vm1730_vm13, %v5229_v2, %v1180_v58 }
 0x27f   : > { %v4473_v34 = vpop.f32.mrb[0].mxu0 }
 0x280   : > { %v4475_v60 = vpop.f32.mrb[1].mxu0 }
 0x281   : > { %v1212_v32 = vpop.permute.xlu1 %1211  ;;  %v1466_v45 = vpop.permute.xlu0 %1465 }
 0x282   : > { %v1843_v26 = vsel %vm1829_vm3, %v1810_v16, %v1466_v45  ;;  %v1761_v35 = vsel %vm1730_vm13, %v5231_v57, %v1212_v32 }
 0x283   : > { %v4480_v42 = vpop.f32.mrb[0].mxu1 }
 0x284   : > { %v4483_v36 = vpop.f32.mrb[1].mxu1 }
 0x285   : > { %v1498_v13 = vpop.permute.xlu1 %1497  ;;  %v1560_v61 = vpop.permute.xlu0 %1559 }
 0x286   : > { %v1875_v28 = vsel %vm1862_vm4, %v1842_v41, %v1560_v61  ;;  %v1859_v15 = vsel %vm1829_vm3, %v1826_v21, %v1498_v13 }
 0x287   : > { %2607 = vmatprep.mubr.msk.f32.mxu0 %vm1895_vm5, %v1875_v28 }
 0x289   : > { %v1592_v30 = vpop.permute.xlu1 %1591  ;;  %v1182_v18 = vpop.permute.xlu0 %1181 }
 0x28a   : > { %v1891_v39 = vsel %vm1862_vm4, %v1858_v40, %v1592_v30  ;;  %v1746_v23 = vsel %vm1730_vm13, %v5230_v10, %v1182_v18 }
 0x28b   : > { %2631 = vmatprep.mubr.msk.f32.mxu1 %vm1895_vm5, %v1891_v39 }
 0x28d   : > { %v1214_v43 = vpop.permute.xlu1 %1213  ;;  %v1276_v48 = vpop.permute.xlu0 %1275 }
 0x28e   : > { %v1778_v8 = vsel %vm1763_vm14, %v1745_v14, %v1276_v48  ;;  %v1762_v7 = vsel %vm1730_vm13, %v5232_v4, %v1214_v43 }
 0x291   : > { %v1308_v1 = vpop.permute.xlu1 %1307  ;;  %v1562_v63 = vpop.permute.xlu0 %1561 }
 0x292   : > { %v1876_v33 = vsel %vm1862_vm4, %v1843_v26, %v1562_v63  ;;  %v1794_v54 = vsel %vm1763_vm14, %v1761_v35, %v1308_v1 }
 0x293   : > { %2608 = vmatmul.mubr.msk.f32.gmra.mrb[12].mxu0 %vm1895_vm5, %v1876_v33 }
 0x295   : > { %v1594_v20 = vpop.permute.xlu1 %1593  ;;  %v1278_v24 = vpop.permute.xlu0 %1277 }
 0x296   : > { %v1892_v47 = vsel %vm1862_vm4, %v1859_v15, %v1594_v20  ;;  %v1779_v38 = vsel %vm1763_vm14, %v1746_v23, %v1278_v24 }
 0x297   : > { %2632 = vmatmul.mubr.msk.f32.gmra.mrb[12].mxu1 %vm1895_vm5, %v1892_v47 }
 0x299   : > { %v1310_v6 = vpop.permute.xlu1 %1309  ;;  %v1372_v46 = vpop.permute.xlu0 %1371 }
 0x29a   : > { %v1811_v17 = vsel %vm1796_vm15, %v1778_v8, %v1372_v46  ;;  %v1795_v61 = vsel %vm1763_vm14, %v1762_v7, %v1310_v6  ;;  %v2715_v8 = vmov (!%p2537_p4), 0.0  }
 0x29b   : > { %2226 = vst.msk [vmem:[%s4869_s6] sm:$0x3] (!%p2537_p4), %vm2225_vm1, %v2715_v8 }
 0x29d   : > { %v2682_v19 = vpop.permute.xlu1 %2681  ;;  %v1374_v37 = vpop.permute.xlu0 %1373 }
 0x29e   : > { %v2683_v0 = vunpack.i.l.bf16 %v2682_v19  ;;  %v2684_v50 = vunpack.i.h.bf16 %v2682_v19  ;;  %v1812_v41 = vsel %vm1796_vm15, %v1779_v38, %v1374_v37 }
 0x2a0   : > { %v1827_v32 = vsel %vm1796_vm15, %v1794_v54, %v2683_v0  ;;  %v1828_v55 = vsel %vm1796_vm15, %v1795_v61, %v2684_v50 }
 0x2a1   : > { %v1468_v9 = vpop.permute.xlu1 %1467  ;;  %v2687_v59 = vpop.permute.xlu0 %2686 }
 0x2a2   : > { %v1844_v11 = vsel %vm1829_vm3, %v1811_v17, %v1468_v9  ;;  %v2689_v58 = vunpack.i.h.bf16 %v2687_v59  ;;  %v2688_v45 = vunpack.i.l.bf16 %v2687_v59 }
 0x2a3   : > { %v4512_v53 = vpop.f32.mrb[2].mxu0 }
 0x2a4   : > { %v4515_v5 = vpop.f32.mrb[3].mxu0  ;;  %v1860_v18 = vsel %vm1829_vm3, %v1827_v32, %v2688_v45  ;;  %v1861_v39 = vsel %vm1829_vm3, %v1828_v55, %v2689_v58 }
 0x2a5   : > { %v1470_v52 = vpop.permute.xlu1 %1469  ;;  %v1564_v49 = vpop.permute.xlu0 %1563 }
 0x2a6   : > { %v1877_v51 = vsel %vm1862_vm4, %v1844_v11, %v1564_v49  ;;  %v1845_v27 = vsel %vm1829_vm3, %v1812_v41, %v1470_v52 }
 0x2a7   : > { %v4524_v12 = vpop.f32.mrb[2].mxu1  ;;  %2610 = vmatprep.mubr.msk.f32.mxu0 %vm1895_vm5, %v1877_v51 }
 0x2a8   : > { %v4531_v13 = vpop.f32.mrb[3].mxu1 }
 0x2a9   : > { %v2692_v62 = vpop.permute.xlu1 %2691  ;;  %v1566_v28 = vpop.permute.xlu0 %1565 }
 0x2aa   : > { %v2694_v25 = vunpack.i.h.bf16 %v2692_v62  ;;  %v2693_v40 = vunpack.i.l.bf16 %v2692_v62  ;;  %v1878_v30 = vsel %vm1862_vm4, %v1845_v27, %v1566_v28 }
 0x2ab   : > { %2611 = vmatmul.mubr.msk.f32.gmra.mrb[14].mxu0 %vm1895_vm5, %v1878_v30 }
 0x2ac   : > { %v1893_v43 = vsel %vm1862_vm4, %v1860_v18, %v2693_v40  ;;  %v1894_v48 = vsel %vm1862_vm4, %v1861_v39, %v2694_v25 }
 0x2ad   : > { %2634 = vmatprep.mubr.msk.f32.mxu1 %vm1895_vm5, %v1893_v43 }
 0x2ae   : > { %2635 = vmatmul.mubr.msk.f32.gmra.mrb[14].mxu1 %vm1895_vm5, %v1894_v48 }
 0x2c7   : > { %v4545_v31 = vpop.f32.mrb[4].mxu0 }
 0x2c8   : > { %v4547_v29 = vpop.f32.mrb[5].mxu0 }
 0x2cb   : > { %v4549_v3 = vpop.f32.mrb[4].mxu1 }
 0x2cc   : > { %v4551_v16 = vpop.f32.mrb[5].mxu1 }
 0x2ef   : > { %v4553_v26 = vpop.f32.mrb[6].mxu0 }
 0x2f0   : > { %v4555_v1 = vpop.f32.mrb[7].mxu0 }
 0x2f3   : > { %v4557_v63 = vpop.f32.mrb[6].mxu1 }
 0x2f4   : > { %v4559_v22 = vpop.f32.mrb[7].mxu1 }
 0x316   : > { %v4561_v44 = vpop.f32.mrb[8].mxu0 }
 0x317   : > { %v4563_v33 = vpop.f32.mrb[9].mxu0 }
 0x31a   : > { %v4565_v56 = vpop.f32.mrb[8].mxu1 }
 0x31b   : > { %v4567_v21 = vpop.f32.mrb[9].mxu1 }
 0x33e   : > { %v4569_v15 = vpop.f32.mrb[10].mxu0 }
 0x33f   : > { %v4571_v20 = vpop.f32.mrb[11].mxu0 }
 0x342   : > { %v4573_v24 = vpop.f32.mrb[10].mxu1 }
 0x343   : > { %v4575_v47 = vpop.f32.mrb[11].mxu1 }
 0x366   : > { %v4577_v6 = vpop.f32.mrb[12].mxu0 }
 0x367   : > { %v4579_v46 = vpop.f32.mrb[13].mxu0 }
 0x36a   : > { %v4581_v19 = vpop.f32.mrb[12].mxu1 }
 0x36b   : > { %v4583_v37 = vpop.f32.mrb[13].mxu1 }
 0x37c   : > { %2224 = sbr.rel (%p2537_p4) target bundleno = 899 (0x383), region = 44 }
 0x37e   : > { %v4585_v9 = vpop.f32.mrb[14].mxu0 }
 0x37f   : > { %v4587_v59 = vpop.f32.mrb[15].mxu0 }
 0x381   : > { %v4589_v2 = vpop.f32.mrb[14].mxu1 }
 0x382   : > { %v4591_v14 = vpop.f32.mrb[15].mxu1 }
 0x383 PF: > { %v2228_v17 = vsel %vm1631_vm10, %v4475_v60, 0.0  ;;  %v2229_v0 = vsel %vm1631_vm10, %v4473_v34, 0.0  ;;  %v2231_v11 = vsel %vm1631_vm10, %v4515_v5, 0.0  ;;  %2402 = vst.msk [vmem:[%s2782_s29] sm:$0xff] %vm1631_vm10, %v4475_v60  ;;  %2403 = vst.msk [vmem:[%s2782_s29 + $0x8] sm:$0xff] %vm1631_vm10, %v4473_v34  ;;  %v2233_v49 = vsel %vm1631_vm10, %v4512_v53, 0.0 }
 0x384   : > { %2404 = vst.msk [vmem:[%s2782_s29 + $0x10] sm:$0xff] %vm1631_vm10, %v4515_v5  ;;  %2405 = vst.msk [vmem:[%s2782_s29 + $0x18] sm:$0xff] %vm1631_vm10, %v4512_v53  ;;  %v2230_v52 = vadd.f32 %v2229_v0, %v2228_v17  ;;  %v2235_v23 = vsel %vm1631_vm10, %v4547_v29, 0.0  ;;  %v2237_v51 = vsel %vm1631_vm10, %v4545_v31, 0.0  ;;  %v2239_v35 = vsel %vm1631_vm10, %v4555_v1, 0.0 }
 0x385   : > { %2406 = vst.msk [vmem:[%s2782_s29 + $0x20] sm:$0xff] %vm1631_vm10, %v4547_v29  ;;  %2407 = vst.msk [vmem:[%s2782_s29 + $0x28] sm:$0xff] %vm1631_vm10, %v4545_v31  ;;  %v2241_v58 = vsel %vm1631_vm10, %v4553_v26, 0.0  ;;  %v2243_v4 = vsel %vm1631_vm10, %v4563_v33, 0.0  ;;  %v2245_v54 = vsel %vm1631_vm10, %v4561_v44, 0.0  ;;  %v2297_v41 = vmul.f32 %v4475_v60, %v4475_v60 }
 0x386   : > { %2408 = vst.msk [vmem:[%s2782_s29 + $0x30] sm:$0xff] %vm1631_vm10, %v4555_v1  ;;  %2409 = vst.msk [vmem:[%s2782_s29 + $0x38] sm:$0xff] %vm1631_vm10, %v4553_v26  ;;  %v2232_v10 = vadd.f32 %v2231_v11, %v2230_v52  ;;  %v2298_v61 = vmul.f32 %v4473_v34, %v4473_v34  ;;  %v2299_v32 = vmul.f32 %v4515_v5, %v4515_v5  ;;  %v2247_v62 = vsel %vm1631_vm10, %v4571_v20, 0.0 }
 0x387   : > { %2410 = vst.msk [vmem:[%s2782_s29 + $0x40] sm:$0xff] %vm1631_vm10, %v4563_v33  ;;  %2411 = vst.msk [vmem:[%s2782_s29 + $0x48] sm:$0xff] %vm1631_vm10, %v4561_v44  ;;  %v2300_v28 = vmul.f32 %v4512_v53, %v4512_v53  ;;  %v2249_v25 = vsel %vm1631_vm10, %v4569_v15, 0.0  ;;  %v2301_v60 = vmul.f32 %v4547_v29, %v4547_v29  ;;  %v2329_v40 = vsel %vm1631_vm10, %v2297_v41, 0.0 }
 0x388   : > { %2412 = vst.msk [vmem:[%s2782_s29 + $0x50] sm:$0xff] %vm1631_vm10, %v4571_v20  ;;  %2413 = vst.msk [vmem:[%s2782_s29 + $0x58] sm:$0xff] %vm1631_vm10, %v4569_v15  ;;  %v2234_v50 = vadd.f32 %v2233_v49, %v2232_v10  ;;  %v2330_v34 = vsel %vm1631_vm10, %v2298_v61, 0.0  ;;  %v2332_v5 = vsel %vm1631_vm10, %v2299_v32, 0.0  ;;  %v2251_v39 = vsel %vm1631_vm10, %v4579_v46, 0.0 }
 0x389   : > { %2414 = vst.msk [vmem:[%s2782_s29 + $0x60] sm:$0xff] %vm1631_vm10, %v4579_v46  ;;  %2415 = vst.msk [vmem:[%s2782_s29 + $0x68] sm:$0xff] %vm1631_vm10, %v4577_v6  ;;  %v2331_v18 = vadd.f32 %v2330_v34, %v2329_v40  ;;  %v2302_v53 = vmul.f32 %v4545_v31, %v4545_v31  ;;  %v2334_v43 = vsel %vm1631_vm10, %v2300_v28, 0.0  ;;  %v2253_v29 = vsel %vm1631_vm10, %v4577_v6, 0.0 }
 0x38a   : > { %2416 = vst.msk [vmem:[%s2782_s29 + $0x70] sm:$0xff] %vm1631_vm10, %v4587_v59  ;;  %2417 = vst.msk [vmem:[%s2782_s29 + $0x78] sm:$0xff] %vm1631_vm10, %v4585_v9  ;;  %v2236_v57 = vadd.f32 %v2235_v23, %v2234_v50  ;;  %v2303_v17 = vmul.f32 %v4555_v1, %v4555_v1  ;;  %v2336_v0 = vsel %vm1631_vm10, %v2301_v60, 0.0  ;;  %v2255_v49 = vsel %vm1631_vm10, %v4587_v59, 0.0 }
 0x38b   : > { %2418 = vst.msk [vmem:[%s2782_s29 + $0x80] sm:$0xff] %vm1631_vm10, %v4483_v36  ;;  %2419 = vst.msk [vmem:[%s2782_s29 + $0x88] sm:$0xff] %vm1631_vm10, %v4480_v42  ;;  %v2333_v8 = vadd.f32 %v2332_v5, %v2331_v18  ;;  %v2304_v31 = vmul.f32 %v4553_v26, %v4553_v26  ;;  %v2338_v10 = vsel %vm1631_vm10, %v2302_v53, 0.0  ;;  %v2305_v1 = vmul.f32 %v4563_v33, %v4563_v33 }
 0x38c   : > { %2420 = vst.msk [vmem:[%s2782_s29 + $0x90] sm:$0xff] %vm1631_vm10, %v4531_v13  ;;  %2421 = vst.msk [vmem:[%s2782_s29 + $0x98] sm:$0xff] %vm1631_vm10, %v4524_v12  ;;  %v2238_v38 = vadd.f32 %v2237_v51, %v2236_v57  ;;  %v2257_v51 = vsel %vm1631_vm10, %v4585_v9, 0.0  ;;  %v2340_v57 = vsel %vm1631_vm10, %v2303_v17, 0.0  ;;  %v2306_v26 = vmul.f32 %v4561_v44, %v4561_v44 }
 0x38d   : > { %2422 = vst.msk [vmem:[%s2782_s29 + $0xa0] sm:$0xff] %vm1631_vm10, %v4551_v16  ;;  %2423 = vst.msk [vmem:[%s2782_s29 + $0xa8] sm:$0xff] %vm1631_vm10, %v4549_v3  ;;  %v2335_v52 = vadd.f32 %v2334_v43, %v2333_v8  ;;  %v2307_v33 = vmul.f32 %v4571_v20, %v4571_v20  ;;  %v2344_v41 = vsel %vm1631_vm10, %v2305_v1, 0.0  ;;  %v2308_v44 = vmul.f32 %v4569_v15, %v4569_v15 }
 0x38e   : > { %2424 = vst.msk [vmem:[%s2782_s29 + $0xb0] sm:$0xff] %vm1631_vm10, %v4559_v22  ;;  %2425 = vst.msk [vmem:[%s2782_s29 + $0xb8] sm:$0xff] %vm1631_vm10, %v4557_v63  ;;  %v2240_v45 = vadd.f32 %v2239_v35, %v2238_v38  ;;  %v2309_v20 = vmul.f32 %v4579_v46, %v4579_v46  ;;  %v2267_v5 = vsel %vm1631_vm10, %v4551_v16, 0.0  ;;  %v2310_v15 = vmul.f32 %v4577_v6, %v4577_v6 }
 0x38f   : > { %2426 = vst.msk [vmem:[%s2782_s29 + $0xc0] sm:$0xff] %vm1631_vm10, %v4567_v21  ;;  %2427 = vst.msk [vmem:[%s2782_s29 + $0xc8] sm:$0xff] %vm1631_vm10, %v4565_v56  ;;  %v2337_v50 = vadd.f32 %v2336_v0, %v2335_v52  ;;  %v2348_v60 = vsel %vm1631_vm10, %v2307_v33, 0.0  ;;  %v2269_v53 = vsel %vm1631_vm10, %v4549_v3, 0.0  ;;  %v2311_v46 = vmul.f32 %v4587_v59, %v4587_v59 }
 0x390   : > { %2428 = vst.msk [vmem:[%s2782_s29 + $0xd0] sm:$0xff] %vm1631_vm10, %v4575_v47  ;;  %2429 = vst.msk [vmem:[%s2782_s29 + $0xd8] sm:$0xff] %vm1631_vm10, %v4573_v24  ;;  %v2242_v7 = vadd.f32 %v2241_v58, %v2240_v45  ;;  %v2259_v58 = vsel %vm1631_vm10, %v4483_v36, 0.0  ;;  %v2342_v45 = vsel %vm1631_vm10, %v2304_v31, 0.0  ;;  %v2352_v43 = vsel %vm1631_vm10, %v2309_v20, 0.0 }
 0x391   : > { %2430 = vst.msk [vmem:[%s2782_s29 + $0xe0] sm:$0xff] %vm1631_vm10, %v4583_v37  ;;  %2431 = vst.msk [vmem:[%s2782_s29 + $0xe8] sm:$0xff] %vm1631_vm10, %v4581_v19  ;;  %v2339_v38 = vadd.f32 %v2338_v10, %v2337_v50  ;;  %v2312_v6 = vmul.f32 %v4585_v9, %v4585_v9  ;;  %v2354_v17 = vsel %vm1631_vm10, %v2310_v15, 0.0  ;;  %v2273_v52 = vsel %vm1631_vm10, %v4557_v63, 0.0 }
 0x392   : > { %2432 = vst.msk [vmem:[%s2782_s29 + $0xf0] sm:$0xff] %vm1631_vm10, %v4591_v14  ;;  %2433 = vst.msk [vmem:[%s2782_s29 + $0xf8] sm:$0xff] %vm1631_vm10, %v4589_v2  ;;  %v2244_v27 = vadd.f32 %v2243_v4, %v2242_v7  ;;  %v2313_v59 = vmul.f32 %v4483_v36, %v4483_v36  ;;  %v2314_v9 = vmul.f32 %v4480_v42, %v4480_v42  ;;  %vm2400_vm2 = vcmask 25600  }
 0x393   : > { %v2341_v7 = vadd.f32 %v2340_v57, %v2339_v38  ;;  %v2358_v50 = vsel %vm1631_vm10, %v2312_v6, 0.0  ;;  %v2277_v57 = vsel %vm1631_vm10, %v4565_v56, 0.0  ;;  %v2315_v36 = vmul.f32 %v4531_v13, %v4531_v13 }
 0x394   : > { %v2246_v55 = vadd.f32 %v2245_v54, %v2244_v27  ;;  %v2261_v54 = vsel %vm1631_vm10, %v4480_v42, 0.0  ;;  %v2263_v27 = vsel %vm1631_vm10, %v4531_v13, 0.0  ;;  %v2316_v42 = vmul.f32 %v4524_v12, %v4524_v12 }
 0x395   : > { %v2343_v32 = vadd.f32 %v2342_v45, %v2341_v7  ;;  %v2362_v45 = vsel %vm1631_vm10, %v2314_v9, 0.0  ;;  %v2317_v13 = vmul.f32 %v4551_v16, %v4551_v16  ;;  %v2364_v33 = vsel %vm1631_vm10, %v2315_v36, 0.0 }
 0x396   : > { %v2248_v30 = vadd.f32 %v2247_v62, %v2246_v55  ;;  %v2346_v62 = vsel %vm1631_vm10, %v2306_v26, 0.0  ;;  %v2279_v26 = vsel %vm1631_vm10, %v4575_v47, 0.0  ;;  %v2319_v16 = vmul.f32 %v4559_v22, %v4559_v22 }
 0x397   : > { %v2345_v55 = vadd.f32 %v2344_v41, %v2343_v32  ;;  %v2283_v32 = vsel %vm1631_vm10, %v4583_v37, 0.0  ;;  %v2321_v15 = vmul.f32 %v4567_v21, %v4567_v21 }
 0x398   : > { %v2250_v48 = vadd.f32 %v2249_v25, %v2248_v30  ;;  %v2265_v25 = vsel %vm1631_vm10, %v4524_v12, 0.0  ;;  %v2350_v30 = vsel %vm1631_vm10, %v2308_v44, 0.0  ;;  %v2318_v12 = vmul.f32 %v4549_v3, %v4549_v3 }
 0x399   : > { %v2347_v34 = vadd.f32 %v2346_v62, %v2345_v55  ;;  %v2368_v55 = vsel %vm1631_vm10, %v2317_v13, 0.0 }
 0x39a   : > { %v2252_v11 = vadd.f32 %v2251_v39, %v2250_v48 }
 0x39b   : > { %v2349_v39 = vadd.f32 %v2348_v60, %v2347_v34  ;;  %v2320_v60 = vmul.f32 %v4557_v63, %v4557_v63 }
 0x39c   : > { %v2254_v23 = vadd.f32 %v2253_v29, %v2252_v11  ;;  %v2271_v29 = vsel %vm1631_vm10, %v4559_v22, 0.0 }
 0x39d   : > { %v2351_v8 = vadd.f32 %v2350_v30, %v2349_v39  ;;  %v2372_v30 = vsel %vm1631_vm10, %v2319_v16, 0.0  ;;  %v2374_v39 = vsel %vm1631_vm10, %v2320_v60, 0.0 }
 0x39e   : > { %v2256_v35 = vadd.f32 %v2255_v49, %v2254_v23  ;;  %v2356_v49 = vsel %vm1631_vm10, %v2311_v46, 0.0  ;;  %v2275_v23 = vsel %vm1631_vm10, %v4567_v21, 0.0  ;;  %v2289_v46 = vsel %vm1631_vm10, %v4589_v2, 0.0 }
 0x39f   : > { %v2353_v11 = vadd.f32 %v2352_v43, %v2351_v8  ;;  %v2323_v43 = vmul.f32 %v4575_v47, %v4575_v47  ;;  %v2324_v21 = vmul.f32 %v4573_v24, %v4573_v24 }
 0x3a0   : > { %v2258_v4 = vadd.f32 %v2257_v51, %v2256_v35  ;;  %v2360_v35 = vsel %vm1631_vm10, %v2313_v59, 0.0 }
 0x3a1   : > { %v2355_v10 = vadd.f32 %v2354_v17, %v2353_v11  ;;  %v2325_v17 = vmul.f32 %v4583_v37, %v4583_v37  ;;  %v2382_v47 = vsel %vm1631_vm10, %v2324_v21, 0.0 }
 0x3a2   : > { %v2260_v61 = vadd.f32 %v2259_v58, %v2258_v4 }
 0x3a3   : > { %v2357_v1 = vadd.f32 %v2356_v49, %v2355_v10 }
 0x3a4   : > { %v2262_v28 = vadd.f32 %v2261_v54, %v2260_v61  ;;  %v2281_v54 = vsel %vm1631_vm10, %v4573_v24, 0.0  ;;  %v2327_v24 = vmul.f32 %v4591_v14, %v4591_v14 }
 0x3a5   : > { %v2359_v58 = vadd.f32 %v2358_v50, %v2357_v1 }
 0x3a6   : > { %v2264_v40 = vadd.f32 %v2263_v27, %v2262_v28  ;;  %v2366_v27 = vsel %vm1631_vm10, %v2316_v42, 0.0  ;;  %v2285_v28 = vsel %vm1631_vm10, %v4581_v19, 0.0 }
 0x3a7   : > { %v2361_v7 = vadd.f32 %v2360_v35, %v2359_v58 }
 0x3a8   : > { %v2266_v18 = vadd.f32 %v2265_v25, %v2264_v40  ;;  %v2370_v40 = vsel %vm1631_vm10, %v2318_v12, 0.0 }
 0x3a9   : > { %v2363_v61 = vadd.f32 %v2362_v45, %v2361_v7  ;;  %v2227_v7 = vld [vmem:[%s4869_s6] sm:$0x3] }
 0x3aa   : > { %v2268_v48 = vadd.f32 %v2267_v5, %v2266_v18  ;;  %v2287_v5 = vsel %vm1631_vm10, %v4591_v14, 0.0  ;;  %v2322_v18 = vmul.f32 %v4565_v56, %v4565_v56 }
 0x3ab   : > { %v2365_v62 = vadd.f32 %v2364_v33, %v2363_v61 }
 0x3ac   : > { %v2270_v0 = vadd.f32 %v2269_v53, %v2268_v48  ;;  %v2376_v48 = vsel %vm1631_vm10, %v2321_v15, 0.0 }
 0x3ad   : > { %v2367_v20 = vadd.f32 %v2366_v27, %v2365_v62 }
 0x3ae   : > { %v2272_v31 = vadd.f32 %v2271_v29, %v2270_v0  ;;  %v2378_v29 = vsel %vm1631_vm10, %v2322_v18, 0.0  ;;  %v2380_v0 = vsel %vm1631_vm10, %v2323_v43, 0.0 }
 0x3af   : > { %v2369_v34 = vadd.f32 %v2368_v55, %v2367_v20 }
 0x3b0   : > { %v2274_v51 = vadd.f32 %v2273_v52, %v2272_v31  ;;  %v2326_v52 = vmul.f32 %v4581_v19, %v4581_v19  ;;  %v2384_v31 = vsel %vm1631_vm10, %v2325_v17, 0.0 }
 0x3b1   : > { %v2371_v22 = vadd.f32 %v2370_v40, %v2369_v34 }
 0x3b2   : > { %v2276_v38 = vadd.f32 %v2275_v23, %v2274_v51  ;;  %v2328_v23 = vmul.f32 %v4589_v2, %v4589_v2  ;;  %v2386_v37 = vsel %vm1631_vm10, %v2326_v52, 0.0  ;;  %v2388_v51 = vsel %vm1631_vm10, %v2327_v24, 0.0 }
 0x3b3   : > { %v2373_v63 = vadd.f32 %v2372_v30, %v2371_v22 }
 0x3b4   : > { %v2278_v4 = vadd.f32 %v2277_v57, %v2276_v38  ;;  %v2390_v1 = vsel %vm1631_vm10, %v2328_v23, 0.0 }
 0x3b5   : > { %v2375_v8 = vadd.f32 %v2374_v39, %v2373_v63 }
 0x3b6   : > { %v2280_v41 = vadd.f32 %v2279_v26, %v2278_v4 }
 0x3b7   : > { %v2377_v56 = vadd.f32 %v2376_v48, %v2375_v8 }
 0x3b8   : > { %v2282_v44 = vadd.f32 %v2281_v54, %v2280_v41 }
 0x3b9   : > { %v2379_v11 = vadd.f32 %v2378_v29, %v2377_v56 }
 0x3ba   : > { %v2284_v25 = vadd.f32 %v2283_v32, %v2282_v44 }
 0x3bb   : > { %v2381_v49 = vadd.f32 %v2380_v0, %v2379_v11 }
 0x3bc   : > { %v2286_v3 = vadd.f32 %v2285_v28, %v2284_v25 }
 0x3bd   : > { %v2383_v10 = vadd.f32 %v2382_v47, %v2381_v49 }
 0x3be   : > { %v2288_v53 = vadd.f32 %v2287_v5, %v2286_v3 }
 0x3bf   : > { %v2385_v50 = vadd.f32 %v2384_v31, %v2383_v10 }
 0x3c0   : > { %v2290_v6 = vadd.f32 %v2289_v46, %v2288_v53 }
 0x3c1   : > { %v2387_v19 = vadd.f32 %v2386_v37, %v2385_v50 }
 0x3c2   : > { %v2291_v59 = vrot.slane %v2290_v6, 4 }
 0x3c3   : > { %v2389_v36 = vadd.f32 %v2388_v51, %v2387_v19 }
 0x3c4   : > { %v2292_v9 = vadd.f32 %v2291_v59, %v2290_v6 }
 0x3c5   : > { %v2391_v35 = vadd.f32 %v2390_v1, %v2389_v36 }
 0x3c6   : > { %v2293_v57 = vrot.slane %v2292_v9, 2 }
 0x3c7   : > { %v2392_v14 = vrot.slane %v2391_v35, 4 }
 0x3c8   : > { %v2294_v38 = vadd.f32 %v2293_v57, %v2292_v9 }
 0x3c9   : > { %v2393_v58 = vadd.f32 %v2392_v14, %v2391_v35 }
 0x3ca   : > { %v2295_v26 = vrot.slane %v2294_v38, 1 }
 0x3cb   : > { %v2394_v42 = vrot.slane %v2393_v58, 2 }
 0x3cc   : > { %v2296_v4 = vadd.f32 %v2295_v26, %v2294_v38 }
 0x3cd   : > { %v2395_v45 = vadd.f32 %v2394_v42, %v2393_v58 }
 0x3cf   : > { %v2396_v2 = vrot.slane %v2395_v45, 1 }
 0x3d1   : > { %v2397_v54 = vadd.f32 %v2396_v2, %v2395_v45 }
 0x3d3   : > { %v2398_v13 = vsel %vm523_vm0, %v2296_v4, %v2397_v54 }
 0x3d4   : > { %v2399_v33 = vadd.f32 %v2398_v13, %v2227_v7 }
 0x3d6   : > { %2401 = vst.msk [vmem:[%s4869_s6] sm:$0x3] %vm2400_vm2, %v2399_v33 }
 0x3d7 PF: > { %s17_s21 = sadd.s32 1, %s2703_s21  }
 0x3d8   : > { %p14_p5 = scmp.ge.s32.totalorder %s17_s21, 4  }
 0x3da   :  { %16 = sbr.rel (!%p14_p5) target bundleno = 1 (0x1), region = 82 }

</bundles_post_ra>
